<compile_context>
chip_gen: v6e
topology: v6e:2x2x1
jax: 0.10.0
libtpu: 0.0.40
codegen_flags: <defaults>
</compile_context>

<pallas_src>
import functools

import jax
import jax.numpy as jnp
import numpy as np
from jax.experimental import pallas as pl
from jax.experimental.pallas import tpu as pltpu

# ----------------------------- hyper-parameters ------------------------------
N_CHANNELS = 4
EMBED_DIM = 32
N_LAYERS = 2
N_HEADS = 4
FORWARD_MUL = 2
IMAGE_SIZE = 16
PATCH_SIZE = 4
N_CLASSES = 8
BATCH = 2
BATCH_BLOCK = 1                     # batch elements per grid step (parallel grid)

N_PATCHES = (IMAGE_SIZE // PATCH_SIZE) ** 2          # 16
SEQ = N_PATCHES + 1                                   # 17 real tokens
S_PAD = ((SEQ + 7) // 8) * 8                          # 24 rows (full sublanes)
CLS_ROW = N_PATCHES                                   # cls token row (8-aligned)
CPP = N_CHANNELS * PATCH_SIZE * PATCH_SIZE            # 64
FF = FORWARD_MUL * EMBED_DIM                          # 64
HEAD_DIM = EMBED_DIM // N_HEADS                       # 8
LN_EPS = 1e-5
NEG_INF = -1e30

# MXU operand dtype (accumulation is always f32).  bf16 operands cut the number
# of MXU passes ~2-3x on v6e/v7x; flip to jnp.float32 for exact f32 parity.
MM_DTYPE = jnp.bfloat16


# ------------------------------- kernel helpers -------------------------------
def _mm(a, b):
    """a @ b on the MXU: bf16 operands, f32 accumulate."""
    return jnp.dot(a.astype(MM_DTYPE), b.astype(MM_DTYPE),
                   preferred_element_type=jnp.float32)


def _mm_t(a, b):
    """a @ b.T (contract last dims of both) without an explicit transpose."""
    return jax.lax.dot_general(a.astype(MM_DTYPE), b.astype(MM_DTYPE),
                               (((1,), (1,)), ((), ())),
                               preferred_element_type=jnp.float32)


def _layernorm(x, gamma, beta):
    mu = jnp.mean(x, axis=-1, keepdims=True)
    var = jnp.mean((x - mu) ** 2, axis=-1, keepdims=True)
    return (x - mu) * jax.lax.rsqrt(var + LN_EPS) * gamma + beta


def _gelu(x):  # exact (erf) GELU, matches PyTorch activation='gelu'
    return 0.5 * x * (1.0 + jax.lax.erf(x * (1.0 / np.sqrt(2.0))))


# ------------------------------- fused kernel ---------------------------------
def vit_kernel(patches_ref, w_patch_ref, b_patch_ref, pos_ref, cls_ref,
               g1_ref, be1_ref, wqkv_ref, bqkv_ref, wo_ref, bo_ref,
               g2_ref, be2_ref, w1_ref, b1_ref, w2_ref, b2_ref,
               gf_ref, bef_ref, wc1_ref, bc1_ref, wc2_ref, bc2_ref,
               o_ref, *, bb):
    pad_rows = S_PAD - N_PATCHES      # 8 rows: cls token at local row 0, rest 0

    # ---- patch embedding: (bb*NP, CPP) @ (CPP, D) + bias (+ pos embedding) ---
    emb = _mm(patches_ref[0], w_patch_ref[...]) + b_patch_ref[...]

    # ---- register-resident, sublane-aligned token slab (bb*S_PAD, D) ---------
    #   rows [0, NP)        : patch tokens (+ pos embedding, as in EmbedLayer)
    #   row  NP (= CLS_ROW) : cls token   (no pos embedding, as in EmbedLayer)
    #   rows (NP, S_PAD)    : zero padding, masked out of attention
    if bb == 1:
        emb = emb + pos_ref[...]
        cls_blk = jnp.where(
            jax.lax.broadcasted_iota(jnp.int32, (pad_rows, EMBED_DIM), 0) == 0,
            cls_ref[...], 0.0)
        x = jnp.concatenate([emb, cls_blk], axis=0)                   # (S_PAD, D)
    else:
        emb = emb.reshape(bb, N_PATCHES, EMBED_DIM) + pos_ref[...][None]
        cls_blk = jnp.where(
            jax.lax.broadcasted_iota(jnp.int32, (bb, pad_rows, EMBED_DIM), 1) == 0,
            cls_ref[...][None], 0.0)
        x = jnp.concatenate([emb, cls_blk], axis=1).reshape(bb * S_PAD, EMBED_DIM)

    m = bb * S_PAD
    # attention mask: keys must be real tokens, and (batch folded into the
    # score N dimension when bb > 1) belong to the same batch element.
    if bb == 1:
        col = jax.lax.broadcasted_iota(jnp.int32, (m, m), 1)
        mask = jnp.where(col <= CLS_ROW, 0.0, NEG_INF).astype(jnp.float32)
    else:
        row = jax.lax.broadcasted_iota(jnp.int32, (m, m), 0)
        col = jax.lax.broadcasted_iota(jnp.int32, (m, m), 1)
        same = (row // S_PAD) == (col // S_PAD)
        real = (col % S_PAD) <= CLS_ROW
        mask = jnp.where(same & real, 0.0, NEG_INF).astype(jnp.float32)

    scale = 1.0 / np.sqrt(float(HEAD_DIM))

    # ------------------------- transformer encoder ---------------------------
    for layer in range(N_LAYERS):
        # --- multi-head self-attention (pre-norm), fused QKV matmul ---
        xn = _layernorm(x, g1_ref[layer], be1_ref[layer])
        qkv = _mm(xn, wqkv_ref[layer]) + bqkv_ref[layer]              # (m, 3D)
        head_outs = []
        for h in range(N_HEADS):                       # 8-lane register slices
            lo = h * HEAD_DIM
            qh = qkv[:, lo:lo + HEAD_DIM]
            kh = qkv[:, EMBED_DIM + lo:EMBED_DIM + lo + HEAD_DIM]
            vh = qkv[:, 2 * EMBED_DIM + lo:2 * EMBED_DIM + lo + HEAD_DIM]
            s = _mm_t(qh, kh) * scale + mask                          # (m, m)
            s = s - jnp.max(s, axis=-1, keepdims=True)
            p = jnp.exp(s)
            p = p * pl.reciprocal(jnp.sum(p, axis=-1, keepdims=True), approx=True)
            head_outs.append(_mm(p, vh))                              # (m, hd)
        # concat heads (lane concat) -> one lane-dense out-projection matmul
        attn = _mm(jnp.concatenate(head_outs, axis=-1), wo_ref[layer]) + bo_ref[layer]
        x = x + attn

        # --- feed-forward (pre-norm, exact GELU) ---
        xn = _layernorm(x, g2_ref[layer], be2_ref[layer])
        h1 = _gelu(_mm(xn, w1_ref[layer]) + b1_ref[layer])
        x = x + _mm(h1, w2_ref[layer]) + b2_ref[layer]

    # ---- final encoder LayerNorm + classifier on the cls row(s) only --------
    if bb == 1:
        cls_rows = x[CLS_ROW:CLS_ROW + 1, :]                          # (1, D)
    else:
        cls_rows = x.reshape(bb, S_PAD, EMBED_DIM)[:, CLS_ROW, :]     # (bb, D)
    xn = _layernorm(cls_rows, gf_ref[...], bef_ref[...])
    hc = jnp.tanh(_mm(xn, wc1_ref[...]) + bc1_ref[...])
    out = _mm(hc, wc2_ref[...]) + bc2_ref[...]
    o_ref[0] = out.astype(o_ref.dtype)


# --------------------------------- wrapper ------------------------------------
def _vit_forward(x_nchw, params, *, batch_block=BATCH_BLOCK):
    """NCHW image -> (B, N_CLASSES) logits via a batch-gridded Pallas kernel."""
    B, C, H, W = x_nchw.shape
    P = PATCH_SIZE
    assert B % batch_block == 0, "batch must be divisible by batch_block"
    nb = B // batch_block

    # extract non-overlapping patches; feature order (c, ph, pw) matches the
    # flattened Conv2d(kernel=stride=patch) weight
    p = x_nchw.reshape(B, C, H // P, P, W // P, P)
    p = p.transpose(0, 2, 4, 1, 3, 5).reshape(nb, batch_block * N_PATCHES, CPP)

    def w_spec(a):
        nd = a.ndim
        return pl.BlockSpec(a.shape, lambda i, nd=nd: (0,) * nd)

    mmw = lambda w: w.astype(MM_DTYPE)          # matmul weights travel as bf16
    operands = [
        p,
        mmw(params["w_patch"]), params["b_patch"], params["pos"], params["cls"],
        params["g1"], params["be1"],
        mmw(params["wqkv"]), params["bqkv"], mmw(params["wo"]), params["bo"],
        params["g2"], params["be2"],
        mmw(params["w1"]), params["b1"], mmw(params["w2"]), params["b2"],
        params["gf"], params["bef"],
        mmw(params["wc1"]), params["bc1"], mmw(params["wc2"]), params["bc2"],
    ]
    in_specs = ([pl.BlockSpec((1, batch_block * N_PATCHES, CPP),
                              lambda i: (i, 0, 0))]
                + [w_spec(a) for a in operands[1:]])

    out = pl.pallas_call(
        functools.partial(vit_kernel, bb=batch_block),
        grid=(nb,),
        in_specs=in_specs,
        out_specs=pl.BlockSpec((1, batch_block, N_CLASSES), lambda i: (i, 0, 0)),
        out_shape=jax.ShapeDtypeStruct((nb, batch_block, N_CLASSES), jnp.float32),
        compiler_params=pltpu.CompilerParams(
            dimension_semantics=("parallel",)),
    )(*operands)
    return out.reshape(B, N_CLASSES)


vit_forward = jax.jit(_vit_forward)


# ----------------------------- parameter init --------------------------------
def init_params(key):
    def tn(k, shape, std=0.02):
        return (std * jax.random.truncated_normal(k, -2.0, 2.0, shape)
                ).astype(jnp.float32)

    def zeros(*shape):
        return jnp.zeros(shape, jnp.float32)

    def ones(*shape):
        return jnp.ones(shape, jnp.float32)

    keys = iter(jax.random.split(key, 12))
    return {
        # patch embedding (conv weight (D, C, P, P) -> (CPP, D) matmul form)
        "w_patch": tn(next(keys), (CPP, EMBED_DIM)),
        "b_patch": zeros(1, EMBED_DIM),
        "pos": tn(next(keys), (N_PATCHES, EMBED_DIM)),
        "cls": tn(next(keys), (1, EMBED_DIM)),
        # stacked per-layer encoder weights; QKV fused on the lane axis
        "g1": ones(N_LAYERS, 1, EMBED_DIM),
        "be1": zeros(N_LAYERS, 1, EMBED_DIM),
        "wqkv": tn(next(keys), (N_LAYERS, EMBED_DIM, 3 * EMBED_DIM)),
        "bqkv": zeros(N_LAYERS, 1, 3 * EMBED_DIM),
        "wo": tn(next(keys), (N_LAYERS, EMBED_DIM, EMBED_DIM)),
        "bo": zeros(N_LAYERS, 1, EMBED_DIM),
        "g2": ones(N_LAYERS, 1, EMBED_DIM),
        "be2": zeros(N_LAYERS, 1, EMBED_DIM),
        "w1": tn(next(keys), (N_LAYERS, EMBED_DIM, FF)),
        "b1": zeros(N_LAYERS, 1, FF),
        "w2": tn(next(keys), (N_LAYERS, FF, EMBED_DIM)),
        "b2": zeros(N_LAYERS, 1, EMBED_DIM),
        # final encoder LayerNorm + classifier
        "gf": ones(1, EMBED_DIM),
        "bef": zeros(1, EMBED_DIM),
        "wc1": tn(next(keys), (EMBED_DIM, EMBED_DIM)),
        "bc1": zeros(1, EMBED_DIM),
        "wc2": tn(next(keys), (EMBED_DIM, N_CLASSES)),
        "bc2": zeros(1, N_CLASSES),
    }


# ----------------------------------- main -------------------------------------
if __name__ == "__main__":
    key = jax.random.PRNGKey(0)
    k_x, k_p = jax.random.split(key)
    x = jax.random.normal(k_x, (BATCH, N_CHANNELS, IMAGE_SIZE, IMAGE_SIZE),
                          dtype=jnp.float32)            # NCHW, like PyTorch
    params = init_params(k_p)

    logits = vit_forward(x, params)
    jax.block_until_ready(logits)
    assert logits.shape == (BATCH, N_CLASSES)
    assert bool(jnp.all(jnp.isfinite(logits)))
    print("KERNEL_OK")
</pallas_src>

<mosaic_0001>
module attributes {stable_mosaic.version = 11 : i64} {
  func.func @vit_kernel(%arg0: i32, %arg1: memref<1x16x64xf32, #tpu.memory_space<vmem>>, %arg2: memref<64x32xbf16, #tpu.memory_space<vmem>>, %arg3: memref<1x32xf32, #tpu.memory_space<vmem>>, %arg4: memref<16x32xf32, #tpu.memory_space<vmem>>, %arg5: memref<1x32xf32, #tpu.memory_space<vmem>>, %arg6: memref<2x1x32xf32, #tpu.memory_space<vmem>>, %arg7: memref<2x1x32xf32, #tpu.memory_space<vmem>>, %arg8: memref<2x32x96xbf16, #tpu.memory_space<vmem>>, %arg9: memref<2x1x96xf32, #tpu.memory_space<vmem>>, %arg10: memref<2x32x32xbf16, #tpu.memory_space<vmem>>, %arg11: memref<2x1x32xf32, #tpu.memory_space<vmem>>, %arg12: memref<2x1x32xf32, #tpu.memory_space<vmem>>, %arg13: memref<2x1x32xf32, #tpu.memory_space<vmem>>, %arg14: memref<2x32x64xbf16, #tpu.memory_space<vmem>>, %arg15: memref<2x1x64xf32, #tpu.memory_space<vmem>>, %arg16: memref<2x64x32xbf16, #tpu.memory_space<vmem>>, %arg17: memref<2x1x32xf32, #tpu.memory_space<vmem>>, %arg18: memref<1x32xf32, #tpu.memory_space<vmem>>, %arg19: memref<1x32xf32, #tpu.memory_space<vmem>>, %arg20: memref<32x32xbf16, #tpu.memory_space<vmem>>, %arg21: memref<1x32xf32, #tpu.memory_space<vmem>>, %arg22: memref<32x8xbf16, #tpu.memory_space<vmem>>, %arg23: memref<1x8xf32, #tpu.memory_space<vmem>>, %arg24: memref<1x1x8xf32, #tpu.memory_space<vmem>>) attributes {dimension_semantics = [#tpu.dimension_semantics<parallel>], iteration_bounds = array<i64: 2>, scalar_prefetch = 0 : i64, scratch_operands = 0 : i64, tpu.core_type = #tpu.core_type<tc>, window_params = [{transform_indices = @transform_0, window_bounds = array<i64: 1, 16, 64>}, {pipeline_mode = #tpu.pipeline_mode<synchronous>, transform_indices = @transform_1, window_bounds = array<i64: 64, 32>}, {pipeline_mode = #tpu.pipeline_mode<synchronous>, transform_indices = @transform_2, window_bounds = array<i64: 1, 32>}, {pipeline_mode = #tpu.pipeline_mode<synchronous>, transform_indices = @transform_3, window_bounds = array<i64: 16, 32>}, {pipeline_mode = #tpu.pipeline_mode<synchronous>, transform_indices = @transform_4, window_bounds = array<i64: 1, 32>}, {pipeline_mode = #tpu.pipeline_mode<synchronous>, transform_indices = @transform_5, window_bounds = array<i64: 2, 1, 32>}, {pipeline_mode = #tpu.pipeline_mode<synchronous>, transform_indices = @transform_6, window_bounds = array<i64: 2, 1, 32>}, {pipeline_mode = #tpu.pipeline_mode<synchronous>, transform_indices = @transform_7, window_bounds = array<i64: 2, 32, 96>}, {pipeline_mode = #tpu.pipeline_mode<synchronous>, transform_indices = @transform_8, window_bounds = array<i64: 2, 1, 96>}, {pipeline_mode = #tpu.pipeline_mode<synchronous>, transform_indices = @transform_9, window_bounds = array<i64: 2, 32, 32>}, {pipeline_mode = #tpu.pipeline_mode<synchronous>, transform_indices = @transform_10, window_bounds = array<i64: 2, 1, 32>}, {pipeline_mode = #tpu.pipeline_mode<synchronous>, transform_indices = @transform_11, window_bounds = array<i64: 2, 1, 32>}, {pipeline_mode = #tpu.pipeline_mode<synchronous>, transform_indices = @transform_12, window_bounds = array<i64: 2, 1, 32>}, {pipeline_mode = #tpu.pipeline_mode<synchronous>, transform_indices = @transform_13, window_bounds = array<i64: 2, 32, 64>}, {pipeline_mode = #tpu.pipeline_mode<synchronous>, transform_indices = @transform_14, window_bounds = array<i64: 2, 1, 64>}, {pipeline_mode = #tpu.pipeline_mode<synchronous>, transform_indices = @transform_15, window_bounds = array<i64: 2, 64, 32>}, {pipeline_mode = #tpu.pipeline_mode<synchronous>, transform_indices = @transform_16, window_bounds = array<i64: 2, 1, 32>}, {pipeline_mode = #tpu.pipeline_mode<synchronous>, transform_indices = @transform_17, window_bounds = array<i64: 1, 32>}, {pipeline_mode = #tpu.pipeline_mode<synchronous>, transform_indices = @transform_18, window_bounds = array<i64: 1, 32>}, {pipeline_mode = #tpu.pipeline_mode<synchronous>, transform_indices = @transform_19, window_bounds = array<i64: 32, 32>}, {pipeline_mode = #tpu.pipeline_mode<synchronous>, transform_indices = @transform_20, window_bounds = array<i64: 1, 32>}, {pipeline_mode = #tpu.pipeline_mode<synchronous>, transform_indices = @transform_21, window_bounds = array<i64: 32, 8>}, {pipeline_mode = #tpu.pipeline_mode<synchronous>, transform_indices = @transform_22, window_bounds = array<i64: 1, 8>}, {transform_indices = @transform_23, window_bounds = array<i64: 1, 1, 8>}]} {
    %c0 = arith.constant 0 : index
    %c0_0 = arith.constant 0 : index
    %c0_1 = arith.constant 0 : index
    %0 = vector.load %arg1[%c0, %c0_0, %c0_1] : memref<1x16x64xf32, #tpu.memory_space<vmem>>, vector<1x16x64xf32>
    %1 = vector.shape_cast %0 : vector<1x16x64xf32> to vector<16x64xf32>
    %c0_2 = arith.constant 0 : index
    %c0_3 = arith.constant 0 : index
    %2 = vector.load %arg2[%c0_2, %c0_3] : memref<64x32xbf16, #tpu.memory_space<vmem>>, vector<64x32xbf16>
    %3 = arith.truncf %1 : vector<16x64xf32> to vector<16x64xbf16>
    %cst = arith.constant dense<0.000000e+00> : vector<16x32xf32>
    %4 = tpu.matmul %3, %2, %cst {dimension_numbers = #tpu.dot_dimension_numbers<[1], [0], [0], [1], [0, 0, 1, 1], [], []>} : vector<16x64xbf16>, vector<64x32xbf16>, vector<16x32xf32> -> vector<16x32xf32>
    %c0_4 = arith.constant 0 : index
    %c0_5 = arith.constant 0 : index
    %5 = vector.load %arg3[%c0_4, %c0_5] : memref<1x32xf32, #tpu.memory_space<vmem>>, vector<1x32xf32>
    %6 = vector.broadcast %5 : vector<1x32xf32> to vector<16x32xf32>
    %7 = arith.addf %4, %6 : vector<16x32xf32>
    %c0_6 = arith.constant 0 : index
    %c0_7 = arith.constant 0 : index
    %8 = vector.load %arg4[%c0_6, %c0_7] : memref<16x32xf32, #tpu.memory_space<vmem>>, vector<16x32xf32>
    %9 = arith.addf %7, %8 : vector<16x32xf32>
    %10 = tpu.iota {dimensions = array<i32: 0>} : vector<8x32xi32>
    %c0_i32 = arith.constant 0 : i32
    %11 = vector.broadcast %c0_i32 : i32 to vector<8x32xi32>
    %12 = arith.cmpi eq, %10, %11 : vector<8x32xi32>
    %c0_8 = arith.constant 0 : index
    %c0_9 = arith.constant 0 : index
    %13 = vector.load %arg5[%c0_8, %c0_9] : memref<1x32xf32, #tpu.memory_space<vmem>>, vector<1x32xf32>
    %cst_10 = arith.constant 0.000000e+00 : f32
    %14 = vector.shape_cast %13 : vector<1x32xf32> to vector<1x32xf32>
    %15 = vector.broadcast %14 : vector<1x32xf32> to vector<8x32xf32>
    %16 = vector.broadcast %cst_10 : f32 to vector<8x32xf32>
    %17 = arith.select %12, %15, %16 : vector<8x32xi1>, vector<8x32xf32>
    %18 = tpu.concatenate %9, %17 in 0 : vector<16x32xf32>, vector<8x32xf32> -> vector<24x32xf32>
    %19 = tpu.iota {dimensions = array<i32: 1>} : vector<24x24xi32>
    %c16_i32 = arith.constant 16 : i32
    %20 = vector.broadcast %c16_i32 : i32 to vector<24x24xi32>
    %21 = arith.cmpi sle, %19, %20 : vector<24x24xi32>
    %cst_11 = arith.constant 0.000000e+00 : f32
    %cst_12 = arith.constant -1.000000e+30 : f32
    %22 = vector.broadcast %cst_11 : f32 to vector<24x24xf32>
    %23 = vector.broadcast %cst_12 : f32 to vector<24x24xf32>
    %24 = arith.select %21, %22, %23 : vector<24x24xi1>, vector<24x24xf32>
    %c0_13 = arith.constant 0 : index
    %c0_14 = arith.constant 0 : index
    %c0_15 = arith.constant 0 : index
    %25 = vector.load %arg6[%c0_13, %c0_14, %c0_15] : memref<2x1x32xf32, #tpu.memory_space<vmem>>, vector<1x1x32xf32>
    %26 = vector.shape_cast %25 : vector<1x1x32xf32> to vector<1x32xf32>
    %c0_16 = arith.constant 0 : index
    %c0_17 = arith.constant 0 : index
    %c0_18 = arith.constant 0 : index
    %27 = vector.load %arg7[%c0_16, %c0_17, %c0_18] : memref<2x1x32xf32, #tpu.memory_space<vmem>>, vector<1x1x32xf32>
    %28 = vector.shape_cast %27 : vector<1x1x32xf32> to vector<1x32xf32>
    %cst_19 = arith.constant dense<0.000000e+00> : vector<24xf32>
    %29 = vector.multi_reduction <add>, %18, %cst_19 [1] : vector<24x32xf32> to vector<24xf32>
    %30 = vector.shape_cast %29 : vector<24xf32> to vector<24x1xf32>
    %cst_20 = arith.constant 3.200000e+01 : f32
    %31 = vector.broadcast %cst_20 : f32 to vector<24x1xf32>
    %32 = arith.divf %30, %31 : vector<24x1xf32>
    %33 = vector.broadcast %32 : vector<24x1xf32> to vector<24x32xf32>
    %34 = arith.subf %18, %33 : vector<24x32xf32>
    %35 = arith.mulf %34, %34 : vector<24x32xf32>
    %cst_21 = arith.constant dense<0.000000e+00> : vector<24xf32>
    %36 = vector.multi_reduction <add>, %35, %cst_21 [1] : vector<24x32xf32> to vector<24xf32>
    %37 = vector.shape_cast %36 : vector<24xf32> to vector<24x1xf32>
    %cst_22 = arith.constant 3.200000e+01 : f32
    %38 = vector.broadcast %cst_22 : f32 to vector<24x1xf32>
    %39 = arith.divf %37, %38 : vector<24x1xf32>
    %40 = vector.broadcast %32 : vector<24x1xf32> to vector<24x32xf32>
    %41 = arith.subf %18, %40 : vector<24x32xf32>
    %cst_23 = arith.constant 9.99999974E-6 : f32
    %42 = vector.broadcast %cst_23 : f32 to vector<24x1xf32>
    %43 = arith.addf %39, %42 : vector<24x1xf32>
    %44 = math.rsqrt %43 : vector<24x1xf32>
    %45 = vector.broadcast %44 : vector<24x1xf32> to vector<24x32xf32>
    %46 = arith.mulf %41, %45 : vector<24x32xf32>
    %47 = vector.broadcast %26 : vector<1x32xf32> to vector<24x32xf32>
    %48 = arith.mulf %46, %47 : vector<24x32xf32>
    %49 = vector.broadcast %28 : vector<1x32xf32> to vector<24x32xf32>
    %50 = arith.addf %48, %49 : vector<24x32xf32>
    %c0_24 = arith.constant 0 : index
    %c0_25 = arith.constant 0 : index
    %c0_26 = arith.constant 0 : index
    %51 = vector.load %arg8[%c0_24, %c0_25, %c0_26] : memref<2x32x96xbf16, #tpu.memory_space<vmem>>, vector<1x32x96xbf16>
    %52 = vector.shape_cast %51 : vector<1x32x96xbf16> to vector<32x96xbf16>
    %53 = arith.truncf %50 : vector<24x32xf32> to vector<24x32xbf16>
    %cst_27 = arith.constant dense<0.000000e+00> : vector<24x96xf32>
    %54 = tpu.matmul %53, %52, %cst_27 {dimension_numbers = #tpu.dot_dimension_numbers<[1], [0], [0], [1], [0, 0, 1, 1], [], []>} : vector<24x32xbf16>, vector<32x96xbf16>, vector<24x96xf32> -> vector<24x96xf32>
    %c0_28 = arith.constant 0 : index
    %c0_29 = arith.constant 0 : index
    %c0_30 = arith.constant 0 : index
    %55 = vector.load %arg9[%c0_28, %c0_29, %c0_30] : memref<2x1x96xf32, #tpu.memory_space<vmem>>, vector<1x1x96xf32>
    %56 = vector.shape_cast %55 : vector<1x1x96xf32> to vector<1x96xf32>
    %57 = vector.broadcast %56 : vector<1x96xf32> to vector<24x96xf32>
    %58 = arith.addf %54, %57 : vector<24x96xf32>
    %59 = vector.extract_strided_slice %58 {offsets = [0, 0], sizes = [24, 8], strides = [1, 1]} : vector<24x96xf32> to vector<24x8xf32>
    %60 = vector.extract_strided_slice %58 {offsets = [0, 32], sizes = [24, 8], strides = [1, 1]} : vector<24x96xf32> to vector<24x8xf32>
    %61 = vector.extract_strided_slice %58 {offsets = [0, 64], sizes = [24, 8], strides = [1, 1]} : vector<24x96xf32> to vector<24x8xf32>
    %62 = arith.truncf %59 : vector<24x8xf32> to vector<24x8xbf16>
    %63 = arith.truncf %60 : vector<24x8xf32> to vector<24x8xbf16>
    %cst_31 = arith.constant dense<0.000000e+00> : vector<24x24xf32>
    %64 = tpu.matmul %62, %63, %cst_31 {dimension_numbers = #tpu.dot_dimension_numbers<[1], [1], [0], [0], [0, 0, 1, 0], [], []>} : vector<24x8xbf16>, vector<24x8xbf16>, vector<24x24xf32> -> vector<24x24xf32>
    %cst_32 = arith.constant 0.353553385 : f32
    %65 = vector.broadcast %cst_32 : f32 to vector<24x24xf32>
    %66 = arith.mulf %64, %65 : vector<24x24xf32>
    %67 = arith.addf %66, %24 : vector<24x24xf32>
    %cst_33 = arith.constant dense<0xFF800000> : vector<24xf32>
    %68 = vector.multi_reduction <maximumf>, %67, %cst_33 [1] : vector<24x24xf32> to vector<24xf32>
    %69 = vector.shape_cast %68 : vector<24xf32> to vector<24x1xf32>
    %70 = vector.broadcast %69 : vector<24x1xf32> to vector<24x24xf32>
    %71 = arith.subf %67, %70 : vector<24x24xf32>
    %72 = math.exp %71 : vector<24x24xf32>
    %cst_34 = arith.constant dense<0.000000e+00> : vector<24xf32>
    %73 = vector.multi_reduction <add>, %72, %cst_34 [1] : vector<24x24xf32> to vector<24xf32>
    %74 = vector.shape_cast %73 : vector<24xf32> to vector<24x1xf32>
    %75 = tpu.reciprocal %74 {approx = true} : vector<24x1xf32> -> vector<24x1xf32>
    %76 = vector.broadcast %75 : vector<24x1xf32> to vector<24x24xf32>
    %77 = arith.mulf %72, %76 : vector<24x24xf32>
    %78 = arith.truncf %77 : vector<24x24xf32> to vector<24x24xbf16>
    %79 = arith.truncf %61 : vector<24x8xf32> to vector<24x8xbf16>
    %cst_35 = arith.constant dense<0.000000e+00> : vector<24x8xf32>
    %80 = tpu.matmul %78, %79, %cst_35 {dimension_numbers = #tpu.dot_dimension_numbers<[1], [0], [0], [1], [0, 0, 1, 1], [], []>} : vector<24x24xbf16>, vector<24x8xbf16>, vector<24x8xf32> -> vector<24x8xf32>
    %81 = vector.extract_strided_slice %58 {offsets = [0, 8], sizes = [24, 8], strides = [1, 1]} : vector<24x96xf32> to vector<24x8xf32>
    %82 = vector.extract_strided_slice %58 {offsets = [0, 40], sizes = [24, 8], strides = [1, 1]} : vector<24x96xf32> to vector<24x8xf32>
    %83 = vector.extract_strided_slice %58 {offsets = [0, 72], sizes = [24, 8], strides = [1, 1]} : vector<24x96xf32> to vector<24x8xf32>
    %84 = arith.truncf %81 : vector<24x8xf32> to vector<24x8xbf16>
    %85 = arith.truncf %82 : vector<24x8xf32> to vector<24x8xbf16>
    %cst_36 = arith.constant dense<0.000000e+00> : vector<24x24xf32>
    %86 = tpu.matmul %84, %85, %cst_36 {dimension_numbers = #tpu.dot_dimension_numbers<[1], [1], [0], [0], [0, 0, 1, 0], [], []>} : vector<24x8xbf16>, vector<24x8xbf16>, vector<24x24xf32> -> vector<24x24xf32>
    %cst_37 = arith.constant 0.353553385 : f32
    %87 = vector.broadcast %cst_37 : f32 to vector<24x24xf32>
    %88 = arith.mulf %86, %87 : vector<24x24xf32>
    %89 = arith.addf %88, %24 : vector<24x24xf32>
    %cst_38 = arith.constant dense<0xFF800000> : vector<24xf32>
    %90 = vector.multi_reduction <maximumf>, %89, %cst_38 [1] : vector<24x24xf32> to vector<24xf32>
    %91 = vector.shape_cast %90 : vector<24xf32> to vector<24x1xf32>
    %92 = vector.broadcast %91 : vector<24x1xf32> to vector<24x24xf32>
    %93 = arith.subf %89, %92 : vector<24x24xf32>
    %94 = math.exp %93 : vector<24x24xf32>
    %cst_39 = arith.constant dense<0.000000e+00> : vector<24xf32>
    %95 = vector.multi_reduction <add>, %94, %cst_39 [1] : vector<24x24xf32> to vector<24xf32>
    %96 = vector.shape_cast %95 : vector<24xf32> to vector<24x1xf32>
    %97 = tpu.reciprocal %96 {approx = true} : vector<24x1xf32> -> vector<24x1xf32>
    %98 = vector.broadcast %97 : vector<24x1xf32> to vector<24x24xf32>
    %99 = arith.mulf %94, %98 : vector<24x24xf32>
    %100 = arith.truncf %99 : vector<24x24xf32> to vector<24x24xbf16>
    %101 = arith.truncf %83 : vector<24x8xf32> to vector<24x8xbf16>
    %cst_40 = arith.constant dense<0.000000e+00> : vector<24x8xf32>
    %102 = tpu.matmul %100, %101, %cst_40 {dimension_numbers = #tpu.dot_dimension_numbers<[1], [0], [0], [1], [0, 0, 1, 1], [], []>} : vector<24x24xbf16>, vector<24x8xbf16>, vector<24x8xf32> -> vector<24x8xf32>
    %103 = vector.extract_strided_slice %58 {offsets = [0, 16], sizes = [24, 8], strides = [1, 1]} : vector<24x96xf32> to vector<24x8xf32>
    %104 = vector.extract_strided_slice %58 {offsets = [0, 48], sizes = [24, 8], strides = [1, 1]} : vector<24x96xf32> to vector<24x8xf32>
    %105 = vector.extract_strided_slice %58 {offsets = [0, 80], sizes = [24, 8], strides = [1, 1]} : vector<24x96xf32> to vector<24x8xf32>
    %106 = arith.truncf %103 : vector<24x8xf32> to vector<24x8xbf16>
    %107 = arith.truncf %104 : vector<24x8xf32> to vector<24x8xbf16>
    %cst_41 = arith.constant dense<0.000000e+00> : vector<24x24xf32>
    %108 = tpu.matmul %106, %107, %cst_41 {dimension_numbers = #tpu.dot_dimension_numbers<[1], [1], [0], [0], [0, 0, 1, 0], [], []>} : vector<24x8xbf16>, vector<24x8xbf16>, vector<24x24xf32> -> vector<24x24xf32>
    %cst_42 = arith.constant 0.353553385 : f32
    %109 = vector.broadcast %cst_42 : f32 to vector<24x24xf32>
    %110 = arith.mulf %108, %109 : vector<24x24xf32>
    %111 = arith.addf %110, %24 : vector<24x24xf32>
    %cst_43 = arith.constant dense<0xFF800000> : vector<24xf32>
    %112 = vector.multi_reduction <maximumf>, %111, %cst_43 [1] : vector<24x24xf32> to vector<24xf32>
    %113 = vector.shape_cast %112 : vector<24xf32> to vector<24x1xf32>
    %114 = vector.broadcast %113 : vector<24x1xf32> to vector<24x24xf32>
    %115 = arith.subf %111, %114 : vector<24x24xf32>
    %116 = math.exp %115 : vector<24x24xf32>
    %cst_44 = arith.constant dense<0.000000e+00> : vector<24xf32>
    %117 = vector.multi_reduction <add>, %116, %cst_44 [1] : vector<24x24xf32> to vector<24xf32>
    %118 = vector.shape_cast %117 : vector<24xf32> to vector<24x1xf32>
    %119 = tpu.reciprocal %118 {approx = true} : vector<24x1xf32> -> vector<24x1xf32>
    %120 = vector.broadcast %119 : vector<24x1xf32> to vector<24x24xf32>
    %121 = arith.mulf %116, %120 : vector<24x24xf32>
    %122 = arith.truncf %121 : vector<24x24xf32> to vector<24x24xbf16>
    %123 = arith.truncf %105 : vector<24x8xf32> to vector<24x8xbf16>
    %cst_45 = arith.constant dense<0.000000e+00> : vector<24x8xf32>
    %124 = tpu.matmul %122, %123, %cst_45 {dimension_numbers = #tpu.dot_dimension_numbers<[1], [0], [0], [1], [0, 0, 1, 1], [], []>} : vector<24x24xbf16>, vector<24x8xbf16>, vector<24x8xf32> -> vector<24x8xf32>
    %125 = vector.extract_strided_slice %58 {offsets = [0, 24], sizes = [24, 8], strides = [1, 1]} : vector<24x96xf32> to vector<24x8xf32>
    %126 = vector.extract_strided_slice %58 {offsets = [0, 56], sizes = [24, 8], strides = [1, 1]} : vector<24x96xf32> to vector<24x8xf32>
    %127 = vector.extract_strided_slice %58 {offsets = [0, 88], sizes = [24, 8], strides = [1, 1]} : vector<24x96xf32> to vector<24x8xf32>
    %128 = arith.truncf %125 : vector<24x8xf32> to vector<24x8xbf16>
    %129 = arith.truncf %126 : vector<24x8xf32> to vector<24x8xbf16>
    %cst_46 = arith.constant dense<0.000000e+00> : vector<24x24xf32>
    %130 = tpu.matmul %128, %129, %cst_46 {dimension_numbers = #tpu.dot_dimension_numbers<[1], [1], [0], [0], [0, 0, 1, 0], [], []>} : vector<24x8xbf16>, vector<24x8xbf16>, vector<24x24xf32> -> vector<24x24xf32>
    %cst_47 = arith.constant 0.353553385 : f32
    %131 = vector.broadcast %cst_47 : f32 to vector<24x24xf32>
    %132 = arith.mulf %130, %131 : vector<24x24xf32>
    %133 = arith.addf %132, %24 : vector<24x24xf32>
    %cst_48 = arith.constant dense<0xFF800000> : vector<24xf32>
    %134 = vector.multi_reduction <maximumf>, %133, %cst_48 [1] : vector<24x24xf32> to vector<24xf32>
    %135 = vector.shape_cast %134 : vector<24xf32> to vector<24x1xf32>
    %136 = vector.broadcast %135 : vector<24x1xf32> to vector<24x24xf32>
    %137 = arith.subf %133, %136 : vector<24x24xf32>
    %138 = math.exp %137 : vector<24x24xf32>
    %cst_49 = arith.constant dense<0.000000e+00> : vector<24xf32>
    %139 = vector.multi_reduction <add>, %138, %cst_49 [1] : vector<24x24xf32> to vector<24xf32>
    %140 = vector.shape_cast %139 : vector<24xf32> to vector<24x1xf32>
    %141 = tpu.reciprocal %140 {approx = true} : vector<24x1xf32> -> vector<24x1xf32>
    %142 = vector.broadcast %141 : vector<24x1xf32> to vector<24x24xf32>
    %143 = arith.mulf %138, %142 : vector<24x24xf32>
    %144 = arith.truncf %143 : vector<24x24xf32> to vector<24x24xbf16>
    %145 = arith.truncf %127 : vector<24x8xf32> to vector<24x8xbf16>
    %cst_50 = arith.constant dense<0.000000e+00> : vector<24x8xf32>
    %146 = tpu.matmul %144, %145, %cst_50 {dimension_numbers = #tpu.dot_dimension_numbers<[1], [0], [0], [1], [0, 0, 1, 1], [], []>} : vector<24x24xbf16>, vector<24x8xbf16>, vector<24x8xf32> -> vector<24x8xf32>
    %147 = tpu.concatenate %80, %102, %124, %146 in 1 : vector<24x8xf32>, vector<24x8xf32>, vector<24x8xf32>, vector<24x8xf32> -> vector<24x32xf32>
    %c0_51 = arith.constant 0 : index
    %c0_52 = arith.constant 0 : index
    %c0_53 = arith.constant 0 : index
    %148 = vector.load %arg10[%c0_51, %c0_52, %c0_53] : memref<2x32x32xbf16, #tpu.memory_space<vmem>>, vector<1x32x32xbf16>
    %149 = vector.shape_cast %148 : vector<1x32x32xbf16> to vector<32x32xbf16>
    %150 = arith.truncf %147 : vector<24x32xf32> to vector<24x32xbf16>
    %cst_54 = arith.constant dense<0.000000e+00> : vector<24x32xf32>
    %151 = tpu.matmul %150, %149, %cst_54 {dimension_numbers = #tpu.dot_dimension_numbers<[1], [0], [0], [1], [0, 0, 1, 1], [], []>} : vector<24x32xbf16>, vector<32x32xbf16>, vector<24x32xf32> -> vector<24x32xf32>
    %c0_55 = arith.constant 0 : index
    %c0_56 = arith.constant 0 : index
    %c0_57 = arith.constant 0 : index
    %152 = vector.load %arg11[%c0_55, %c0_56, %c0_57] : memref<2x1x32xf32, #tpu.memory_space<vmem>>, vector<1x1x32xf32>
    %153 = vector.shape_cast %152 : vector<1x1x32xf32> to vector<1x32xf32>
    %154 = vector.broadcast %153 : vector<1x32xf32> to vector<24x32xf32>
    %155 = arith.addf %151, %154 : vector<24x32xf32>
    %156 = arith.addf %18, %155 : vector<24x32xf32>
    %c0_58 = arith.constant 0 : index
    %c0_59 = arith.constant 0 : index
    %c0_60 = arith.constant 0 : index
    %157 = vector.load %arg12[%c0_58, %c0_59, %c0_60] : memref<2x1x32xf32, #tpu.memory_space<vmem>>, vector<1x1x32xf32>
    %158 = vector.shape_cast %157 : vector<1x1x32xf32> to vector<1x32xf32>
    %c0_61 = arith.constant 0 : index
    %c0_62 = arith.constant 0 : index
    %c0_63 = arith.constant 0 : index
    %159 = vector.load %arg13[%c0_61, %c0_62, %c0_63] : memref<2x1x32xf32, #tpu.memory_space<vmem>>, vector<1x1x32xf32>
    %160 = vector.shape_cast %159 : vector<1x1x32xf32> to vector<1x32xf32>
    %cst_64 = arith.constant dense<0.000000e+00> : vector<24xf32>
    %161 = vector.multi_reduction <add>, %156, %cst_64 [1] : vector<24x32xf32> to vector<24xf32>
    %162 = vector.shape_cast %161 : vector<24xf32> to vector<24x1xf32>
    %cst_65 = arith.constant 3.200000e+01 : f32
    %163 = vector.broadcast %cst_65 : f32 to vector<24x1xf32>
    %164 = arith.divf %162, %163 : vector<24x1xf32>
    %165 = vector.broadcast %164 : vector<24x1xf32> to vector<24x32xf32>
    %166 = arith.subf %156, %165 : vector<24x32xf32>
    %167 = arith.mulf %166, %166 : vector<24x32xf32>
    %cst_66 = arith.constant dense<0.000000e+00> : vector<24xf32>
    %168 = vector.multi_reduction <add>, %167, %cst_66 [1] : vector<24x32xf32> to vector<24xf32>
    %169 = vector.shape_cast %168 : vector<24xf32> to vector<24x1xf32>
    %cst_67 = arith.constant 3.200000e+01 : f32
    %170 = vector.broadcast %cst_67 : f32 to vector<24x1xf32>
    %171 = arith.divf %169, %170 : vector<24x1xf32>
    %172 = vector.broadcast %164 : vector<24x1xf32> to vector<24x32xf32>
    %173 = arith.subf %156, %172 : vector<24x32xf32>
    %cst_68 = arith.constant 9.99999974E-6 : f32
    %174 = vector.broadcast %cst_68 : f32 to vector<24x1xf32>
    %175 = arith.addf %171, %174 : vector<24x1xf32>
    %176 = math.rsqrt %175 : vector<24x1xf32>
    %177 = vector.broadcast %176 : vector<24x1xf32> to vector<24x32xf32>
    %178 = arith.mulf %173, %177 : vector<24x32xf32>
    %179 = vector.broadcast %158 : vector<1x32xf32> to vector<24x32xf32>
    %180 = arith.mulf %178, %179 : vector<24x32xf32>
    %181 = vector.broadcast %160 : vector<1x32xf32> to vector<24x32xf32>
    %182 = arith.addf %180, %181 : vector<24x32xf32>
    %c0_69 = arith.constant 0 : index
    %c0_70 = arith.constant 0 : index
    %c0_71 = arith.constant 0 : index
    %183 = vector.load %arg14[%c0_69, %c0_70, %c0_71] : memref<2x32x64xbf16, #tpu.memory_space<vmem>>, vector<1x32x64xbf16>
    %184 = vector.shape_cast %183 : vector<1x32x64xbf16> to vector<32x64xbf16>
    %185 = arith.truncf %182 : vector<24x32xf32> to vector<24x32xbf16>
    %cst_72 = arith.constant dense<0.000000e+00> : vector<24x64xf32>
    %186 = tpu.matmul %185, %184, %cst_72 {dimension_numbers = #tpu.dot_dimension_numbers<[1], [0], [0], [1], [0, 0, 1, 1], [], []>} : vector<24x32xbf16>, vector<32x64xbf16>, vector<24x64xf32> -> vector<24x64xf32>
    %c0_73 = arith.constant 0 : index
    %c0_74 = arith.constant 0 : index
    %c0_75 = arith.constant 0 : index
    %187 = vector.load %arg15[%c0_73, %c0_74, %c0_75] : memref<2x1x64xf32, #tpu.memory_space<vmem>>, vector<1x1x64xf32>
    %188 = vector.shape_cast %187 : vector<1x1x64xf32> to vector<1x64xf32>
    %189 = vector.broadcast %188 : vector<1x64xf32> to vector<24x64xf32>
    %190 = arith.addf %186, %189 : vector<24x64xf32>
    %cst_76 = arith.constant 5.000000e-01 : f32
    %191 = vector.broadcast %cst_76 : f32 to vector<24x64xf32>
    %192 = arith.mulf %191, %190 : vector<24x64xf32>
    %cst_77 = arith.constant 0.707106769 : f32
    %193 = vector.broadcast %cst_77 : f32 to vector<24x64xf32>
    %194 = arith.mulf %190, %193 : vector<24x64xf32>
    %195 = math.erf %194 : vector<24x64xf32>
    %cst_78 = arith.constant 1.000000e+00 : f32
    %196 = vector.broadcast %cst_78 : f32 to vector<24x64xf32>
    %197 = arith.addf %196, %195 : vector<24x64xf32>
    %198 = arith.mulf %192, %197 : vector<24x64xf32>
    %c0_79 = arith.constant 0 : index
    %c0_80 = arith.constant 0 : index
    %c0_81 = arith.constant 0 : index
    %199 = vector.load %arg16[%c0_79, %c0_80, %c0_81] : memref<2x64x32xbf16, #tpu.memory_space<vmem>>, vector<1x64x32xbf16>
    %200 = vector.shape_cast %199 : vector<1x64x32xbf16> to vector<64x32xbf16>
    %201 = arith.truncf %198 : vector<24x64xf32> to vector<24x64xbf16>
    %cst_82 = arith.constant dense<0.000000e+00> : vector<24x32xf32>
    %202 = tpu.matmul %201, %200, %cst_82 {dimension_numbers = #tpu.dot_dimension_numbers<[1], [0], [0], [1], [0, 0, 1, 1], [], []>} : vector<24x64xbf16>, vector<64x32xbf16>, vector<24x32xf32> -> vector<24x32xf32>
    %203 = arith.addf %156, %202 : vector<24x32xf32>
    %c0_83 = arith.constant 0 : index
    %c0_84 = arith.constant 0 : index
    %c0_85 = arith.constant 0 : index
    %204 = vector.load %arg17[%c0_83, %c0_84, %c0_85] : memref<2x1x32xf32, #tpu.memory_space<vmem>>, vector<1x1x32xf32>
    %205 = vector.shape_cast %204 : vector<1x1x32xf32> to vector<1x32xf32>
    %206 = vector.broadcast %205 : vector<1x32xf32> to vector<24x32xf32>
    %207 = arith.addf %203, %206 : vector<24x32xf32>
    %c1 = arith.constant 1 : index
    %c0_86 = arith.constant 0 : index
    %c0_87 = arith.constant 0 : index
    %208 = vector.load %arg6[%c1, %c0_86, %c0_87] : memref<2x1x32xf32, #tpu.memory_space<vmem>>, vector<1x1x32xf32>
    %209 = vector.shape_cast %208 : vector<1x1x32xf32> to vector<1x32xf32>
    %c1_88 = arith.constant 1 : index
    %c0_89 = arith.constant 0 : index
    %c0_90 = arith.constant 0 : index
    %210 = vector.load %arg7[%c1_88, %c0_89, %c0_90] : memref<2x1x32xf32, #tpu.memory_space<vmem>>, vector<1x1x32xf32>
    %211 = vector.shape_cast %210 : vector<1x1x32xf32> to vector<1x32xf32>
    %cst_91 = arith.constant dense<0.000000e+00> : vector<24xf32>
    %212 = vector.multi_reduction <add>, %207, %cst_91 [1] : vector<24x32xf32> to vector<24xf32>
    %213 = vector.shape_cast %212 : vector<24xf32> to vector<24x1xf32>
    %cst_92 = arith.constant 3.200000e+01 : f32
    %214 = vector.broadcast %cst_92 : f32 to vector<24x1xf32>
    %215 = arith.divf %213, %214 : vector<24x1xf32>
    %216 = vector.broadcast %215 : vector<24x1xf32> to vector<24x32xf32>
    %217 = arith.subf %207, %216 : vector<24x32xf32>
    %218 = arith.mulf %217, %217 : vector<24x32xf32>
    %cst_93 = arith.constant dense<0.000000e+00> : vector<24xf32>
    %219 = vector.multi_reduction <add>, %218, %cst_93 [1] : vector<24x32xf32> to vector<24xf32>
    %220 = vector.shape_cast %219 : vector<24xf32> to vector<24x1xf32>
    %cst_94 = arith.constant 3.200000e+01 : f32
    %221 = vector.broadcast %cst_94 : f32 to vector<24x1xf32>
    %222 = arith.divf %220, %221 : vector<24x1xf32>
    %223 = vector.broadcast %215 : vector<24x1xf32> to vector<24x32xf32>
    %224 = arith.subf %207, %223 : vector<24x32xf32>
    %cst_95 = arith.constant 9.99999974E-6 : f32
    %225 = vector.broadcast %cst_95 : f32 to vector<24x1xf32>
    %226 = arith.addf %222, %225 : vector<24x1xf32>
    %227 = math.rsqrt %226 : vector<24x1xf32>
    %228 = vector.broadcast %227 : vector<24x1xf32> to vector<24x32xf32>
    %229 = arith.mulf %224, %228 : vector<24x32xf32>
    %230 = vector.broadcast %209 : vector<1x32xf32> to vector<24x32xf32>
    %231 = arith.mulf %229, %230 : vector<24x32xf32>
    %232 = vector.broadcast %211 : vector<1x32xf32> to vector<24x32xf32>
    %233 = arith.addf %231, %232 : vector<24x32xf32>
    %c1_96 = arith.constant 1 : index
    %c0_97 = arith.constant 0 : index
    %c0_98 = arith.constant 0 : index
    %234 = vector.load %arg8[%c1_96, %c0_97, %c0_98] : memref<2x32x96xbf16, #tpu.memory_space<vmem>>, vector<1x32x96xbf16>
    %235 = vector.shape_cast %234 : vector<1x32x96xbf16> to vector<32x96xbf16>
    %236 = arith.truncf %233 : vector<24x32xf32> to vector<24x32xbf16>
    %cst_99 = arith.constant dense<0.000000e+00> : vector<24x96xf32>
    %237 = tpu.matmul %236, %235, %cst_99 {dimension_numbers = #tpu.dot_dimension_numbers<[1], [0], [0], [1], [0, 0, 1, 1], [], []>} : vector<24x32xbf16>, vector<32x96xbf16>, vector<24x96xf32> -> vector<24x96xf32>
    %c1_100 = arith.constant 1 : index
    %c0_101 = arith.constant 0 : index
    %c0_102 = arith.constant 0 : index
    %238 = vector.load %arg9[%c1_100, %c0_101, %c0_102] : memref<2x1x96xf32, #tpu.memory_space<vmem>>, vector<1x1x96xf32>
    %239 = vector.shape_cast %238 : vector<1x1x96xf32> to vector<1x96xf32>
    %240 = vector.broadcast %239 : vector<1x96xf32> to vector<24x96xf32>
    %241 = arith.addf %237, %240 : vector<24x96xf32>
    %242 = vector.extract_strided_slice %241 {offsets = [0, 0], sizes = [24, 8], strides = [1, 1]} : vector<24x96xf32> to vector<24x8xf32>
    %243 = vector.extract_strided_slice %241 {offsets = [0, 32], sizes = [24, 8], strides = [1, 1]} : vector<24x96xf32> to vector<24x8xf32>
    %244 = vector.extract_strided_slice %241 {offsets = [0, 64], sizes = [24, 8], strides = [1, 1]} : vector<24x96xf32> to vector<24x8xf32>
    %245 = arith.truncf %242 : vector<24x8xf32> to vector<24x8xbf16>
    %246 = arith.truncf %243 : vector<24x8xf32> to vector<24x8xbf16>
    %cst_103 = arith.constant dense<0.000000e+00> : vector<24x24xf32>
    %247 = tpu.matmul %245, %246, %cst_103 {dimension_numbers = #tpu.dot_dimension_numbers<[1], [1], [0], [0], [0, 0, 1, 0], [], []>} : vector<24x8xbf16>, vector<24x8xbf16>, vector<24x24xf32> -> vector<24x24xf32>
    %cst_104 = arith.constant 0.353553385 : f32
    %248 = vector.broadcast %cst_104 : f32 to vector<24x24xf32>
    %249 = arith.mulf %247, %248 : vector<24x24xf32>
    %250 = arith.addf %249, %24 : vector<24x24xf32>
    %cst_105 = arith.constant dense<0xFF800000> : vector<24xf32>
    %251 = vector.multi_reduction <maximumf>, %250, %cst_105 [1] : vector<24x24xf32> to vector<24xf32>
    %252 = vector.shape_cast %251 : vector<24xf32> to vector<24x1xf32>
    %253 = vector.broadcast %252 : vector<24x1xf32> to vector<24x24xf32>
    %254 = arith.subf %250, %253 : vector<24x24xf32>
    %255 = math.exp %254 : vector<24x24xf32>
    %cst_106 = arith.constant dense<0.000000e+00> : vector<24xf32>
    %256 = vector.multi_reduction <add>, %255, %cst_106 [1] : vector<24x24xf32> to vector<24xf32>
    %257 = vector.shape_cast %256 : vector<24xf32> to vector<24x1xf32>
    %258 = tpu.reciprocal %257 {approx = true} : vector<24x1xf32> -> vector<24x1xf32>
    %259 = vector.broadcast %258 : vector<24x1xf32> to vector<24x24xf32>
    %260 = arith.mulf %255, %259 : vector<24x24xf32>
    %261 = arith.truncf %260 : vector<24x24xf32> to vector<24x24xbf16>
    %262 = arith.truncf %244 : vector<24x8xf32> to vector<24x8xbf16>
    %cst_107 = arith.constant dense<0.000000e+00> : vector<24x8xf32>
    %263 = tpu.matmul %261, %262, %cst_107 {dimension_numbers = #tpu.dot_dimension_numbers<[1], [0], [0], [1], [0, 0, 1, 1], [], []>} : vector<24x24xbf16>, vector<24x8xbf16>, vector<24x8xf32> -> vector<24x8xf32>
    %264 = vector.extract_strided_slice %241 {offsets = [0, 8], sizes = [24, 8], strides = [1, 1]} : vector<24x96xf32> to vector<24x8xf32>
    %265 = vector.extract_strided_slice %241 {offsets = [0, 40], sizes = [24, 8], strides = [1, 1]} : vector<24x96xf32> to vector<24x8xf32>
    %266 = vector.extract_strided_slice %241 {offsets = [0, 72], sizes = [24, 8], strides = [1, 1]} : vector<24x96xf32> to vector<24x8xf32>
    %267 = arith.truncf %264 : vector<24x8xf32> to vector<24x8xbf16>
    %268 = arith.truncf %265 : vector<24x8xf32> to vector<24x8xbf16>
    %cst_108 = arith.constant dense<0.000000e+00> : vector<24x24xf32>
    %269 = tpu.matmul %267, %268, %cst_108 {dimension_numbers = #tpu.dot_dimension_numbers<[1], [1], [0], [0], [0, 0, 1, 0], [], []>} : vector<24x8xbf16>, vector<24x8xbf16>, vector<24x24xf32> -> vector<24x24xf32>
    %cst_109 = arith.constant 0.353553385 : f32
    %270 = vector.broadcast %cst_109 : f32 to vector<24x24xf32>
    %271 = arith.mulf %269, %270 : vector<24x24xf32>
    %272 = arith.addf %271, %24 : vector<24x24xf32>
    %cst_110 = arith.constant dense<0xFF800000> : vector<24xf32>
    %273 = vector.multi_reduction <maximumf>, %272, %cst_110 [1] : vector<24x24xf32> to vector<24xf32>
    %274 = vector.shape_cast %273 : vector<24xf32> to vector<24x1xf32>
    %275 = vector.broadcast %274 : vector<24x1xf32> to vector<24x24xf32>
    %276 = arith.subf %272, %275 : vector<24x24xf32>
    %277 = math.exp %276 : vector<24x24xf32>
    %cst_111 = arith.constant dense<0.000000e+00> : vector<24xf32>
    %278 = vector.multi_reduction <add>, %277, %cst_111 [1] : vector<24x24xf32> to vector<24xf32>
    %279 = vector.shape_cast %278 : vector<24xf32> to vector<24x1xf32>
    %280 = tpu.reciprocal %279 {approx = true} : vector<24x1xf32> -> vector<24x1xf32>
    %281 = vector.broadcast %280 : vector<24x1xf32> to vector<24x24xf32>
    %282 = arith.mulf %277, %281 : vector<24x24xf32>
    %283 = arith.truncf %282 : vector<24x24xf32> to vector<24x24xbf16>
    %284 = arith.truncf %266 : vector<24x8xf32> to vector<24x8xbf16>
    %cst_112 = arith.constant dense<0.000000e+00> : vector<24x8xf32>
    %285 = tpu.matmul %283, %284, %cst_112 {dimension_numbers = #tpu.dot_dimension_numbers<[1], [0], [0], [1], [0, 0, 1, 1], [], []>} : vector<24x24xbf16>, vector<24x8xbf16>, vector<24x8xf32> -> vector<24x8xf32>
    %286 = vector.extract_strided_slice %241 {offsets = [0, 16], sizes = [24, 8], strides = [1, 1]} : vector<24x96xf32> to vector<24x8xf32>
    %287 = vector.extract_strided_slice %241 {offsets = [0, 48], sizes = [24, 8], strides = [1, 1]} : vector<24x96xf32> to vector<24x8xf32>
    %288 = vector.extract_strided_slice %241 {offsets = [0, 80], sizes = [24, 8], strides = [1, 1]} : vector<24x96xf32> to vector<24x8xf32>
    %289 = arith.truncf %286 : vector<24x8xf32> to vector<24x8xbf16>
    %290 = arith.truncf %287 : vector<24x8xf32> to vector<24x8xbf16>
    %cst_113 = arith.constant dense<0.000000e+00> : vector<24x24xf32>
    %291 = tpu.matmul %289, %290, %cst_113 {dimension_numbers = #tpu.dot_dimension_numbers<[1], [1], [0], [0], [0, 0, 1, 0], [], []>} : vector<24x8xbf16>, vector<24x8xbf16>, vector<24x24xf32> -> vector<24x24xf32>
    %cst_114 = arith.constant 0.353553385 : f32
    %292 = vector.broadcast %cst_114 : f32 to vector<24x24xf32>
    %293 = arith.mulf %291, %292 : vector<24x24xf32>
    %294 = arith.addf %293, %24 : vector<24x24xf32>
    %cst_115 = arith.constant dense<0xFF800000> : vector<24xf32>
    %295 = vector.multi_reduction <maximumf>, %294, %cst_115 [1] : vector<24x24xf32> to vector<24xf32>
    %296 = vector.shape_cast %295 : vector<24xf32> to vector<24x1xf32>
    %297 = vector.broadcast %296 : vector<24x1xf32> to vector<24x24xf32>
    %298 = arith.subf %294, %297 : vector<24x24xf32>
    %299 = math.exp %298 : vector<24x24xf32>
    %cst_116 = arith.constant dense<0.000000e+00> : vector<24xf32>
    %300 = vector.multi_reduction <add>, %299, %cst_116 [1] : vector<24x24xf32> to vector<24xf32>
    %301 = vector.shape_cast %300 : vector<24xf32> to vector<24x1xf32>
    %302 = tpu.reciprocal %301 {approx = true} : vector<24x1xf32> -> vector<24x1xf32>
    %303 = vector.broadcast %302 : vector<24x1xf32> to vector<24x24xf32>
    %304 = arith.mulf %299, %303 : vector<24x24xf32>
    %305 = arith.truncf %304 : vector<24x24xf32> to vector<24x24xbf16>
    %306 = arith.truncf %288 : vector<24x8xf32> to vector<24x8xbf16>
    %cst_117 = arith.constant dense<0.000000e+00> : vector<24x8xf32>
    %307 = tpu.matmul %305, %306, %cst_117 {dimension_numbers = #tpu.dot_dimension_numbers<[1], [0], [0], [1], [0, 0, 1, 1], [], []>} : vector<24x24xbf16>, vector<24x8xbf16>, vector<24x8xf32> -> vector<24x8xf32>
    %308 = vector.extract_strided_slice %241 {offsets = [0, 24], sizes = [24, 8], strides = [1, 1]} : vector<24x96xf32> to vector<24x8xf32>
    %309 = vector.extract_strided_slice %241 {offsets = [0, 56], sizes = [24, 8], strides = [1, 1]} : vector<24x96xf32> to vector<24x8xf32>
    %310 = vector.extract_strided_slice %241 {offsets = [0, 88], sizes = [24, 8], strides = [1, 1]} : vector<24x96xf32> to vector<24x8xf32>
    %311 = arith.truncf %308 : vector<24x8xf32> to vector<24x8xbf16>
    %312 = arith.truncf %309 : vector<24x8xf32> to vector<24x8xbf16>
    %cst_118 = arith.constant dense<0.000000e+00> : vector<24x24xf32>
    %313 = tpu.matmul %311, %312, %cst_118 {dimension_numbers = #tpu.dot_dimension_numbers<[1], [1], [0], [0], [0, 0, 1, 0], [], []>} : vector<24x8xbf16>, vector<24x8xbf16>, vector<24x24xf32> -> vector<24x24xf32>
    %cst_119 = arith.constant 0.353553385 : f32
    %314 = vector.broadcast %cst_119 : f32 to vector<24x24xf32>
    %315 = arith.mulf %313, %314 : vector<24x24xf32>
    %316 = arith.addf %315, %24 : vector<24x24xf32>
    %cst_120 = arith.constant dense<0xFF800000> : vector<24xf32>
    %317 = vector.multi_reduction <maximumf>, %316, %cst_120 [1] : vector<24x24xf32> to vector<24xf32>
    %318 = vector.shape_cast %317 : vector<24xf32> to vector<24x1xf32>
    %319 = vector.broadcast %318 : vector<24x1xf32> to vector<24x24xf32>
    %320 = arith.subf %316, %319 : vector<24x24xf32>
    %321 = math.exp %320 : vector<24x24xf32>
    %cst_121 = arith.constant dense<0.000000e+00> : vector<24xf32>
    %322 = vector.multi_reduction <add>, %321, %cst_121 [1] : vector<24x24xf32> to vector<24xf32>
    %323 = vector.shape_cast %322 : vector<24xf32> to vector<24x1xf32>
    %324 = tpu.reciprocal %323 {approx = true} : vector<24x1xf32> -> vector<24x1xf32>
    %325 = vector.broadcast %324 : vector<24x1xf32> to vector<24x24xf32>
    %326 = arith.mulf %321, %325 : vector<24x24xf32>
    %327 = arith.truncf %326 : vector<24x24xf32> to vector<24x24xbf16>
    %328 = arith.truncf %310 : vector<24x8xf32> to vector<24x8xbf16>
    %cst_122 = arith.constant dense<0.000000e+00> : vector<24x8xf32>
    %329 = tpu.matmul %327, %328, %cst_122 {dimension_numbers = #tpu.dot_dimension_numbers<[1], [0], [0], [1], [0, 0, 1, 1], [], []>} : vector<24x24xbf16>, vector<24x8xbf16>, vector<24x8xf32> -> vector<24x8xf32>
    %330 = tpu.concatenate %263, %285, %307, %329 in 1 : vector<24x8xf32>, vector<24x8xf32>, vector<24x8xf32>, vector<24x8xf32> -> vector<24x32xf32>
    %c1_123 = arith.constant 1 : index
    %c0_124 = arith.constant 0 : index
    %c0_125 = arith.constant 0 : index
    %331 = vector.load %arg10[%c1_123, %c0_124, %c0_125] : memref<2x32x32xbf16, #tpu.memory_space<vmem>>, vector<1x32x32xbf16>
    %332 = vector.shape_cast %331 : vector<1x32x32xbf16> to vector<32x32xbf16>
    %333 = arith.truncf %330 : vector<24x32xf32> to vector<24x32xbf16>
    %cst_126 = arith.constant dense<0.000000e+00> : vector<24x32xf32>
    %334 = tpu.matmul %333, %332, %cst_126 {dimension_numbers = #tpu.dot_dimension_numbers<[1], [0], [0], [1], [0, 0, 1, 1], [], []>} : vector<24x32xbf16>, vector<32x32xbf16>, vector<24x32xf32> -> vector<24x32xf32>
    %c1_127 = arith.constant 1 : index
    %c0_128 = arith.constant 0 : index
    %c0_129 = arith.constant 0 : index
    %335 = vector.load %arg11[%c1_127, %c0_128, %c0_129] : memref<2x1x32xf32, #tpu.memory_space<vmem>>, vector<1x1x32xf32>
    %336 = vector.shape_cast %335 : vector<1x1x32xf32> to vector<1x32xf32>
    %337 = vector.broadcast %336 : vector<1x32xf32> to vector<24x32xf32>
    %338 = arith.addf %334, %337 : vector<24x32xf32>
    %339 = arith.addf %207, %338 : vector<24x32xf32>
    %c1_130 = arith.constant 1 : index
    %c0_131 = arith.constant 0 : index
    %c0_132 = arith.constant 0 : index
    %340 = vector.load %arg12[%c1_130, %c0_131, %c0_132] : memref<2x1x32xf32, #tpu.memory_space<vmem>>, vector<1x1x32xf32>
    %341 = vector.shape_cast %340 : vector<1x1x32xf32> to vector<1x32xf32>
    %c1_133 = arith.constant 1 : index
    %c0_134 = arith.constant 0 : index
    %c0_135 = arith.constant 0 : index
    %342 = vector.load %arg13[%c1_133, %c0_134, %c0_135] : memref<2x1x32xf32, #tpu.memory_space<vmem>>, vector<1x1x32xf32>
    %343 = vector.shape_cast %342 : vector<1x1x32xf32> to vector<1x32xf32>
    %cst_136 = arith.constant dense<0.000000e+00> : vector<24xf32>
    %344 = vector.multi_reduction <add>, %339, %cst_136 [1] : vector<24x32xf32> to vector<24xf32>
    %345 = vector.shape_cast %344 : vector<24xf32> to vector<24x1xf32>
    %cst_137 = arith.constant 3.200000e+01 : f32
    %346 = vector.broadcast %cst_137 : f32 to vector<24x1xf32>
    %347 = arith.divf %345, %346 : vector<24x1xf32>
    %348 = vector.broadcast %347 : vector<24x1xf32> to vector<24x32xf32>
    %349 = arith.subf %339, %348 : vector<24x32xf32>
    %350 = arith.mulf %349, %349 : vector<24x32xf32>
    %cst_138 = arith.constant dense<0.000000e+00> : vector<24xf32>
    %351 = vector.multi_reduction <add>, %350, %cst_138 [1] : vector<24x32xf32> to vector<24xf32>
    %352 = vector.shape_cast %351 : vector<24xf32> to vector<24x1xf32>
    %cst_139 = arith.constant 3.200000e+01 : f32
    %353 = vector.broadcast %cst_139 : f32 to vector<24x1xf32>
    %354 = arith.divf %352, %353 : vector<24x1xf32>
    %355 = vector.broadcast %347 : vector<24x1xf32> to vector<24x32xf32>
    %356 = arith.subf %339, %355 : vector<24x32xf32>
    %cst_140 = arith.constant 9.99999974E-6 : f32
    %357 = vector.broadcast %cst_140 : f32 to vector<24x1xf32>
    %358 = arith.addf %354, %357 : vector<24x1xf32>
    %359 = math.rsqrt %358 : vector<24x1xf32>
    %360 = vector.broadcast %359 : vector<24x1xf32> to vector<24x32xf32>
    %361 = arith.mulf %356, %360 : vector<24x32xf32>
    %362 = vector.broadcast %341 : vector<1x32xf32> to vector<24x32xf32>
    %363 = arith.mulf %361, %362 : vector<24x32xf32>
    %364 = vector.broadcast %343 : vector<1x32xf32> to vector<24x32xf32>
    %365 = arith.addf %363, %364 : vector<24x32xf32>
    %c1_141 = arith.constant 1 : index
    %c0_142 = arith.constant 0 : index
    %c0_143 = arith.constant 0 : index
    %366 = vector.load %arg14[%c1_141, %c0_142, %c0_143] : memref<2x32x64xbf16, #tpu.memory_space<vmem>>, vector<1x32x64xbf16>
    %367 = vector.shape_cast %366 : vector<1x32x64xbf16> to vector<32x64xbf16>
    %368 = arith.truncf %365 : vector<24x32xf32> to vector<24x32xbf16>
    %cst_144 = arith.constant dense<0.000000e+00> : vector<24x64xf32>
    %369 = tpu.matmul %368, %367, %cst_144 {dimension_numbers = #tpu.dot_dimension_numbers<[1], [0], [0], [1], [0, 0, 1, 1], [], []>} : vector<24x32xbf16>, vector<32x64xbf16>, vector<24x64xf32> -> vector<24x64xf32>
    %c1_145 = arith.constant 1 : index
    %c0_146 = arith.constant 0 : index
    %c0_147 = arith.constant 0 : index
    %370 = vector.load %arg15[%c1_145, %c0_146, %c0_147] : memref<2x1x64xf32, #tpu.memory_space<vmem>>, vector<1x1x64xf32>
    %371 = vector.shape_cast %370 : vector<1x1x64xf32> to vector<1x64xf32>
    %372 = vector.broadcast %371 : vector<1x64xf32> to vector<24x64xf32>
    %373 = arith.addf %369, %372 : vector<24x64xf32>
    %cst_148 = arith.constant 5.000000e-01 : f32
    %374 = vector.broadcast %cst_148 : f32 to vector<24x64xf32>
    %375 = arith.mulf %374, %373 : vector<24x64xf32>
    %cst_149 = arith.constant 0.707106769 : f32
    %376 = vector.broadcast %cst_149 : f32 to vector<24x64xf32>
    %377 = arith.mulf %373, %376 : vector<24x64xf32>
    %378 = math.erf %377 : vector<24x64xf32>
    %cst_150 = arith.constant 1.000000e+00 : f32
    %379 = vector.broadcast %cst_150 : f32 to vector<24x64xf32>
    %380 = arith.addf %379, %378 : vector<24x64xf32>
    %381 = arith.mulf %375, %380 : vector<24x64xf32>
    %c1_151 = arith.constant 1 : index
    %c0_152 = arith.constant 0 : index
    %c0_153 = arith.constant 0 : index
    %382 = vector.load %arg16[%c1_151, %c0_152, %c0_153] : memref<2x64x32xbf16, #tpu.memory_space<vmem>>, vector<1x64x32xbf16>
    %383 = vector.shape_cast %382 : vector<1x64x32xbf16> to vector<64x32xbf16>
    %384 = arith.truncf %381 : vector<24x64xf32> to vector<24x64xbf16>
    %cst_154 = arith.constant dense<0.000000e+00> : vector<24x32xf32>
    %385 = tpu.matmul %384, %383, %cst_154 {dimension_numbers = #tpu.dot_dimension_numbers<[1], [0], [0], [1], [0, 0, 1, 1], [], []>} : vector<24x64xbf16>, vector<64x32xbf16>, vector<24x32xf32> -> vector<24x32xf32>
    %386 = arith.addf %339, %385 : vector<24x32xf32>
    %c1_155 = arith.constant 1 : index
    %c0_156 = arith.constant 0 : index
    %c0_157 = arith.constant 0 : index
    %387 = vector.load %arg17[%c1_155, %c0_156, %c0_157] : memref<2x1x32xf32, #tpu.memory_space<vmem>>, vector<1x1x32xf32>
    %388 = vector.shape_cast %387 : vector<1x1x32xf32> to vector<1x32xf32>
    %389 = vector.broadcast %388 : vector<1x32xf32> to vector<24x32xf32>
    %390 = arith.addf %386, %389 : vector<24x32xf32>
    %391 = vector.extract_strided_slice %390 {offsets = [16, 0], sizes = [1, 32], strides = [1, 1]} : vector<24x32xf32> to vector<1x32xf32>
    %c0_158 = arith.constant 0 : index
    %c0_159 = arith.constant 0 : index
    %392 = vector.load %arg18[%c0_158, %c0_159] : memref<1x32xf32, #tpu.memory_space<vmem>>, vector<1x32xf32>
    %c0_160 = arith.constant 0 : index
    %c0_161 = arith.constant 0 : index
    %393 = vector.load %arg19[%c0_160, %c0_161] : memref<1x32xf32, #tpu.memory_space<vmem>>, vector<1x32xf32>
    %cst_162 = arith.constant dense<0.000000e+00> : vector<1xf32>
    %394 = vector.multi_reduction <add>, %391, %cst_162 [1] : vector<1x32xf32> to vector<1xf32>
    %395 = vector.shape_cast %394 : vector<1xf32> to vector<1x1xf32>
    %cst_163 = arith.constant 3.200000e+01 : f32
    %396 = vector.broadcast %cst_163 : f32 to vector<1x1xf32>
    %397 = arith.divf %395, %396 : vector<1x1xf32>
    %398 = vector.broadcast %397 : vector<1x1xf32> to vector<1x32xf32>
    %399 = arith.subf %391, %398 : vector<1x32xf32>
    %400 = arith.mulf %399, %399 : vector<1x32xf32>
    %cst_164 = arith.constant dense<0.000000e+00> : vector<1xf32>
    %401 = vector.multi_reduction <add>, %400, %cst_164 [1] : vector<1x32xf32> to vector<1xf32>
    %402 = vector.shape_cast %401 : vector<1xf32> to vector<1x1xf32>
    %cst_165 = arith.constant 3.200000e+01 : f32
    %403 = vector.broadcast %cst_165 : f32 to vector<1x1xf32>
    %404 = arith.divf %402, %403 : vector<1x1xf32>
    %405 = vector.broadcast %397 : vector<1x1xf32> to vector<1x32xf32>
    %406 = arith.subf %391, %405 : vector<1x32xf32>
    %cst_166 = arith.constant 9.99999974E-6 : f32
    %407 = vector.broadcast %cst_166 : f32 to vector<1x1xf32>
    %408 = arith.addf %404, %407 : vector<1x1xf32>
    %409 = math.rsqrt %408 : vector<1x1xf32>
    %410 = vector.broadcast %409 : vector<1x1xf32> to vector<1x32xf32>
    %411 = arith.mulf %406, %410 : vector<1x32xf32>
    %412 = arith.mulf %411, %392 : vector<1x32xf32>
    %413 = arith.addf %412, %393 : vector<1x32xf32>
    %c0_167 = arith.constant 0 : index
    %c0_168 = arith.constant 0 : index
    %414 = vector.load %arg20[%c0_167, %c0_168] : memref<32x32xbf16, #tpu.memory_space<vmem>>, vector<32x32xbf16>
    %415 = arith.truncf %413 : vector<1x32xf32> to vector<1x32xbf16>
    %cst_169 = arith.constant dense<0.000000e+00> : vector<1x32xf32>
    %416 = tpu.matmul %415, %414, %cst_169 {dimension_numbers = #tpu.dot_dimension_numbers<[1], [0], [0], [1], [0, 0, 1, 1], [], []>} : vector<1x32xbf16>, vector<32x32xbf16>, vector<1x32xf32> -> vector<1x32xf32>
    %c0_170 = arith.constant 0 : index
    %c0_171 = arith.constant 0 : index
    %417 = vector.load %arg21[%c0_170, %c0_171] : memref<1x32xf32, #tpu.memory_space<vmem>>, vector<1x32xf32>
    %418 = arith.addf %416, %417 : vector<1x32xf32>
    %419 = math.tanh %418 : vector<1x32xf32>
    %c0_172 = arith.constant 0 : index
    %c0_173 = arith.constant 0 : index
    %420 = vector.load %arg22[%c0_172, %c0_173] : memref<32x8xbf16, #tpu.memory_space<vmem>>, vector<32x8xbf16>
    %421 = arith.truncf %419 : vector<1x32xf32> to vector<1x32xbf16>
    %cst_174 = arith.constant dense<0.000000e+00> : vector<1x8xf32>
    %422 = tpu.matmul %421, %420, %cst_174 {dimension_numbers = #tpu.dot_dimension_numbers<[1], [0], [0], [1], [0, 0, 1, 1], [], []>} : vector<1x32xbf16>, vector<32x8xbf16>, vector<1x8xf32> -> vector<1x8xf32>
    %c0_175 = arith.constant 0 : index
    %c0_176 = arith.constant 0 : index
    %423 = vector.load %arg23[%c0_175, %c0_176] : memref<1x8xf32, #tpu.memory_space<vmem>>, vector<1x8xf32>
    %424 = arith.addf %422, %423 : vector<1x8xf32>
    %c0_177 = arith.constant 0 : index
    %c0_178 = arith.constant 0 : index
    %c0_179 = arith.constant 0 : index
    %425 = vector.load %arg24[%c0_177, %c0_178, %c0_179] : memref<1x1x8xf32, #tpu.memory_space<vmem>>, vector<1x1x8xf32>
    %426 = vector.shape_cast %425 : vector<1x1x8xf32> to vector<1x8xf32>
    %427 = vector.shape_cast %424 : vector<1x8xf32> to vector<1x1x8xf32>
    tpu.vector_store %arg24[%c0_177, %c0_178, %c0_179], %427 {strides = array<i32>} : memref<1x1x8xf32, #tpu.memory_space<vmem>>, vector<1x1x8xf32>,
    return
  }
  func.func @transform_0(%arg0: i32) -> (i32, i32, i32) {
    %c0_i32 = arith.constant 0 : i32
    %c0_i32_0 = arith.constant 0 : i32
    %c0_i32_1 = arith.constant 0 : i32
    return %arg0, %c0_i32, %c0_i32_0 : i32, i32, i32
  }
  func.func @transform_1(%arg0: i32) -> (i32, i32) {
    %c0_i32 = arith.constant 0 : i32
    %c0_i32_0 = arith.constant 0 : i32
    %c0_i32_1 = arith.constant 0 : i32
    return %c0_i32, %c0_i32_0 : i32, i32
  }
  func.func @transform_2(%arg0: i32) -> (i32, i32) {
    %c0_i32 = arith.constant 0 : i32
    %c0_i32_0 = arith.constant 0 : i32
    %c0_i32_1 = arith.constant 0 : i32
    return %c0_i32, %c0_i32_0 : i32, i32
  }
  func.func @transform_3(%arg0: i32) -> (i32, i32) {
    %c0_i32 = arith.constant 0 : i32
    %c0_i32_0 = arith.constant 0 : i32
    %c0_i32_1 = arith.constant 0 : i32
    return %c0_i32, %c0_i32_0 : i32, i32
  }
  func.func @transform_4(%arg0: i32) -> (i32, i32) {
    %c0_i32 = arith.constant 0 : i32
    %c0_i32_0 = arith.constant 0 : i32
    %c0_i32_1 = arith.constant 0 : i32
    return %c0_i32, %c0_i32_0 : i32, i32
  }
  func.func @transform_5(%arg0: i32) -> (i32, i32, i32) {
    %c0_i32 = arith.constant 0 : i32
    %c0_i32_0 = arith.constant 0 : i32
    %c0_i32_1 = arith.constant 0 : i32
    %c0_i32_2 = arith.constant 0 : i32
    return %c0_i32, %c0_i32_0, %c0_i32_1 : i32, i32, i32
  }
  func.func @transform_6(%arg0: i32) -> (i32, i32, i32) {
    %c0_i32 = arith.constant 0 : i32
    %c0_i32_0 = arith.constant 0 : i32
    %c0_i32_1 = arith.constant 0 : i32
    %c0_i32_2 = arith.constant 0 : i32
    return %c0_i32, %c0_i32_0, %c0_i32_1 : i32, i32, i32
  }
  func.func @transform_7(%arg0: i32) -> (i32, i32, i32) {
    %c0_i32 = arith.constant 0 : i32
    %c0_i32_0 = arith.constant 0 : i32
    %c0_i32_1 = arith.constant 0 : i32
    %c0_i32_2 = arith.constant 0 : i32
    return %c0_i32, %c0_i32_0, %c0_i32_1 : i32, i32, i32
  }
  func.func @transform_8(%arg0: i32) -> (i32, i32, i32) {
    %c0_i32 = arith.constant 0 : i32
    %c0_i32_0 = arith.constant 0 : i32
    %c0_i32_1 = arith.constant 0 : i32
    %c0_i32_2 = arith.constant 0 : i32
    return %c0_i32, %c0_i32_0, %c0_i32_1 : i32, i32, i32
  }
  func.func @transform_9(%arg0: i32) -> (i32, i32, i32) {
    %c0_i32 = arith.constant 0 : i32
    %c0_i32_0 = arith.constant 0 : i32
    %c0_i32_1 = arith.constant 0 : i32
    %c0_i32_2 = arith.constant 0 : i32
    return %c0_i32, %c0_i32_0, %c0_i32_1 : i32, i32, i32
  }
  func.func @transform_10(%arg0: i32) -> (i32, i32, i32) {
    %c0_i32 = arith.constant 0 : i32
    %c0_i32_0 = arith.constant 0 : i32
    %c0_i32_1 = arith.constant 0 : i32
    %c0_i32_2 = arith.constant 0 : i32
    return %c0_i32, %c0_i32_0, %c0_i32_1 : i32, i32, i32
  }
  func.func @transform_11(%arg0: i32) -> (i32, i32, i32) {
    %c0_i32 = arith.constant 0 : i32
    %c0_i32_0 = arith.constant 0 : i32
    %c0_i32_1 = arith.constant 0 : i32
    %c0_i32_2 = arith.constant 0 : i32
    return %c0_i32, %c0_i32_0, %c0_i32_1 : i32, i32, i32
  }
  func.func @transform_12(%arg0: i32) -> (i32, i32, i32) {
    %c0_i32 = arith.constant 0 : i32
    %c0_i32_0 = arith.constant 0 : i32
    %c0_i32_1 = arith.constant 0 : i32
    %c0_i32_2 = arith.constant 0 : i32
    return %c0_i32, %c0_i32_0, %c0_i32_1 : i32, i32, i32
  }
  func.func @transform_13(%arg0: i32) -> (i32, i32, i32) {
    %c0_i32 = arith.constant 0 : i32
    %c0_i32_0 = arith.constant 0 : i32
    %c0_i32_1 = arith.constant 0 : i32
    %c0_i32_2 = arith.constant 0 : i32
    return %c0_i32, %c0_i32_0, %c0_i32_1 : i32, i32, i32
  }
  func.func @transform_14(%arg0: i32) -> (i32, i32, i32) {
    %c0_i32 = arith.constant 0 : i32
    %c0_i32_0 = arith.constant 0 : i32
    %c0_i32_1 = arith.constant 0 : i32
    %c0_i32_2 = arith.constant 0 : i32
    return %c0_i32, %c0_i32_0, %c0_i32_1 : i32, i32, i32
  }
  func.func @transform_15(%arg0: i32) -> (i32, i32, i32) {
    %c0_i32 = arith.constant 0 : i32
    %c0_i32_0 = arith.constant 0 : i32
    %c0_i32_1 = arith.constant 0 : i32
    %c0_i32_2 = arith.constant 0 : i32
    return %c0_i32, %c0_i32_0, %c0_i32_1 : i32, i32, i32
  }
  func.func @transform_16(%arg0: i32) -> (i32, i32, i32) {
    %c0_i32 = arith.constant 0 : i32
    %c0_i32_0 = arith.constant 0 : i32
    %c0_i32_1 = arith.constant 0 : i32
    %c0_i32_2 = arith.constant 0 : i32
    return %c0_i32, %c0_i32_0, %c0_i32_1 : i32, i32, i32
  }
  func.func @transform_17(%arg0: i32) -> (i32, i32) {
    %c0_i32 = arith.constant 0 : i32
    %c0_i32_0 = arith.constant 0 : i32
    %c0_i32_1 = arith.constant 0 : i32
    return %c0_i32, %c0_i32_0 : i32, i32
  }
  func.func @transform_18(%arg0: i32) -> (i32, i32) {
    %c0_i32 = arith.constant 0 : i32
    %c0_i32_0 = arith.constant 0 : i32
    %c0_i32_1 = arith.constant 0 : i32
    return %c0_i32, %c0_i32_0 : i32, i32
  }
  func.func @transform_19(%arg0: i32) -> (i32, i32) {
    %c0_i32 = arith.constant 0 : i32
    %c0_i32_0 = arith.constant 0 : i32
    %c0_i32_1 = arith.constant 0 : i32
    return %c0_i32, %c0_i32_0 : i32, i32
  }
  func.func @transform_20(%arg0: i32) -> (i32, i32) {
    %c0_i32 = arith.constant 0 : i32
    %c0_i32_0 = arith.constant 0 : i32
    %c0_i32_1 = arith.constant 0 : i32
    return %c0_i32, %c0_i32_0 : i32, i32
  }
  func.func @transform_21(%arg0: i32) -> (i32, i32) {
    %c0_i32 = arith.constant 0 : i32
    %c0_i32_0 = arith.constant 0 : i32
    %c0_i32_1 = arith.constant 0 : i32
    return %c0_i32, %c0_i32_0 : i32, i32
  }
  func.func @transform_22(%arg0: i32) -> (i32, i32) {
    %c0_i32 = arith.constant 0 : i32
    %c0_i32_0 = arith.constant 0 : i32
    %c0_i32_1 = arith.constant 0 : i32
    return %c0_i32, %c0_i32_0 : i32, i32
  }
  func.func @transform_23(%arg0: i32) -> (i32, i32, i32) {
    %c0_i32 = arith.constant 0 : i32
    %c0_i32_0 = arith.constant 0 : i32
    %c0_i32_1 = arith.constant 0 : i32
    return %arg0, %c0_i32, %c0_i32_0 : i32, i32, i32
  }
}

</mosaic_0001>

<bundles_post_ra>
// kernel: _vit_forward.1
= control target key start
LH: loop header
LB: loop body
LE: loop exit
PB: predicated region body
PF: predicated region fallthrough
CT: control target
= control target key end

     0   :  { %s5082_s0 = inlined_call_operand.vmem [shape: f32[2,16,64], index: 0, kind: input, shape index: {}]   ;;  %s5083_s1 = inlined_call_operand.vmem [shape: bf16[64,32], index: 1, kind: input, shape index: {}]   ;;  %s5084_s2 = inlined_call_operand.vmem [shape: f32[1,32], index: 2, kind: input, shape index: {}]   ;;  %s5085_s3 = inlined_call_operand.vmem [shape: f32[16,32], index: 3, kind: input, shape index: {}]   ;;  %s5086_s4 = inlined_call_operand.vmem [shape: f32[1,32], index: 4, kind: input, shape index: {}]   ;;  %s5087_s5 = inlined_call_operand.vmem [shape: f32[2,1,32], index: 5, kind: input, shape index: {}]   ;;  %s5088_s6 = inlined_call_operand.vmem [shape: f32[2,1,32], index: 6, kind: input, shape index: {}]   ;;  %s5089_s7 = inlined_call_operand.vmem [shape: bf16[2,32,96], index: 7, kind: input, shape index: {}]   ;;  %s5090_s8 = inlined_call_operand.vmem [shape: f32[2,1,96], index: 8, kind: input, shape index: {}]   ;;  %s5091_s9 = inlined_call_operand.vmem [shape: bf16[2,32,32], index: 9, kind: input, shape index: {}]   ;;  %s5092_s10 = inlined_call_operand.vmem [shape: f32[2,1,32], index: 10, kind: input, shape index: {}]   ;;  %s5093_s11 = inlined_call_operand.vmem [shape: f32[2,1,32], index: 11, kind: input, shape index: {}]   ;;  %s5094_s12 = inlined_call_operand.vmem [shape: f32[2,1,32], index: 12, kind: input, shape index: {}]   ;;  %s5095_s13 = inlined_call_operand.vmem [shape: bf16[2,32,64], index: 13, kind: input, shape index: {}]   ;;  %s5096_s14 = inlined_call_operand.vmem [shape: f32[2,1,64], index: 14, kind: input, shape index: {}]   ;;  %s5097_s15 = inlined_call_operand.vmem [shape: bf16[2,64,32], index: 15, kind: input, shape index: {}]   ;;  %s5098_s16 = inlined_call_operand.vmem [shape: f32[2,1,32], index: 16, kind: input, shape index: {}]   ;;  %s5099_s17 = inlined_call_operand.vmem [shape: f32[1,32], index: 17, kind: input, shape index: {}]   ;;  %s5100_s18 = inlined_call_operand.vmem [shape: f32[1,32], index: 18, kind: input, shape index: {}]   ;;  %s5101_s19 = inlined_call_operand.vmem [shape: bf16[32,32], index: 19, kind: input, shape index: {}]   ;;  %s5102_s20 = inlined_call_operand.vmem [shape: f32[1,32], index: 20, kind: input, shape index: {}]   ;;  %s5103_s21 = inlined_call_operand.vmem [shape: bf16[32,8], index: 21, kind: input, shape index: {}]   ;;  %s5104_s22 = inlined_call_operand.vmem [shape: f32[1,8], index: 22, kind: input, shape index: {}]   ;;  %s5105_s23 = inlined_call_operand.hbm [shape: f32[2,1,8], index: 23, kind: output, shape index: {}]  }
   0x1   :  { %5147 = sst [smem:[#allocation10_spill]] %s5082_s0 }
   0x2   :  { %5148 = sst [smem:[#allocation11_spill]] %s5083_s1 }
   0x3   :  { %5149 = sst [smem:[#allocation12_spill]] %s5084_s2 }
   0x4   :  { %5150 = sst [smem:[#allocation13_spill]] %s5085_s3 }
   0x5   :  { %5151 = sst [smem:[#allocation14_spill]] %s5086_s4 }
   0x6   :  { %5152 = sst [smem:[#allocation15_spill]] %s5087_s5 }
   0x7   :  { %5153 = sst [smem:[#allocation16_spill]] %s5088_s6 }
   0x8   :  { %5154 = sst [smem:[#allocation17_spill]] %s5089_s7 }
   0x9   :  { %5155 = sst [smem:[#allocation18_spill]] %s5090_s8 }
   0xa   :  { %5156 = sst [smem:[#allocation19_spill]] %s5091_s9 }
   0xb   :  { %28 = vsyncpa [#allocation3], 0 }
   0xc   :  { %30 = vsyncpa [#allocation3 + $0x1], 0  ;;  %s4392_s4 = smov 0   ;;  %s4394_s30 = smov 0  }
   0xd   :  { %s4396_s24 = smov 0   ;;  %s4398_s25 = smov 0  }
   0xe LB: > { %5157 = sst [smem:[#allocation5_spill]] %s4240_s4  ;;  %s4413_s5 = sadd.s32 4294967295, %s4252_s25   ;;  %s4252_s25 = sphi %s4398_s25, %s5192_s25   ;;  %s4248_s24 = sphi %s4396_s24, %s5194_s24   ;;  %s4244_s30 = sphi %s4394_s30, %s5196_s30   ;;  %s4240_s4 = sphi %s4392_s4, %s5195_s4  }
   0xf   : > { %5158 = sst [smem:[#allocation6_spill]] %s4248_s24  ;;  %s3444_s1 = sadd.s32 4294967294, %s4252_s25  }
  0x10   : > { %s4417_s26 = sadd.s32 1, %s4252_s25   ;;  %s531_s2 = sadd.s32 1, %s4248_s24 }
  0x11   : > { %5159 = sst [smem:[#allocation7_spill]] %s4417_s26  ;;  %s528_s6 = ssub.s32 %s4252_s25, %s4417_s26 }
  0x12   : > { %p541_p0 = scmp.ne.s32.totalorder %s4248_s24, %s4244_s30  ;;  %p529_p1 = scmp.eq.s32.totalorder %s528_s6, 0 }
  0x13   : > { %p542_p2 = scmp.eq.s32.totalorder %s4413_s5, 1  ;;  %p547_p3 = scmp.ne.s32.totalorder %s4244_s30, %s4240_s4 }
  0x14   : > { %p548_p4 = scmp.eq.s32.totalorder %s3444_s1, 1  ;;  %p3447_p7 = scmp.ge.s32.totalorder %s4252_s25, 1 }
  0x15   : > { %s4428_s27 = scalar_select %p529_p1, %s4248_s24, %s531_s2  }
  0x16   : > { %p4430_p5 = por %p542_p2, %p541_p0  ;;  %p4434_p6 = por %p548_p4, %p547_p3 }
  0x17   : > { %5160 = sst [smem:[#allocation8_spill]] %s4428_s27  ;;  %p640_p8 = scmp.lt.s32.totalorder %s4252_s25, 3 }
  0x18   : > { %s5162_s28 = scalar_select %p4434_p6, 1, 0 }
  0x19   : > { %p641_p9 = pnand %p3447_p7, %p640_p8 }
  0x1a   : > { %5163 = sst [smem:[#allocation9_spill]] %s5162_s28  ;;  %p703_p10 = scmp.lt.s32.totalorder (!%p641_p9), %s4413_s5, 1 }
  0x1b   : > { %644 = sbr.rel (%p641_p9) target bundleno = 9043 (0x2353), region = 112  ;;  %s5164_s0 = sld [smem:[#allocation11_spill]] (!%p641_p9) }
  0x1c   : > { %s5165_s1 = sld [smem:[#allocation10_spill]] (!%p641_p9)  ;;  %s5122_s29 = smov (!%p641_p9), 56  }
  0x1d   : > { %s5169_s4 = sld [smem:[#allocation17_spill]] (!%p641_p9)  ;;  %s5120_s3 = smov (!%p641_p9), 80  }
  0x1e   : > { %s5171_s24 = sld [smem:[#allocation15_spill]] (!%p641_p9) }
  0x1f   : > { %s5174_s8 = sld [smem:[#allocation18_spill]] (!%p641_p9) }
  0x20   : > { %v4254_v1 = vmov 0.0   ;;  %vm4255_vm0 = vmmov 0   ;;  %s704_s6 = scalar_select %p703_p10, %s4413_s5, 1  ;;  %vm751_vm1 = vcmask 523264   ;;  %v800_v8 = vlaneseq }
  0x21   : > { %v4028_v0 = vld [vmem:[%s5164_s0 + $0x18] sm:$0xff]   ;;  %3690 = vmatprep.subr.bf16.mxu0 %v4254_v1  ;;  %v4029_v2 = vld [vmem:[%s5164_s0 + $0x10] sm:$0xff]   ;;  %3698 = vmatprep.mubr.msk.bf16.mxu0 %vm4255_vm0, %v4254_v1  ;;  %v4030_v3 = vld [vmem:[%s5164_s0 + $0x8] sm:$0xff]   ;;  %vm817_vm3 = vcmask 261120   ;;  %vm963_vm4 = vcmask 64512   ;;  %vm1030_vm6 = vcmask 195584  }
  0x22   : > { %3691 = vmatpush3.bf16.msra.mxu0 %v4028_v0  ;;  %s3578_s27 = sshll.u32 %s704_s6, 4  ;;  %v4031_v4 = vld [vmem:[%s5164_s0] sm:$0xff]   ;;  %v801_v9 = vshrl.u32 %v800_v8, 7  ;;  %s5167_s6 = sld [smem:[#allocation12_spill]]  ;;  %vm1077_vm7 = vcmask 1043456   ;;  %vm1681_vm8 = vcmask 130048  }
  0x23   : > { %3692 = vmatprep.subr.bf16.mxu0 %v4254_v1  ;;  %s707_s2 = scalar_lea.vmem %s5165_s1, %s3578_s27  ;;  %s5166_s27 = sld [smem:[#allocation14_spill]]  ;;  %v4032_v41 = vld [vmem:[%s5169_s4 + $0x8] sm:$0xff]   ;;  %vm3235_vm9 = vcmask 253952   ;;  %vm3374_vm10 = vcmask 57344  }
  0x24   : > { %v709_v5 = vld [vmem:[%s707_s2] sm:$0xff]  ;;  %v710_v6 = vld [vmem:[%s707_s2 + $0x8] sm:$0xff]  ;;  %vm802_vm2 = vcmp.eq.s32.totalorder %v801_v9, 0  ;;  %s5168_s1 = sld [smem:[#allocation13_spill]]  ;;  %s5170_s28 = smov %s5169_s4  ;;  %3702 = vmatprep.subr.bf16.mxu1 %v4032_v41 }
  0x25   : > { %v719_v7 = vpack.c.bf16 %v710_v6, %v709_v5  ;;  %v4033_v42 = vld [vmem:[%s5170_s28] sm:$0xff]   ;;  %3703 = vmatpush3.bf16.msra.mxu1 %v4032_v41  ;;  %s5172_s26 = smov %s5171_s24  ;;  %s5142_s2 = smov 96  }
  0x26   : > { %3693 = vmatpush3.bf16.msra.mxu0 %v4029_v2  ;;  %3704 = vmatprep.subr.bf16.mxu1 %v4033_v42  ;;  %v3457_v54 = vld [vmem:[%s5171_s24] ss:$0 sm:$0xff]  ;;  %s5138_s24 = smov 64   ;;  %s5116_s4 = smov 88  }
  0x27   : > { %3694 = vmatprep.subr.bf16.mxu0 %v4254_v1  ;;  %v3459_v5 = vld [vmem:[%s5174_s8] ss:$0 sm:$0xff]  ;;  %s5175_s9 = sld [smem:[#allocation19_spill]]  ;;  %s5180_s0 = smov 56  }
  0x28   : > { %v3450_v13 = vld [vmem:[%s5167_s6] ss:$0 sm:$0xff]  ;;  %s5173_s6 = sld [smem:[#allocation16_spill]] }
  0x29   : > { %v3456_v10 = vld [vmem:[%s5166_s27] ss:$0 sm:$0xff]  ;;  %3705 = vmatpush3.bf16.msra.mxu1 %v4033_v42  ;;  %s5136_s27 = smov 120  }
  0x2a   : > { %3695 = vmatpush3.bf16.msra.mxu0 %v4030_v3  ;;  %v4468_v11 = vsel %vm802_vm2, %v3456_v10, 0.0  ;;  %v796_v15 = vld [vmem:[%s5168_s1] sm:$0xff]  ;;  %v797_v20 = vld [vmem:[%s5168_s1 + $0x8] sm:$0xff]  ;;  %s5181_s1 = smov 80  }
  0x2b   : > { %3696 = vmatprep.subr.bf16.mxu0 %v4254_v1  ;;  %v824_v12 = vsel %vm817_vm3, %v4468_v11, 0.0 }
  0x2c   : > { %825 = vadd.xlane.f32.xlu1 %v824_v12 }
  0x2e   : > { %3697 = vmatpush3.bf16.msra.mxu0 %v4031_v4  ;;  %v3458_v60 = vld [vmem:[%s5173_s6] ss:$0 sm:$0xff] }
  0x31   : > { %3699 = vmatmul.mubr.msk.bf16.vlgmr.msra.gmra.mxu0 %vm751_vm1, %v719_v7 }
  0xb5   : > { %v826_v26 = vpop.xlane.xlu1 %825 }
  0xb6   : > { %v830_v27 = vmul.f32 0.03125, %v826_v26 }
  0xb8   : > { %v833_v30 = vsub.f32 %v4468_v11, %v830_v27  ;;  %v4257_v27 = vmov -1e+30  }
  0xba   : > { %v836_v35 = vmul.f32 %v833_v30, %v833_v30 }
  0xbc   : > { %v843_v38 = vsel %vm817_vm3, %v836_v35, 0.0 }
  0xf1   : > { %v789_v14 = vpop.f32.mrf.mxu0 }
  0xf2   : > { %v790_v16 = vadd.f32 %v3450_v13, %v789_v14 }
  0xf3   : > { %v3700_v17 = vpop.f32.mrf.mxu0 }
  0xf4   : > { %v4478_v18 = vadd.f32 %v796_v15, %v790_v16 }
  0xf5   : > { %v792_v19 = vpop.f32.mrf.mxu0 }
  0xf6   : > { %v793_v21 = vadd.f32 %v3450_v13, %v792_v19  ;;  %v818_v22 = vsel %vm817_vm3, %v4478_v18, 0.0 }
  0xf7   : > { %819 = vadd.xlane.f32.xlu0 %v818_v22  ;;  %v3701_v23 = vpop.f32.mrf.mxu0  ;;  %v812_v22 = vand.u32 127, %v800_v8 }
  0xf8   : > { %v4485_v24 = vadd.f32 %v797_v20, %v793_v21 }
  0xf9   : > { %vm813_vm5 = vcmp.le.s32.totalorder %v812_v22, 16 }
  0xfa   : > { %v821_v25 = vsel %vm817_vm3, %v4485_v24, 0.0 }
  0xfb   : > { %822 = vadd.xlane.f32.xlu0 %v821_v25 }
 0x180   : > { %v820_v28 = vpop.xlane.xlu0 %819 }
 0x181   : > { %v828_v29 = vmul.f32 0.03125, %v820_v28  ;;  %v4529_v28 = vsel %vm813_vm5, 0.0, %v4257_v27 }
 0x183   : > { %v831_v31 = vsub.f32 %v4478_v18, %v828_v29 }
 0x184   : > { %v823_v32 = vpop.xlane.xlu0 %822 }
 0x185   : > { %v829_v33 = vmul.f32 0.03125, %v823_v32  ;;  %v834_v34 = vmul.f32 %v831_v31, %v831_v31 }
 0x187   : > { %v832_v36 = vsub.f32 %v4485_v24, %v829_v33  ;;  %v837_v37 = vsel %vm817_vm3, %v834_v34, 0.0 }
 0x188   : > { %838 = vadd.xlane.f32.xlu1 %v837_v37 }
 0x189   : > { %v835_v39 = vmul.f32 %v832_v36, %v832_v36 }
 0x18b   : > { %v840_v40 = vsel %vm817_vm3, %v835_v39, 0.0 }
 0x18c   : > { %844 = vadd.xlane.f32.xlu1 %v843_v38  ;;  %841 = vadd.xlane.f32.xlu0 %v840_v40 }
 0x211   : > { %v839_v43 = vpop.xlane.xlu1 %838 }
 0x212   : > { %v846_v44 = vmul.f32 0.03125, %v839_v43 }
 0x214   : > { %v849_v45 = vadd.f32 1e-05, %v846_v44 }
 0x215   : > { %v845_v46 = vpop.xlane.xlu1 %844  ;;  %v842_v47 = vpop.xlane.xlu0 %841 }
 0x216   : > { %4056 = vrsqrt.f32 %v849_v45  ;;  %v848_v48 = vmul.f32 0.03125, %v845_v46  ;;  %v847_v49 = vmul.f32 0.03125, %v842_v47 }
 0x218   : > { %v851_v50 = vadd.f32 1e-05, %v848_v48  ;;  %v850_v51 = vadd.f32 1e-05, %v847_v49 }
 0x21a   : > { %4058 = vrsqrt.f32 %v851_v50 }
 0x21b   : > { %4060 = vrsqrt.f32 %v850_v51 }
 0x223   : > { %v4057_v52 = vpop.eup %4056 }
 0x224   : > { %v855_v53 = vmul.f32 %v4057_v52, %v831_v31 }
 0x226   : > { %v864_v59 = vmul.f32 %v3457_v54, %v855_v53 }
 0x227   : > { %v4059_v55 = vpop.eup %4058 }
 0x228   : > { %v4061_v56 = vpop.eup %4060  ;;  %v857_v57 = vmul.f32 %v4059_v55, %v833_v30  ;;  %v873_v0 = vadd.f32 %v3458_v60, %v864_v59 }
 0x229   : > { %v856_v58 = vmul.f32 %v4061_v56, %v832_v36 }
 0x22a   : > { %v866_v61 = vmul.f32 %v3457_v54, %v857_v57 }
 0x22b   : > { %v865_v62 = vmul.f32 %v3457_v54, %v856_v58 }
 0x22c   : > { %v875_v63 = vadd.f32 %v3458_v60, %v866_v61 }
 0x22d   : > { %v874_v2 = vadd.f32 %v3458_v60, %v865_v62 }
 0x22e   : > { %v881_v3 = vpack.c.bf16 %v875_v63, %v875_v63 }
 0x22f   : > { %v880_v4 = vpack.c.bf16 %v874_v2, %v873_v0 }
 0x231   : > { %3706 = vmatprep.mubr.msk.bf16.mxu1 %vm817_vm3, %v880_v4 }
 0x232   : > { %3707 = vmatmul.mubr.msk.bf16.vlgmr.msra.gmra.mxu1 %vm817_vm3, %v881_v3 }
 0x2f2   : > { %v3708_v6 = vpop.f32.mrf.mxu1 }
 0x2f3   : > { %v950_v7 = vadd.f32 %v3708_v6, %v3459_v5 }
 0x2f4   : > { %v941_v9 = vpop.f32.mrf.mxu1 }
 0x2f5   : > { %v4512_v10 = vpack.c.bf16 %v950_v7, %v950_v7  ;;  %v942_v14 = vadd.f32 %v3459_v5, %v941_v9 }
 0x2f6   : > { %v3709_v12 = vpop.f32.mrf.mxu1 }
 0x2f7   : > { %961 = vrot.lane.b32.xlu0 %v4512_v10, %s5142_s2 }
 0x2f8   : > { %v944_v13 = vpop.f32.mrf.mxu1 }
 0x2f9   : > { %v945_v15 = vadd.f32 %v3459_v5, %v944_v13 }
 0x2fb   : > { %v4516_v16 = vpack.c.bf16 %v945_v15, %v942_v14 }
 0x2fd   : > { %959 = vrot.lane.b32.xlu1 %v4516_v16, %s5142_s2  ;;  %3714 = vmatprep.mubr.msk.bf16.mxu1 %vm963_vm4, %v4516_v16  ;;  %s5182_s2 = smov 112  }
 0x369   : > { %v962_v17 = vpop.permute.xlu0 %961 }
 0x36a   : > { %3918 = vmatprep.subr.msk.bf16.mxu1 %vm963_vm4, %v962_v17  ;;  %v974_v19 = vsel %vm963_vm4, %v962_v17, 0 }
 0x36b   : > { %3711 = vmatpush3.bf16.xpose.msra.mxu1 %v974_v19 }
 0x36f   : > { %v960_v20 = vpop.permute.xlu1 %959 }
 0x370   : > { %3919 = vmatprep.subr.msk.bf16.mxu1 %vm963_vm4, %v960_v20  ;;  %v971_v21 = vsel %vm963_vm4, %v960_v20, 0 }
 0x373   : > { %3713 = vmatpush3.bf16.xpose.msra.mxu1 %v971_v21 }
 0x37a   : > { %3715 = vmatmul.mubr.msk.bf16.vlgmr.msra.gmra.mxu1 %vm963_vm4, %v4512_v10 }
 0x43a   : > { %v3716_v23 = vpop.f32.mrf.mxu1 }
 0x43b   : > { %v1026_v32 = vmul.f32 0.35355338, %v3716_v23 }
 0x43c   : > { %v1010_v25 = vpop.f32.mrf.mxu1 }
 0x43d   : > { %v1024_v26 = vmul.f32 0.35355338, %v1010_v25  ;;  %v1029_v36 = vadd.f32 %v1026_v32, %v4529_v28 }
 0x43e   : > { %v3717_v29 = vpop.f32.mrf.mxu1 }
 0x43f   : > { %v1027_v30 = vadd.f32 %v1024_v26, %v4529_v28  ;;  %v1037_v37 = vsel %vm1030_vm6, %v1029_v36, -inf }
 0x440   : > { %v1013_v31 = vpop.f32.mrf.mxu1 }
 0x441   : > { %v1025_v33 = vmul.f32 0.35355338, %v1013_v31  ;;  %v1031_v34 = vsel %vm1030_vm6, %v1027_v30, -inf }
 0x442   : > { %1032 = vmax.xlane.f32.xlu1 %v1031_v34 }
 0x443   : > { %v1028_v35 = vadd.f32 %v1025_v33, %v4529_v28 }
 0x445   : > { %v1034_v8 = vsel %vm1030_vm6, %v1028_v35, -inf }
 0x446   : > { %1035 = vmax.xlane.f32.xlu0 %v1034_v8 }
 0x44a   : > { %1038 = vmax.xlane.f32.xlu0 %v1037_v37 }
 0x4cb   : > { %v1033_v38 = vpop.xlane.xlu1 %1032 }
 0x4cc   : > { %v1040_v41 = vsub.f32 %v1027_v30, %v1033_v38 }
 0x4ce   : > { %v1043_v45 = vmul.f32 1.442695, %v1040_v41 }
 0x4cf   : > { %v1036_v39 = vpop.xlane.xlu0 %1035 }
 0x4d0   : > { %v1041_v40 = vsub.f32 %v1028_v35, %v1036_v39 }
 0x4d2   : > { %v1045_v42 = vmul.f32 1.442695, %v1041_v40 }
 0x4d3   : > { %v1039_v43 = vpop.xlane.xlu0 %1038 }
 0x4d4   : > { %4062 = vpow2.f32 %v1045_v42  ;;  %v1042_v44 = vsub.f32 %v1029_v36, %v1039_v43 }
 0x4d6   : > { %v1047_v46 = vmul.f32 1.442695, %v1042_v44 }
 0x4d8   : > { %4064 = vpow2.f32 %v1047_v46 }
 0x4d9   : > { %4066 = vpow2.f32 %v1043_v45 }
 0x4e1   : > { %v4063_v47 = vpop.eup %4062 }
 0x4e2   : > { %v1052_v48 = vsel %vm1030_vm6, %v4063_v47, 0.0 }
 0x4e3   : > { %1053 = vadd.xlane.f32.xlu0 %v1052_v48 }
 0x4e5   : > { %v4065_v49 = vpop.eup %4064 }
 0x4e6   : > { %v1055_v50 = vsel %vm1030_vm6, %v4065_v49, 0.0  ;;  %v4067_v51 = vpop.eup %4066 }
 0x4e7   : > { %1056 = vadd.xlane.f32.xlu1 %v1055_v50  ;;  %v1049_v52 = vsel %vm1030_vm6, %v4067_v51, 0.0 }
 0x4eb   : > { %1050 = vadd.xlane.f32.xlu1 %v1049_v52 }
 0x4f9   : > { %1068 = vrot.lane.b32.xlu0 %v4512_v10, %s5138_s24 }
 0x4fc   : > { %1066 = vrot.lane.b32.xlu1 %v4516_v16, %s5138_s24  ;;  %s5140_s24 = smov 24  }
 0x4fd   : > { %1129 = vrot.lane.b32.xlu0 %v4516_v16, %s5136_s27 }
 0x500   : > { %1135 = vrot.lane.b32.xlu1 %v4512_v10, %s5116_s4 }
 0x504   : > { %1133 = vrot.lane.b32.xlu1 %v4516_v16, %s5116_s4  ;;  %s5118_s4 = smov 112  }
 0x508   : > { %1131 = vrot.lane.b32.xlu1 %v4512_v10, %s5136_s27  ;;  %s5176_s27 = smov 96  }
 0x56c   : > { %v1054_v53 = vpop.xlane.xlu0 %1053 }
 0x570   : > { %v1057_v54 = vpop.xlane.xlu1 %1056  ;;  %v1069_v55 = vpop.permute.xlu0 %1068 }
 0x571   : > { %3920 = vmatprep.subr.msk.bf16.mxu0 %vm1077_vm7, %v1069_v55  ;;  %v1079_v56 = vsel %vm1077_vm7, %v1069_v55, 0  ;;  %4068 = vrcp.f32 %v1057_v54 }
 0x572   : > { %3719 = vmatpush3.bf16.msra.mxu0 %v1079_v56  ;;  %4070 = vrcp.f32 %v1054_v53 }
 0x574   : > { %v1051_v57 = vpop.xlane.xlu1 %1050  ;;  %v1130_v5 = vpop.permute.xlu0 %1129 }
 0x575   : > { %4072 = vrcp.f32 %v1051_v57 }
 0x578   : > { %v1067_v58 = vpop.permute.xlu1 %1066 }
 0x579   : > { %3720 = vmatprep.subr.bf16.mxu0 %v1067_v58 }
 0x57a   : > { %3721 = vmatpush3.bf16.msra.mxu0 %v1067_v58 }
 0x57c   : > { %v1136_v59 = vpop.permute.xlu1 %1135 }
 0x57d   : > { %3921 = vmatprep.subr.msk.bf16.mxu0 %vm963_vm4, %v1136_v59  ;;  %v1147_v6 = vsel %vm963_vm4, %v1136_v59, 0 }
 0x57e   : > { %v4069_v60 = vpop.eup %4068 }
 0x57f   : > { %v4071_v61 = vpop.eup %4070  ;;  %v1063_v63 = vmul.f32 %v4069_v60, %v4065_v49 }
 0x580   : > { %v1062_v2 = vmul.f32 %v4071_v61, %v4063_v47  ;;  %v1134_v7 = vpop.permute.xlu1 %1133 }
 0x581   : > { %v1065_v4 = vpack.c.bf16 %v1063_v63, %v1063_v63  ;;  %v1144_v9 = vsel %vm963_vm4, %v1134_v7, 0 }
 0x582   : > { %v4073_v62 = vpop.eup %4072 }
 0x583   : > { %v1061_v0 = vmul.f32 %v4073_v62, %v4067_v51 }
 0x584   : > { %v1132_v12 = vpop.permute.xlu1 %1131 }
 0x585   : > { %v1064_v3 = vpack.c.bf16 %v1062_v2, %v1061_v0 }
 0x587   : > { %3722 = vmatprep.mubr.msk.bf16.mxu0 %vm1030_vm6, %v1064_v3 }
 0x588   : > { %3723 = vmatmul.mubr.msk.bf16.vlgmr.msra.gmra.mxu0 %vm1030_vm6, %v1065_v4 }
 0x589   : > { %3727 = vmatpush3.bf16.xpose.msra.mxu0 %v1147_v6  ;;  %3730 = vmatprep.mubr.msk.bf16.mxu0 %vm963_vm4, %v1130_v5 }
 0x58a   : > { %3922 = vmatprep.subr.msk.bf16.mxu0 %vm963_vm4, %v1134_v7 }
 0x591   : > { %3729 = vmatpush3.bf16.xpose.msra.mxu0 %v1144_v9 }
 0x598   : > { %3731 = vmatmul.mubr.msk.bf16.vlgmr.msra.gmra.mxu0 %vm963_vm4, %v1132_v12 }
 0x648   : > { %v4562_v13 = vpop.f32.mrf.mxu0 }
 0x64a   : > { %v4564_v14 = vpop.f32.mrf.mxu0 }
 0x64c   : > { %v3725_v15 = vpop.f32.mrf.mxu0 }
 0x64e   : > { %v4566_v17 = vpop.f32.mrf.mxu0 }
 0x658   : > { %v3732_v19 = vpop.f32.mrf.mxu0 }
 0x659   : > { %v1199_v21 = vmul.f32 0.35355338, %v3732_v19 }
 0x65a   : > { %v1183_v20 = vpop.f32.mrf.mxu0 }
 0x65b   : > { %v1197_v22 = vmul.f32 0.35355338, %v1183_v20  ;;  %v1202_v30 = vadd.f32 %v1199_v21, %v4529_v28 }
 0x65c   : > { %v3733_v23 = vpop.f32.mrf.mxu0 }
 0x65d   : > { %v1200_v25 = vadd.f32 %v1197_v22, %v4529_v28  ;;  %v1209_v32 = vsel %vm1030_vm6, %v1202_v30, -inf }
 0x65e   : > { %v1186_v26 = vpop.f32.mrf.mxu0 }
 0x65f   : > { %v1198_v27 = vmul.f32 0.35355338, %v1186_v26  ;;  %v1203_v29 = vsel %vm1030_vm6, %v1200_v25, -inf }
 0x660   : > { %1204 = vmax.xlane.f32.xlu0 %v1203_v29 }
 0x661   : > { %v1201_v31 = vadd.f32 %v1198_v27, %v4529_v28 }
 0x663   : > { %v1206_v33 = vsel %vm1030_vm6, %v1201_v31, -inf }
 0x664   : > { %1210 = vmax.xlane.f32.xlu0 %v1209_v32  ;;  %1207 = vmax.xlane.f32.xlu1 %v1206_v33 }
 0x6e9   : > { %v1205_v34 = vpop.xlane.xlu0 %1204 }
 0x6ea   : > { %v1212_v35 = vsub.f32 %v1200_v25, %v1205_v34 }
 0x6ec   : > { %v1215_v8 = vmul.f32 1.442695, %v1212_v35 }
 0x6ed   : > { %v1211_v36 = vpop.xlane.xlu0 %1210  ;;  %v1208_v37 = vpop.xlane.xlu1 %1207 }
 0x6ee   : > { %4074 = vpow2.f32 %v1215_v8  ;;  %v1214_v38 = vsub.f32 %v1202_v30, %v1211_v36  ;;  %v1213_v39 = vsub.f32 %v1201_v31, %v1208_v37 }
 0x6f0   : > { %v1219_v40 = vmul.f32 1.442695, %v1214_v38  ;;  %v1217_v41 = vmul.f32 1.442695, %v1213_v39 }
 0x6f2   : > { %4076 = vpow2.f32 %v1219_v40 }
 0x6f3   : > { %4078 = vpow2.f32 %v1217_v41 }
 0x6fb   : > { %v4075_v42 = vpop.eup %4074 }
 0x6fc   : > { %v1221_v43 = vsel %vm1030_vm6, %v4075_v42, 0.0 }
 0x6fd   : > { %1222 = vadd.xlane.f32.xlu0 %v1221_v43 }
 0x6ff   : > { %v4077_v44 = vpop.eup %4076 }
 0x700   : > { %v4079_v45 = vpop.eup %4078  ;;  %v1227_v46 = vsel %vm1030_vm6, %v4077_v44, 0.0 }
 0x701   : > { %1228 = vadd.xlane.f32.xlu1 %v1227_v46  ;;  %v1224_v47 = vsel %vm1030_vm6, %v4079_v45, 0.0 }
 0x702   : > { %1225 = vadd.xlane.f32.xlu0 %v1224_v47 }
 0x712   : > { %1238 = vrot.lane.b32.xlu1 %v4516_v16, %s5122_s29 }
 0x716   : > { %1306 = vrot.lane.b32.xlu1 %v4512_v10, %s5120_s3 }
 0x718   : > { %1240 = vrot.lane.b32.xlu0 %v4512_v10, %s5122_s29  ;;  %s5124_s29 = smov 104  }
 0x71a   : > { %1304 = vrot.lane.b32.xlu1 %v4516_v16, %s5120_s3  ;;  %s5126_s3 = smov 72  }
 0x71c   : > { %1300 = vrot.lane.b32.xlu0 %v4516_v16, %s5118_s4 }
 0x71e   : > { %1302 = vrot.lane.b32.xlu1 %v4512_v10, %s5118_s4  ;;  %s5128_s4 = smov 48  }
 0x786   : > { %v1223_v48 = vpop.xlane.xlu0 %1222 }
 0x787   : > { %4080 = vrcp.f32 %v1223_v48 }
 0x78a   : > { %v1229_v49 = vpop.xlane.xlu1 %1228 }
 0x78b   : > { %v1226_v50 = vpop.xlane.xlu0 %1225  ;;  %4082 = vrcp.f32 %v1229_v49 }
 0x78c   : > { %4084 = vrcp.f32 %v1226_v50 }
 0x78e   : > { %v1239_v52 = vpop.permute.xlu1 %1238 }
 0x78f   : > { %v1241_v51 = vpop.permute.xlu0 %1240 }
 0x790   : > { %3923 = vmatprep.subr.msk.bf16.mxu1 %vm1077_vm7, %v1241_v51  ;;  %v1250_v53 = vsel %vm1077_vm7, %v1241_v51, 0 }
 0x791   : > { %3735 = vmatpush3.bf16.msra.mxu1 %v1250_v53 }
 0x792   : > { %3736 = vmatprep.subr.bf16.mxu1 %v1239_v52  ;;  %v1307_v54 = vpop.permute.xlu1 %1306 }
 0x793   : > { %v1301_v63 = vpop.permute.xlu0 %1300  ;;  %v1318_v0 = vsel %vm963_vm4, %v1307_v54, 0 }
 0x794   : > { %v4081_v55 = vpop.eup %4080 }
 0x795   : > { %3737 = vmatpush3.bf16.msra.mxu1 %v1239_v52  ;;  %v1233_v59 = vmul.f32 %v4081_v55, %v4075_v42 }
 0x796   : > { %3924 = vmatprep.subr.msk.bf16.mxu1 %vm963_vm4, %v1307_v54  ;;  %v1305_v2 = vpop.permute.xlu1 %1304 }
 0x797   : > { %v1315_v3 = vsel %vm963_vm4, %v1305_v2, 0 }
 0x798   : > { %v4083_v56 = vpop.eup %4082 }
 0x799   : > { %v4085_v57 = vpop.eup %4084  ;;  %v1235_v58 = vmul.f32 %v4083_v56, %v4077_v44 }
 0x79a   : > { %v1234_v60 = vmul.f32 %v4085_v57, %v4079_v45  ;;  %v1303_v4 = vpop.permute.xlu1 %1302 }
 0x79b   : > { %v1237_v61 = vpack.c.bf16 %v1235_v58, %v1235_v58 }
 0x79c   : > { %v1236_v62 = vpack.c.bf16 %v1234_v60, %v1233_v59 }
 0x79e   : > { %3738 = vmatprep.mubr.msk.bf16.mxu1 %vm1030_vm6, %v1236_v62 }
 0x79f   : > { %3739 = vmatmul.mubr.msk.bf16.vlgmr.msra.gmra.mxu1 %vm1030_vm6, %v1237_v61 }
 0x7a0   : > { %3743 = vmatpush3.bf16.xpose.msra.mxu1 %v1318_v0  ;;  %3746 = vmatprep.mubr.msk.bf16.mxu1 %vm963_vm4, %v1301_v63 }
 0x7a1   : > { %3925 = vmatprep.subr.msk.bf16.mxu1 %vm963_vm4, %v1305_v2 }
 0x7a8   : > { %3745 = vmatpush3.bf16.xpose.msra.mxu1 %v1315_v3 }
 0x7af   : > { %3747 = vmatmul.mubr.msk.bf16.vlgmr.msra.gmra.mxu1 %vm963_vm4, %v1303_v4 }
 0x85f   : > { %v4599_v5 = vpop.f32.mrf.mxu1 }
 0x861   : > { %v4601_v6 = vpop.f32.mrf.mxu1 }
 0x863   : > { %v3741_v7 = vpop.f32.mrf.mxu1 }
 0x865   : > { %v4603_v9 = vpop.f32.mrf.mxu1 }
 0x866   : > { %v3998_v12 = vpack.i.bf16 %v4603_v9, %v4601_v6 }
 0x86f   : > { %v3748_v15 = vpop.f32.mrf.mxu1 }
 0x870   : > { %v1370_v20 = vmul.f32 0.35355338, %v3748_v15 }
 0x871   : > { %v1354_v19 = vpop.f32.mrf.mxu1 }
 0x872   : > { %v1368_v21 = vmul.f32 0.35355338, %v1354_v19  ;;  %v1373_v29 = vadd.f32 %v1370_v20, %v4529_v28 }
 0x873   : > { %v3749_v22 = vpop.f32.mrf.mxu1 }
 0x874   : > { %v1371_v23 = vadd.f32 %v1368_v21, %v4529_v28  ;;  %v1380_v31 = vsel %vm1030_vm6, %v1373_v29, -inf }
 0x875   : > { %v1357_v25 = vpop.f32.mrf.mxu1 }
 0x876   : > { %v1369_v26 = vmul.f32 0.35355338, %v1357_v25  ;;  %v1374_v27 = vsel %vm1030_vm6, %v1371_v23, -inf }
 0x877   : > { %1375 = vmax.xlane.f32.xlu0 %v1374_v27 }
 0x878   : > { %v1372_v30 = vadd.f32 %v1369_v26, %v4529_v28 }
 0x87a   : > { %v1377_v32 = vsel %vm1030_vm6, %v1372_v30, -inf }
 0x87b   : > { %1381 = vmax.xlane.f32.xlu0 %v1380_v31  ;;  %1378 = vmax.xlane.f32.xlu1 %v1377_v32 }
 0x900   : > { %v1376_v33 = vpop.xlane.xlu0 %1375 }
 0x901   : > { %v1383_v34 = vsub.f32 %v1371_v23, %v1376_v33 }
 0x903   : > { %v1386_v35 = vmul.f32 1.442695, %v1383_v34 }
 0x904   : > { %v1382_v8 = vpop.xlane.xlu0 %1381  ;;  %v1379_v36 = vpop.xlane.xlu1 %1378 }
 0x905   : > { %4086 = vpow2.f32 %v1386_v35  ;;  %v1385_v37 = vsub.f32 %v1373_v29, %v1382_v8  ;;  %v1384_v38 = vsub.f32 %v1372_v30, %v1379_v36 }
 0x907   : > { %v1390_v39 = vmul.f32 1.442695, %v1385_v37  ;;  %v1388_v40 = vmul.f32 1.442695, %v1384_v38 }
 0x909   : > { %4088 = vpow2.f32 %v1390_v39 }
 0x90a   : > { %4090 = vpow2.f32 %v1388_v40 }
 0x912   : > { %v4087_v41 = vpop.eup %4086 }
 0x913   : > { %v1392_v42 = vsel %vm1030_vm6, %v4087_v41, 0.0 }
 0x914   : > { %1393 = vadd.xlane.f32.xlu0 %v1392_v42 }
 0x916   : > { %v4089_v43 = vpop.eup %4088 }
 0x917   : > { %v4091_v44 = vpop.eup %4090  ;;  %v1398_v45 = vsel %vm1030_vm6, %v4089_v43, 0.0 }
 0x918   : > { %1399 = vadd.xlane.f32.xlu1 %v1398_v45  ;;  %v1395_v46 = vsel %vm1030_vm6, %v4091_v44, 0.0 }
 0x919   : > { %1396 = vadd.xlane.f32.xlu0 %v1395_v46 }
 0x929   : > { %1409 = vrot.lane.b32.xlu1 %v4516_v16, %s5128_s4 }
 0x92d   : > { %1477 = vrot.lane.b32.xlu1 %v4512_v10, %s5126_s3 }
 0x92f   : > { %1411 = vrot.lane.b32.xlu0 %v4512_v10, %s5128_s4  ;;  %s5130_s4 = smov 16  }
 0x931   : > { %1475 = vrot.lane.b32.xlu1 %v4516_v16, %s5126_s3  ;;  %s5132_s3 = smov 8  }
 0x933   : > { %1471 = vrot.lane.b32.xlu0 %v4516_v16, %s5124_s29 }
 0x935   : > { %1473 = vrot.lane.b32.xlu1 %v4512_v10, %s5124_s29  ;;  %s5134_s29 = smov 40  }
 0x99d   : > { %v1394_v47 = vpop.xlane.xlu0 %1393 }
 0x99e   : > { %4092 = vrcp.f32 %v1394_v47 }
 0x9a1   : > { %v1400_v48 = vpop.xlane.xlu1 %1399 }
 0x9a2   : > { %v1397_v49 = vpop.xlane.xlu0 %1396  ;;  %4094 = vrcp.f32 %v1400_v48 }
 0x9a3   : > { %4096 = vrcp.f32 %v1397_v49 }
 0x9a5   : > { %v1410_v51 = vpop.permute.xlu1 %1409 }
 0x9a6   : > { %v1412_v50 = vpop.permute.xlu0 %1411 }
 0x9a7   : > { %v1421_v52 = vsel %vm1077_vm7, %v1412_v50, 0  ;;  %3926 = vmatprep.subr.msk.bf16.mxu0 %vm1077_vm7, %v1412_v50 }
 0x9a8   : > { %3751 = vmatpush3.bf16.msra.mxu0 %v1421_v52 }
 0x9a9   : > { %3752 = vmatprep.subr.bf16.mxu0 %v1410_v51  ;;  %v1478_v53 = vpop.permute.xlu1 %1477 }
 0x9aa   : > { %v1472_v62 = vpop.permute.xlu0 %1471  ;;  %v1489_v63 = vsel %vm963_vm4, %v1478_v53, 0 }
 0x9ab   : > { %v4093_v54 = vpop.eup %4092 }
 0x9ac   : > { %3753 = vmatpush3.bf16.msra.mxu0 %v1410_v51  ;;  %v1404_v58 = vmul.f32 %v4093_v54, %v4087_v41 }
 0x9ad   : > { %3927 = vmatprep.subr.msk.bf16.mxu0 %vm963_vm4, %v1478_v53  ;;  %v1476_v0 = vpop.permute.xlu1 %1475 }
 0x9ae   : > { %v1486_v2 = vsel %vm963_vm4, %v1476_v0, 0 }
 0x9af   : > { %v4095_v55 = vpop.eup %4094 }
 0x9b0   : > { %v4097_v56 = vpop.eup %4096  ;;  %v1406_v57 = vmul.f32 %v4095_v55, %v4089_v43 }
 0x9b1   : > { %v1405_v59 = vmul.f32 %v4097_v56, %v4091_v44  ;;  %v1474_v3 = vpop.permute.xlu1 %1473 }
 0x9b2   : > { %v1408_v60 = vpack.c.bf16 %v1406_v57, %v1406_v57 }
 0x9b3   : > { %v1407_v61 = vpack.c.bf16 %v1405_v59, %v1404_v58  ;;  %v4034_v58 = vld [vmem:[%s5175_s9 + $0x8] sm:$0xff]   ;;  %v4035_v59 = vld [vmem:[%s5175_s9] sm:$0xff]  }
 0x9b5   : > { %3754 = vmatprep.mubr.msk.bf16.mxu0 %vm1030_vm6, %v1407_v61 }
 0x9b6   : > { %3755 = vmatmul.mubr.msk.bf16.vlgmr.msra.gmra.mxu0 %vm1030_vm6, %v1408_v60 }
 0x9b7   : > { %3759 = vmatpush3.bf16.xpose.msra.mxu0 %v1489_v63  ;;  %3762 = vmatprep.mubr.msk.bf16.mxu0 %vm963_vm4, %v1472_v62 }
 0x9b8   : > { %3928 = vmatprep.subr.msk.bf16.mxu0 %vm963_vm4, %v1476_v0 }
 0x9bf   : > { %3761 = vmatpush3.bf16.xpose.msra.mxu0 %v1486_v2 }
 0x9c6   : > { %3763 = vmatmul.mubr.msk.bf16.vlgmr.msra.gmra.mxu0 %vm963_vm4, %v1474_v3 }
 0xa76   : > { %v3756_v4 = vpop.f32.mrf.mxu0 }
 0xa78   : > { %v1457_v7 = vpop.f32.mrf.mxu0 }
 0xa7a   : > { %v3757_v15 = vpop.f32.mrf.mxu0 }
 0xa7c   : > { %v1460_v19 = vpop.f32.mrf.mxu0 }
 0xa7d   : > { %v4003_v20 = vpack.i.bf16 %v1460_v19, %v1457_v7 }
 0xa86   : > { %v3764_v21 = vpop.f32.mrf.mxu0 }
 0xa87   : > { %v1541_v23 = vmul.f32 0.35355338, %v3764_v21 }
 0xa88   : > { %v1525_v22 = vpop.f32.mrf.mxu0 }
 0xa89   : > { %v1539_v25 = vmul.f32 0.35355338, %v1525_v22  ;;  %v1544_v32 = vadd.f32 %v1541_v23, %v4529_v28 }
 0xa8a   : > { %v3765_v26 = vpop.f32.mrf.mxu0 }
 0xa8b   : > { %v1542_v27 = vadd.f32 %v1539_v25, %v4529_v28  ;;  %v1551_v34 = vsel %vm1030_vm6, %v1544_v32, -inf }
 0xa8c   : > { %v1528_v29 = vpop.f32.mrf.mxu0 }
 0xa8d   : > { %v1540_v30 = vmul.f32 0.35355338, %v1528_v29  ;;  %v1545_v31 = vsel %vm1030_vm6, %v1542_v27, -inf }
 0xa8e   : > { %1546 = vmax.xlane.f32.xlu0 %v1545_v31 }
 0xa8f   : > { %v1543_v33 = vadd.f32 %v1540_v30, %v4529_v28 }
 0xa91   : > { %v1548_v35 = vsel %vm1030_vm6, %v1543_v33, -inf }
 0xa92   : > { %1552 = vmax.xlane.f32.xlu0 %v1551_v34  ;;  %1549 = vmax.xlane.f32.xlu1 %v1548_v35 }
 0xb17   : > { %v1547_v8 = vpop.xlane.xlu0 %1546 }
 0xb18   : > { %v1554_v36 = vsub.f32 %v1542_v27, %v1547_v8 }
 0xb1a   : > { %v1557_v37 = vmul.f32 1.442695, %v1554_v36  ;;  %v3480_v36 = vld [vmem:[%s5092_s10] ss:$0 sm:$0xff] }
 0xb1b   : > { %v1553_v38 = vpop.xlane.xlu0 %1552  ;;  %v1550_v39 = vpop.xlane.xlu1 %1549 }
 0xb1c   : > { %4098 = vpow2.f32 %v1557_v37  ;;  %v1556_v40 = vsub.f32 %v1544_v32, %v1553_v38  ;;  %v1555_v41 = vsub.f32 %v1543_v33, %v1550_v39 }
 0xb1e   : > { %v1561_v42 = vmul.f32 1.442695, %v1556_v40  ;;  %v1559_v43 = vmul.f32 1.442695, %v1555_v41 }
 0xb20   : > { %4100 = vpow2.f32 %v1561_v42 }
 0xb21   : > { %4102 = vpow2.f32 %v1559_v43 }
 0xb29   : > { %v4099_v44 = vpop.eup %4098 }
 0xb2a   : > { %v1563_v45 = vsel %vm1030_vm6, %v4099_v44, 0.0 }
 0xb2b   : > { %1564 = vadd.xlane.f32.xlu0 %v1563_v45 }
 0xb2d   : > { %v4101_v46 = vpop.eup %4100 }
 0xb2e   : > { %v4103_v47 = vpop.eup %4102  ;;  %v1569_v48 = vsel %vm1030_vm6, %v4101_v46, 0.0 }
 0xb2f   : > { %1570 = vadd.xlane.f32.xlu1 %v1569_v48  ;;  %v1566_v49 = vsel %vm1030_vm6, %v4103_v47, 0.0 }
 0xb30   : > { %1567 = vadd.xlane.f32.xlu0 %v1566_v49 }
 0xb40   : > { %1580 = vrot.lane.b32.xlu1 %v4516_v16, %s5134_s29 }
 0xb44   : > { %3999 = vrot.lane.b32.xlu1 %v3998_v12, %s5132_s3 }
 0xb46   : > { %1582 = vrot.lane.b32.xlu0 %v4512_v10, %s5134_s29  ;;  %s5178_s29 = smov 120  }
 0xb48   : > { %1649 = vrot.lane.b32.xlu1 %v4599_v5, %s5132_s3  ;;  %s5179_s3 = smov 88  }
 0xb4a   : > { %4004 = vrot.lane.b32.xlu0 %v4003_v20, %s5130_s4 }
 0xb4c   : > { %1661 = vrot.lane.b32.xlu1 %v3756_v4, %s5130_s4  ;;  %s5177_s4 = smov 64  }
 0xbb4   : > { %v1565_v50 = vpop.xlane.xlu0 %1564 }
 0xbb5   : > { %4104 = vrcp.f32 %v1565_v50 }
 0xbb8   : > { %v1571_v16 = vpop.xlane.xlu1 %1570 }
 0xbb9   : > { %v1568_v51 = vpop.xlane.xlu0 %1567  ;;  %4106 = vrcp.f32 %v1571_v16 }
 0xbba   : > { %4108 = vrcp.f32 %v1568_v51 }
 0xbbc   : > { %v1581_v10 = vpop.permute.xlu1 %1580 }
 0xbbd   : > { %v1583_v52 = vpop.permute.xlu0 %1582 }
 0xbbe   : > { %v1592_v6 = vsel %vm1077_vm7, %v1583_v52, 0  ;;  %3929 = vmatprep.subr.msk.bf16.mxu1 %vm1077_vm7, %v1583_v52 }
 0xbbf   : > { %3767 = vmatpush3.bf16.msra.mxu1 %v1592_v6 }
 0xbc0   : > { %3768 = vmatprep.subr.bf16.mxu1 %v1581_v10  ;;  %v4000_v2 = vpop.permute.xlu1 %3999 }
 0xbc1   : > { %v4005_v4 = vpop.permute.xlu0 %4004  ;;  %v4002_v7 = vunpack.i.h.bf16 %v4000_v2  ;;  %v4001_v15 = vunpack.i.l.bf16 %v4000_v2 }
 0xbc2   : > { %v4105_v5 = vpop.eup %4104  ;;  %v4007_v20 = vunpack.i.h.bf16 %v4005_v4  ;;  %v4006_v21 = vunpack.i.l.bf16 %v4005_v4 }
 0xbc3   : > { %3769 = vmatpush3.bf16.msra.mxu1 %v1581_v10  ;;  %v1575_v54 = vmul.f32 %v4105_v5, %v4099_v44  ;;  %v1679_v22 = vsel %vm963_vm4, %v4566_v17, %v4002_v7  ;;  %v1678_v23 = vsel %vm963_vm4, %v4564_v14, %v4001_v15  ;;  %v3485_v7 = vld [vmem:[%s5093_s11] ss:$0 sm:$0xff] }
 0xbc4   : > { %3774 = vmatprep.subr.bf16.mxu1 %v4034_v58  ;;  %v1650_v3 = vpop.permute.xlu1 %1649  ;;  %v1682_v33 = vsel %vm1681_vm8, %v1678_v23, %v4006_v21  ;;  %v1683_v34 = vsel %vm1681_vm8, %v1679_v22, %v4007_v20  ;;  %v3486_v23 = vld [vmem:[%s5094_s12] ss:$0 sm:$0xff] }
 0xbc5   : > { %v1680_v26 = vsel %vm963_vm4, %v4562_v13, %v1650_v3 }
 0xbc6   : > { %v4107_v9 = vpop.eup %4106 }
 0xbc7   : > { %v4109_v12 = vpop.eup %4108  ;;  %v1577_v53 = vmul.f32 %v4107_v9, %v4101_v46 }
 0xbc8   : > { %v1576_v55 = vmul.f32 %v4109_v12, %v4103_v47  ;;  %v1662_v19 = vpop.permute.xlu1 %1661 }
 0xbc9   : > { %v1579_v56 = vpack.c.bf16 %v1577_v53, %v1577_v53  ;;  %v1684_v29 = vsel %vm1681_vm8, %v1680_v26, %v1662_v19 }
 0xbca   : > { %v1578_v57 = vpack.c.bf16 %v1576_v55, %v1575_v54  ;;  %v4036_v55 = vld [vmem:[%s5095_s13 + $0x8] sm:$0xff]  }
 0xbcb   : > { %3782 = vmatprep.subr.bf16.mxu0 %v4036_v55 }
 0xbcc   : > { %3770 = vmatprep.mubr.msk.bf16.mxu1 %vm1030_vm6, %v1578_v57  ;;  %3783 = vmatpush3.bf16.msra.mxu0 %v4036_v55 }
 0xbcd   : > { %3771 = vmatmul.mubr.msk.bf16.vlgmr.msra.gmra.mxu1 %vm1030_vm6, %v1579_v56  ;;  %v4037_v56 = vld [vmem:[%s5095_s13] sm:$0xff]  }
 0xbce   : > { %3775 = vmatpush3.bf16.msra.mxu1 %v4034_v58  ;;  %3784 = vmatprep.subr.bf16.mxu0 %v4037_v56 }
 0xbcf   : > { %3776 = vmatprep.subr.bf16.mxu1 %v4035_v59 }
 0xbd0   : > { %3785 = vmatpush3.bf16.msra.mxu0 %v4037_v56  ;;  %v3498_v56 = vld [vmem:[%s5098_s16] ss:$0 sm:$0xff] }
 0xbd2   : > { %3777 = vmatpush3.bf16.msra.mxu1 %v4035_v59 }
 0xc8d   : > { %v3772_v60 = vpop.f32.mrf.mxu1 }
 0xc8e   : > { %1673 = vrot.lane.b32.xlu1 %v3772_v60, %s5140_s24 }
 0xc8f   : > { %v1628_v61 = vpop.f32.mrf.mxu1 }
 0xc91   : > { %v3773_v62 = vpop.f32.mrf.mxu1 }
 0xc93   : > { %v1631_v63 = vpop.f32.mrf.mxu1 }
 0xc94   : > { %v4008_v0 = vpack.i.bf16 %v1631_v63, %v1628_v61 }
 0xc96   : > { %4009 = vrot.lane.b32.xlu0 %v4008_v0, %s5140_s24  ;;  %s5183_s24 = smov 48  }
 0xd00   : > { %v1674_v25 = vpop.permute.xlu1 %1673 }
 0xd01   : > { %v1687_v32 = vsel %vm1030_vm6, %v1684_v29, %v1674_v25 }
 0xd02   : > { %v1693_v8 = vpack.c.bf16 %v1687_v32, %v1687_v32 }
 0xd08   : > { %v4010_v27 = vpop.permute.xlu0 %4009 }
 0xd09   : > { %v4012_v30 = vunpack.i.h.bf16 %v4010_v27  ;;  %v4011_v31 = vunpack.i.l.bf16 %v4010_v27 }
 0xd0b   : > { %v1685_v17 = vsel %vm1030_vm6, %v1682_v33, %v4011_v31  ;;  %v1686_v14 = vsel %vm1030_vm6, %v1683_v34, %v4012_v30  ;;  %v4038_v33 = vld [vmem:[%s5097_s15 + $0x18] sm:$0xff]   ;;  %v4039_v34 = vld [vmem:[%s5097_s15 + $0x10] sm:$0xff]  }
 0xd0c   : > { %v1692_v35 = vpack.c.bf16 %v1686_v14, %v1685_v17  ;;  %3790 = vmatprep.subr.bf16.mxu1 %v4038_v33  ;;  %v4040_v17 = vld [vmem:[%s5097_s15 + $0x8] sm:$0xff]   ;;  %v4041_v14 = vld [vmem:[%s5097_s15] sm:$0xff]  }
 0xd0e   : > { %3778 = vmatprep.mubr.msk.bf16.mxu1 %vm817_vm3, %v1692_v35  ;;  %v3487_v35 = vld [vmem:[%s5096_s14] ss:$0 sm:$0xff] }
 0xd0f   : > { %3779 = vmatmul.mubr.msk.bf16.vlgmr.msra.gmra.mxu1 %vm817_vm3, %v1693_v8 }
 0xd10   : > { %3791 = vmatpush3.bf16.msra.mxu1 %v4038_v33 }
 0xd11   : > { %3792 = vmatprep.subr.bf16.mxu1 %v4039_v34 }
 0xd14   : > { %3793 = vmatpush3.bf16.msra.mxu1 %v4039_v34 }
 0xd15   : > { %3794 = vmatprep.subr.bf16.mxu1 %v4040_v17 }
 0xd18   : > { %3795 = vmatpush3.bf16.msra.mxu1 %v4040_v17 }
 0xd19   : > { %3796 = vmatprep.subr.bf16.mxu1 %v4041_v14 }
 0xd1c   : > { %3797 = vmatpush3.bf16.msra.mxu1 %v4041_v14 }
 0xdcf   : > { %v3780_v13 = vpop.f32.mrf.mxu1 }
 0xdd0   : > { %v1762_v38 = vadd.f32 %v3780_v13, %v3480_v36 }
 0xdd1   : > { %v1753_v37 = vpop.f32.mrf.mxu1 }
 0xdd2   : > { %v1754_v39 = vadd.f32 %v3480_v36, %v1753_v37  ;;  %v4692_v43 = vadd.f32 %v1762_v38, %v4468_v11 }
 0xdd3   : > { %v3781_v40 = vpop.f32.mrf.mxu1 }
 0xdd4   : > { %v4689_v41 = vadd.f32 %v1754_v39, %v4478_v18  ;;  %v1778_v48 = vsel %vm817_vm3, %v4692_v43, 0.0 }
 0xdd5   : > { %v1756_v42 = vpop.f32.mrf.mxu1 }
 0xdd6   : > { %v1757_v44 = vadd.f32 %v3480_v36, %v1756_v42  ;;  %v1772_v45 = vsel %vm817_vm3, %v4689_v41, 0.0 }
 0xdd7   : > { %1773 = vadd.xlane.f32.xlu0 %v1772_v45 }
 0xdd8   : > { %v4697_v46 = vadd.f32 %v1757_v44, %v4485_v24 }
 0xdda   : > { %v1775_v47 = vsel %vm817_vm3, %v4697_v46, 0.0 }
 0xddb   : > { %1776 = vadd.xlane.f32.xlu1 %v1775_v47  ;;  %1779 = vadd.xlane.f32.xlu0 %v1778_v48 }
 0xe60   : > { %v1774_v18 = vpop.xlane.xlu0 %1773 }
 0xe61   : > { %v1781_v49 = vmul.f32 0.03125, %v1774_v18 }
 0xe63   : > { %v1784_v11 = vsub.f32 %v4689_v41, %v1781_v49 }
 0xe64   : > { %v1777_v50 = vpop.xlane.xlu1 %1776  ;;  %v1780_v16 = vpop.xlane.xlu0 %1779 }
 0xe65   : > { %v1782_v51 = vmul.f32 0.03125, %v1777_v50  ;;  %v1783_v52 = vmul.f32 0.03125, %v1780_v16  ;;  %v1787_v6 = vmul.f32 %v1784_v11, %v1784_v11 }
 0xe67   : > { %v1785_v24 = vsub.f32 %v4697_v46, %v1782_v51  ;;  %v1786_v10 = vsub.f32 %v4692_v43, %v1783_v52  ;;  %v1790_v5 = vsel %vm817_vm3, %v1787_v6, 0.0 }
 0xe68   : > { %1791 = vadd.xlane.f32.xlu0 %v1790_v5 }
 0xe69   : > { %v1788_v9 = vmul.f32 %v1785_v24, %v1785_v24  ;;  %v1789_v12 = vmul.f32 %v1786_v10, %v1786_v10 }
 0xe6b   : > { %v1793_v53 = vsel %vm817_vm3, %v1788_v9, 0.0  ;;  %v1796_v54 = vsel %vm817_vm3, %v1789_v12, 0.0 }
 0xe6c   : > { %1794 = vadd.xlane.f32.xlu0 %v1793_v53  ;;  %1797 = vadd.xlane.f32.xlu1 %v1796_v54 }
 0xef1   : > { %v1792_v57 = vpop.xlane.xlu0 %1791 }
 0xef2   : > { %v1799_v58 = vmul.f32 0.03125, %v1792_v57 }
 0xef4   : > { %v1802_v59 = vadd.f32 1e-05, %v1799_v58 }
 0xef5   : > { %v1798_v60 = vpop.xlane.xlu1 %1797  ;;  %v1795_v61 = vpop.xlane.xlu0 %1794 }
 0xef6   : > { %4110 = vrsqrt.f32 %v1802_v59  ;;  %v1801_v62 = vmul.f32 0.03125, %v1798_v60  ;;  %v1800_v63 = vmul.f32 0.03125, %v1795_v61 }
 0xef8   : > { %v1804_v0 = vadd.f32 1e-05, %v1801_v62  ;;  %v1803_v2 = vadd.f32 1e-05, %v1800_v63 }
 0xefa   : > { %4112 = vrsqrt.f32 %v1804_v0 }
 0xefb   : > { %4114 = vrsqrt.f32 %v1803_v2 }
 0xf03   : > { %v4111_v3 = vpop.eup %4110 }
 0xf04   : > { %v1808_v4 = vmul.f32 %v4111_v3, %v1784_v11 }
 0xf06   : > { %v1817_v22 = vmul.f32 %v3485_v7, %v1808_v4 }
 0xf07   : > { %v4113_v15 = vpop.eup %4112 }
 0xf08   : > { %v4115_v19 = vpop.eup %4114  ;;  %v1810_v20 = vmul.f32 %v4113_v15, %v1786_v10  ;;  %v1826_v29 = vadd.f32 %v3486_v23, %v1817_v22 }
 0xf09   : > { %v1809_v21 = vmul.f32 %v4115_v19, %v1785_v24 }
 0xf0a   : > { %v1819_v25 = vmul.f32 %v3485_v7, %v1810_v20 }
 0xf0b   : > { %v1818_v26 = vmul.f32 %v3485_v7, %v1809_v21 }
 0xf0c   : > { %v1828_v27 = vadd.f32 %v3486_v23, %v1819_v25 }
 0xf0d   : > { %v1827_v30 = vadd.f32 %v3486_v23, %v1818_v26 }
 0xf0e   : > { %v1834_v31 = vpack.c.bf16 %v1828_v27, %v1828_v27 }
 0xf0f   : > { %v1833_v32 = vpack.c.bf16 %v1827_v30, %v1826_v29  ;;  %v4042_v29 = vld [vmem:[%s5170_s28 + $0x18] sm:$0xff]   ;;  %v4043_v30 = vld [vmem:[%s5170_s28 + $0x10] sm:$0xff]  }
 0xf10   : > { %3802 = vmatprep.subr.bf16.mxu0 %v4042_v29 }
 0xf11   : > { %3786 = vmatprep.mubr.msk.bf16.mxu0 %vm817_vm3, %v1833_v32 }
 0xf12   : > { %3787 = vmatmul.mubr.msk.bf16.vlgmr.msra.gmra.mxu0 %vm817_vm3, %v1834_v31 }
 0xf13   : > { %3803 = vmatpush3.bf16.msra.mxu0 %v4042_v29 }
 0xf14   : > { %3804 = vmatprep.subr.bf16.mxu0 %v4043_v30 }
 0xf17   : > { %3805 = vmatpush3.bf16.msra.mxu0 %v4043_v30 }
 0xfd2   : > { %v3788_v8 = vpop.f32.mrf.mxu0 }
 0xfd3   : > { %v1903_v13 = vadd.f32 %v3788_v8, %v3487_v35 }
 0xfd4   : > { %v1894_v36 = vpop.f32.mrf.mxu0 }
 0xfd5   : > { %v1913_v37 = vmul.f32 0.70710677, %v1903_v13  ;;  %v1895_v38 = vadd.f32 %v3487_v35, %v1894_v36  ;;  %v1910_v50 = vmul.f32 0.5, %v1903_v13 }
 0xfd6   : > { %v3789_v39 = vpop.f32.mrf.mxu0 }
 0xfd7   : > { %v1911_v40 = vmul.f32 0.70710677, %v1895_v38  ;;  %4116 = verf.f32 %v1913_v37  ;;  %v1908_v16 = vmul.f32 0.5, %v1895_v38  ;;  %v3501_v38 = vld [vmem:[%s5172_s26 + $0x1] ss:$0 sm:$0xff] }
 0xfd8   : > { %v1897_v42 = vpop.f32.mrf.mxu0 }
 0xfd9   : > { %4118 = verf.f32 %v1911_v40  ;;  %v1898_v44 = vadd.f32 %v3487_v35, %v1897_v42 }
 0xfdb   : > { %v1912_v45 = vmul.f32 0.70710677, %v1898_v44  ;;  %v1909_v51 = vmul.f32 0.5, %v1898_v44 }
 0xfdd   : > { %4120 = verf.f32 %v1912_v45 }
 0xfe4   : > { %v4117_v47 = vpop.eup %4116 }
 0xfe5   : > { %v1919_v18 = vadd.f32 1.0, %v4117_v47  ;;  %v3502_v47 = vld [vmem:[%s5173_s6 + $0x1] ss:$0 sm:$0xff] }
 0xfe6   : > { %v4119_v48 = vpop.eup %4118 }
 0xfe7   : > { %v1917_v49 = vadd.f32 1.0, %v4119_v48  ;;  %v1922_v6 = vmul.f32 %v1919_v18, %v1910_v50 }
 0xfe9   : > { %v1920_v24 = vmul.f32 %v1917_v49, %v1908_v16  ;;  %v1932_v9 = vpack.c.bf16 %v1922_v6, %v1922_v6 }
 0xfea   : > { %v4121_v11 = vpop.eup %4120 }
 0xfeb   : > { %v1918_v52 = vadd.f32 1.0, %v4121_v11 }
 0xfed   : > { %v1921_v10 = vmul.f32 %v1918_v52, %v1909_v51  ;;  %v3508_v52 = vld [vmem:[%s5174_s8 + $0x1] ss:$0 sm:$0xff] }
 0xfef   : > { %v1931_v5 = vpack.c.bf16 %v1921_v10, %v1920_v24 }
 0xff1   : > { %3798 = vmatprep.mubr.msk.bf16.mxu1 %vm751_vm1, %v1931_v5 }
 0xff2   : > { %3799 = vmatmul.mubr.msk.bf16.vlgmr.msra.gmra.mxu1 %vm751_vm1, %v1932_v9 }
0x10b2   : > { %v3800_v12 = vpop.f32.mrf.mxu1 }
0x10b3   : > { %v2013_v54 = vadd.f32 %v3800_v12, %v4692_v43 }
0x10b4   : > { %v1997_v53 = vpop.f32.mrf.mxu1 }
0x10b5   : > { %v2011_v55 = vadd.f32 %v1997_v53, %v4689_v41  ;;  %v4747_v60 = vadd.f32 %v3498_v56, %v2013_v54 }
0x10b6   : > { %v3801_v57 = vpop.f32.mrf.mxu1 }
0x10b7   : > { %v4745_v58 = vadd.f32 %v3498_v56, %v2011_v55  ;;  %v2034_v41 = vsel %vm817_vm3, %v4747_v60, 0.0 }
0x10b8   : > { %v2000_v59 = vpop.f32.mrf.mxu1 }
0x10b9   : > { %v2012_v61 = vadd.f32 %v2000_v59, %v4697_v46  ;;  %v2028_v62 = vsel %vm817_vm3, %v4745_v58, 0.0 }
0x10ba   : > { %2029 = vadd.xlane.f32.xlu0 %v2028_v62 }
0x10bb   : > { %v4752_v63 = vadd.f32 %v3498_v56, %v2012_v61 }
0x10bd   : > { %v2031_v43 = vsel %vm817_vm3, %v4752_v63, 0.0 }
0x10be   : > { %2035 = vadd.xlane.f32.xlu0 %v2034_v41  ;;  %2032 = vadd.xlane.f32.xlu1 %v2031_v43 }
0x1143   : > { %v2030_v0 = vpop.xlane.xlu0 %2029 }
0x1144   : > { %v2037_v2 = vmul.f32 0.03125, %v2030_v0 }
0x1146   : > { %v2040_v3 = vsub.f32 %v4745_v58, %v2037_v2 }
0x1147   : > { %v2036_v4 = vpop.xlane.xlu0 %2035  ;;  %v2033_v46 = vpop.xlane.xlu1 %2032 }
0x1148   : > { %v2039_v7 = vmul.f32 0.03125, %v2036_v4  ;;  %v2038_v15 = vmul.f32 0.03125, %v2033_v46  ;;  %v2043_v19 = vmul.f32 %v2040_v3, %v2040_v3 }
0x114a   : > { %v2042_v20 = vsub.f32 %v4747_v60, %v2039_v7  ;;  %v2041_v21 = vsub.f32 %v4752_v63, %v2038_v15  ;;  %v2046_v22 = vsel %vm817_vm3, %v2043_v19, 0.0 }
0x114b   : > { %2047 = vadd.xlane.f32.xlu1 %v2046_v22 }
0x114c   : > { %v2045_v23 = vmul.f32 %v2042_v20, %v2042_v20  ;;  %v2044_v25 = vmul.f32 %v2041_v21, %v2041_v21 }
0x114e   : > { %v2052_v26 = vsel %vm817_vm3, %v2045_v23, 0.0  ;;  %v2049_v27 = vsel %vm817_vm3, %v2044_v25, 0.0 }
0x114f   : > { %2053 = vadd.xlane.f32.xlu1 %v2052_v26  ;;  %2050 = vadd.xlane.f32.xlu0 %v2049_v27 }
0x11d4   : > { %v2048_v31 = vpop.xlane.xlu1 %2047 }
0x11d5   : > { %v2055_v32 = vmul.f32 0.03125, %v2048_v31 }
0x11d7   : > { %v2058_v33 = vadd.f32 1e-05, %v2055_v32 }
0x11d8   : > { %v2051_v34 = vpop.xlane.xlu0 %2050  ;;  %v2054_v17 = vpop.xlane.xlu1 %2053 }
0x11d9   : > { %4122 = vrsqrt.f32 %v2058_v33  ;;  %v2056_v14 = vmul.f32 0.03125, %v2051_v34  ;;  %v2057_v35 = vmul.f32 0.03125, %v2054_v17 }
0x11db   : > { %v2059_v8 = vadd.f32 1e-05, %v2056_v14  ;;  %v2060_v13 = vadd.f32 1e-05, %v2057_v35 }
0x11dd   : > { %4124 = vrsqrt.f32 %v2059_v8 }
0x11de   : > { %4126 = vrsqrt.f32 %v2060_v13 }
0x11e6   : > { %v4123_v36 = vpop.eup %4122 }
0x11e7   : > { %v2064_v37 = vmul.f32 %v4123_v36, %v2040_v3 }
0x11e9   : > { %v2073_v44 = vmul.f32 %v3501_v38, %v2064_v37 }
0x11ea   : > { %v4125_v39 = vpop.eup %4124 }
0x11eb   : > { %v4127_v40 = vpop.eup %4126  ;;  %v2065_v42 = vmul.f32 %v4125_v39, %v2041_v21  ;;  %v2082_v49 = vadd.f32 %v3502_v47, %v2073_v44 }
0x11ec   : > { %v2066_v45 = vmul.f32 %v4127_v40, %v2042_v20 }
0x11ed   : > { %v2074_v48 = vmul.f32 %v3501_v38, %v2065_v42 }
0x11ee   : > { %v2075_v18 = vmul.f32 %v3501_v38, %v2066_v45 }
0x11ef   : > { %v2083_v11 = vadd.f32 %v3502_v47, %v2074_v48 }
0x11f0   : > { %v2084_v50 = vadd.f32 %v3502_v47, %v2075_v18 }
0x11f1   : > { %v2090_v16 = vpack.c.bf16 %v2083_v11, %v2082_v49 }
0x11f2   : > { %v2091_v51 = vpack.c.bf16 %v2084_v50, %v2084_v50 }
0x11f3   : > { %3806 = vmatprep.mubr.msk.bf16.mxu0 %vm817_vm3, %v2090_v16 }
0x11f4   : > { %3807 = vmatmul.mubr.msk.bf16.vlgmr.msra.gmra.mxu0 %vm817_vm3, %v2091_v51 }
0x12b4   : > { %v3808_v6 = vpop.f32.mrf.mxu0 }
0x12b5   : > { %v2161_v24 = vadd.f32 %v3808_v6, %v3508_v52 }
0x12b6   : > { %v2152_v10 = vpop.f32.mrf.mxu0 }
0x12b7   : > { %v4781_v5 = vpack.c.bf16 %v2161_v24, %v2161_v24  ;;  %v2153_v53 = vadd.f32 %v3508_v52, %v2152_v10 }
0x12b8   : > { %v3809_v9 = vpop.f32.mrf.mxu0 }
0x12b9   : > { %2172 = vrot.lane.b32.xlu0 %v4781_v5, %s5176_s27 }
0x12ba   : > { %v2155_v12 = vpop.f32.mrf.mxu0 }
0x12bb   : > { %v2156_v54 = vadd.f32 %v3508_v52, %v2155_v12 }
0x12bd   : > { %v4785_v55 = vpack.c.bf16 %v2156_v54, %v2153_v53 }
0x12bf   : > { %2170 = vrot.lane.b32.xlu1 %v4785_v55, %s5176_s27  ;;  %3814 = vmatprep.mubr.msk.bf16.mxu0 %vm963_vm4, %v4785_v55  ;;  %s5184_s27 = smov 72  }
0x132b   : > { %v2173_v56 = vpop.permute.xlu0 %2172 }
0x132c   : > { %v2184_v57 = vsel %vm963_vm4, %v2173_v56, 0  ;;  %3930 = vmatprep.subr.msk.bf16.mxu0 %vm963_vm4, %v2173_v56 }
0x132d   : > { %3811 = vmatpush3.bf16.xpose.msra.mxu0 %v2184_v57 }
0x1331   : > { %v2171_v59 = vpop.permute.xlu1 %2170 }
0x1332   : > { %3931 = vmatprep.subr.msk.bf16.mxu0 %vm963_vm4, %v2171_v59  ;;  %v2181_v61 = vsel %vm963_vm4, %v2171_v59, 0 }
0x1335   : > { %3813 = vmatpush3.bf16.xpose.msra.mxu0 %v2181_v61 }
0x133c   : > { %3815 = vmatmul.mubr.msk.bf16.vlgmr.msra.gmra.mxu0 %vm963_vm4, %v4781_v5 }
0x13fc   : > { %v3816_v62 = vpop.f32.mrf.mxu0 }
0x13fd   : > { %v2236_v4 = vmul.f32 0.35355338, %v3816_v62 }
0x13fe   : > { %v2220_v41 = vpop.f32.mrf.mxu0 }
0x13ff   : > { %v2234_v43 = vmul.f32 0.35355338, %v2220_v41  ;;  %v2239_v20 = vadd.f32 %v2236_v4, %v4529_v28 }
0x1400   : > { %v3817_v0 = vpop.f32.mrf.mxu0 }
0x1401   : > { %v2237_v2 = vadd.f32 %v2234_v43, %v4529_v28  ;;  %v2246_v21 = vsel %vm1030_vm6, %v2239_v20, -inf }
0x1402   : > { %v2223_v3 = vpop.f32.mrf.mxu0 }
0x1403   : > { %v2235_v46 = vmul.f32 0.35355338, %v2223_v3  ;;  %v2240_v7 = vsel %vm1030_vm6, %v2237_v2, -inf }
0x1404   : > { %2241 = vmax.xlane.f32.xlu1 %v2240_v7 }
0x1405   : > { %v2238_v15 = vadd.f32 %v2235_v46, %v4529_v28 }
0x1407   : > { %v2243_v19 = vsel %vm1030_vm6, %v2238_v15, -inf }
0x1408   : > { %2244 = vmax.xlane.f32.xlu0 %v2243_v19 }
0x140c   : > { %2247 = vmax.xlane.f32.xlu0 %v2246_v21 }
0x148d   : > { %v2242_v22 = vpop.xlane.xlu1 %2241 }
0x148e   : > { %v2249_v26 = vsub.f32 %v2237_v2, %v2242_v22 }
0x1490   : > { %v2252_v31 = vmul.f32 1.442695, %v2249_v26 }
0x1491   : > { %v2245_v23 = vpop.xlane.xlu0 %2244 }
0x1492   : > { %v2250_v25 = vsub.f32 %v2238_v15, %v2245_v23 }
0x1494   : > { %v2254_v27 = vmul.f32 1.442695, %v2250_v25 }
0x1495   : > { %v2248_v29 = vpop.xlane.xlu0 %2247 }
0x1496   : > { %4128 = vpow2.f32 %v2254_v27  ;;  %v2251_v30 = vsub.f32 %v2239_v20, %v2248_v29 }
0x1498   : > { %v2256_v32 = vmul.f32 1.442695, %v2251_v30 }
0x149a   : > { %4130 = vpow2.f32 %v2256_v32 }
0x149b   : > { %4132 = vpow2.f32 %v2252_v31 }
0x14a3   : > { %v4129_v33 = vpop.eup %4128 }
0x14a4   : > { %v2261_v34 = vsel %vm1030_vm6, %v4129_v33, 0.0 }
0x14a5   : > { %2262 = vadd.xlane.f32.xlu0 %v2261_v34 }
0x14a7   : > { %v4131_v17 = vpop.eup %4130 }
0x14a8   : > { %v2264_v14 = vsel %vm1030_vm6, %v4131_v17, 0.0  ;;  %v4133_v35 = vpop.eup %4132 }
0x14a9   : > { %2265 = vadd.xlane.f32.xlu1 %v2264_v14  ;;  %v2258_v8 = vsel %vm1030_vm6, %v4133_v35, 0.0 }
0x14ad   : > { %2259 = vadd.xlane.f32.xlu1 %v2258_v8 }
0x14bb   : > { %2277 = vrot.lane.b32.xlu0 %v4781_v5, %s5177_s4 }
0x14be   : > { %2275 = vrot.lane.b32.xlu1 %v4785_v55, %s5177_s4  ;;  %s5185_s4 = smov 104  }
0x14bf   : > { %2337 = vrot.lane.b32.xlu0 %v4785_v55, %s5178_s29 }
0x14c2   : > { %2343 = vrot.lane.b32.xlu1 %v4781_v5, %s5179_s3 }
0x14c6   : > { %2341 = vrot.lane.b32.xlu1 %v4785_v55, %s5179_s3  ;;  %s5187_s3 = smov 8  }
0x14ca   : > { %2339 = vrot.lane.b32.xlu1 %v4781_v5, %s5178_s29  ;;  %s5186_s29 = smov 40  }
0x152e   : > { %v2263_v13 = vpop.xlane.xlu0 %2262 }
0x1532   : > { %v2266_v36 = vpop.xlane.xlu1 %2265  ;;  %v2278_v37 = vpop.permute.xlu0 %2277 }
0x1533   : > { %v2287_v38 = vsel %vm1077_vm7, %v2278_v37, 0  ;;  %3932 = vmatprep.subr.msk.bf16.mxu1 %vm1077_vm7, %v2278_v37  ;;  %4134 = vrcp.f32 %v2266_v36 }
0x1534   : > { %3819 = vmatpush3.bf16.msra.mxu1 %v2287_v38  ;;  %4136 = vrcp.f32 %v2263_v13 }
0x1536   : > { %v2260_v39 = vpop.xlane.xlu1 %2259  ;;  %v2338_v16 = vpop.permute.xlu0 %2337 }
0x1537   : > { %4138 = vrcp.f32 %v2260_v39 }
0x153a   : > { %v2276_v40 = vpop.permute.xlu1 %2275 }
0x153b   : > { %3820 = vmatprep.subr.bf16.mxu1 %v2276_v40 }
0x153c   : > { %3821 = vmatpush3.bf16.msra.mxu1 %v2276_v40 }
0x153e   : > { %v2344_v42 = vpop.permute.xlu1 %2343 }
0x153f   : > { %3933 = vmatprep.subr.msk.bf16.mxu1 %vm963_vm4, %v2344_v42  ;;  %v2355_v51 = vsel %vm963_vm4, %v2344_v42, 0 }
0x1540   : > { %v4135_v44 = vpop.eup %4134 }
0x1541   : > { %v4137_v45 = vpop.eup %4136  ;;  %v2272_v48 = vmul.f32 %v4135_v44, %v4131_v17 }
0x1542   : > { %v2271_v49 = vmul.f32 %v4137_v45, %v4129_v33  ;;  %v2342_v52 = vpop.permute.xlu1 %2341 }
0x1543   : > { %v2274_v50 = vpack.c.bf16 %v2272_v48, %v2272_v48  ;;  %v2352_v6 = vsel %vm963_vm4, %v2342_v52, 0 }
0x1544   : > { %v4139_v47 = vpop.eup %4138 }
0x1545   : > { %v2270_v18 = vmul.f32 %v4139_v47, %v4133_v35 }
0x1546   : > { %v2340_v24 = vpop.permute.xlu1 %2339 }
0x1547   : > { %v2273_v11 = vpack.c.bf16 %v2271_v49, %v2270_v18 }
0x1549   : > { %3822 = vmatprep.mubr.msk.bf16.mxu1 %vm1030_vm6, %v2273_v11 }
0x154a   : > { %3823 = vmatmul.mubr.msk.bf16.vlgmr.msra.gmra.mxu1 %vm1030_vm6, %v2274_v50 }
0x154b   : > { %3827 = vmatpush3.bf16.xpose.msra.mxu1 %v2355_v51  ;;  %3830 = vmatprep.mubr.msk.bf16.mxu1 %vm963_vm4, %v2338_v16 }
0x154c   : > { %3934 = vmatprep.subr.msk.bf16.mxu1 %vm963_vm4, %v2342_v52 }
0x1553   : > { %3829 = vmatpush3.bf16.xpose.msra.mxu1 %v2352_v6 }
0x155a   : > { %3831 = vmatmul.mubr.msk.bf16.vlgmr.msra.gmra.mxu1 %vm963_vm4, %v2340_v24 }
0x160a   : > { %v4828_v10 = vpop.f32.mrf.mxu1 }
0x160c   : > { %v4830_v9 = vpop.f32.mrf.mxu1 }
0x160e   : > { %v3825_v12 = vpop.f32.mrf.mxu1 }
0x1610   : > { %v4832_v53 = vpop.f32.mrf.mxu1 }
0x161a   : > { %v3832_v54 = vpop.f32.mrf.mxu1 }
0x161b   : > { %v2407_v57 = vmul.f32 0.35355338, %v3832_v54 }
0x161c   : > { %v2391_v56 = vpop.f32.mrf.mxu1 }
0x161d   : > { %v2405_v59 = vmul.f32 0.35355338, %v2391_v56  ;;  %v2410_v2 = vadd.f32 %v2407_v57, %v4529_v28 }
0x161e   : > { %v3833_v61 = vpop.f32.mrf.mxu1 }
0x161f   : > { %v2408_v62 = vadd.f32 %v2405_v59, %v4529_v28  ;;  %v2417_v4 = vsel %vm1030_vm6, %v2410_v2, -inf }
0x1620   : > { %v2394_v41 = vpop.f32.mrf.mxu1 }
0x1621   : > { %v2406_v43 = vmul.f32 0.35355338, %v2394_v41  ;;  %v2411_v0 = vsel %vm1030_vm6, %v2408_v62, -inf }
0x1622   : > { %2412 = vmax.xlane.f32.xlu0 %v2411_v0 }
0x1623   : > { %v2409_v3 = vadd.f32 %v2406_v43, %v4529_v28 }
0x1625   : > { %v2414_v46 = vsel %vm1030_vm6, %v2409_v3, -inf }
0x1626   : > { %2418 = vmax.xlane.f32.xlu0 %v2417_v4  ;;  %2415 = vmax.xlane.f32.xlu1 %v2414_v46 }
0x16ab   : > { %v2413_v7 = vpop.xlane.xlu0 %2412 }
0x16ac   : > { %v2420_v15 = vsub.f32 %v2408_v62, %v2413_v7 }
0x16ae   : > { %v2423_v19 = vmul.f32 1.442695, %v2420_v15 }
0x16af   : > { %v2419_v20 = vpop.xlane.xlu0 %2418  ;;  %v2416_v21 = vpop.xlane.xlu1 %2415 }
0x16b0   : > { %4140 = vpow2.f32 %v2423_v19  ;;  %v2422_v22 = vsub.f32 %v2410_v2, %v2419_v20  ;;  %v2421_v23 = vsub.f32 %v2409_v3, %v2416_v21 }
0x16b2   : > { %v2427_v25 = vmul.f32 1.442695, %v2422_v22  ;;  %v2425_v26 = vmul.f32 1.442695, %v2421_v23 }
0x16b4   : > { %4142 = vpow2.f32 %v2427_v25 }
0x16b5   : > { %4144 = vpow2.f32 %v2425_v26 }
0x16bd   : > { %v4141_v27 = vpop.eup %4140 }
0x16be   : > { %v2429_v29 = vsel %vm1030_vm6, %v4141_v27, 0.0 }
0x16bf   : > { %2430 = vadd.xlane.f32.xlu0 %v2429_v29 }
0x16c1   : > { %v4143_v30 = vpop.eup %4142 }
0x16c2   : > { %v4145_v31 = vpop.eup %4144  ;;  %v2435_v32 = vsel %vm1030_vm6, %v4143_v30, 0.0 }
0x16c3   : > { %2436 = vadd.xlane.f32.xlu1 %v2435_v32  ;;  %v2432_v33 = vsel %vm1030_vm6, %v4145_v31, 0.0 }
0x16c4   : > { %2433 = vadd.xlane.f32.xlu0 %v2432_v33 }
0x16d4   : > { %2446 = vrot.lane.b32.xlu1 %v4785_v55, %s5180_s0 }
0x16d8   : > { %2514 = vrot.lane.b32.xlu1 %v4781_v5, %s5181_s1 }
0x16da   : > { %2448 = vrot.lane.b32.xlu0 %v4781_v5, %s5180_s0  ;;  %s5188_s0 = smov 16  }
0x16dc   : > { %2512 = vrot.lane.b32.xlu1 %v4785_v55, %s5181_s1 }
0x16de   : > { %2508 = vrot.lane.b32.xlu0 %v4785_v55, %s5182_s2 }
0x16e0   : > { %2510 = vrot.lane.b32.xlu1 %v4781_v5, %s5182_s2  ;;  %s701_s2 = sand.u32 1, %s4244_s30  }
0x1748   : > { %v2431_v34 = vpop.xlane.xlu0 %2430 }
0x1749   : > { %4146 = vrcp.f32 %v2431_v34 }
0x174c   : > { %v2437_v17 = vpop.xlane.xlu1 %2436 }
0x174d   : > { %v2434_v14 = vpop.xlane.xlu0 %2433  ;;  %4148 = vrcp.f32 %v2437_v17 }
0x174e   : > { %4150 = vrcp.f32 %v2434_v14 }
0x1750   : > { %v2447_v8 = vpop.permute.xlu1 %2446 }
0x1751   : > { %v2449_v35 = vpop.permute.xlu0 %2448 }
0x1752   : > { %v2458_v13 = vsel %vm1077_vm7, %v2449_v35, 0  ;;  %3935 = vmatprep.subr.msk.bf16.mxu0 %vm1077_vm7, %v2449_v35 }
0x1753   : > { %3835 = vmatpush3.bf16.msra.mxu0 %v2458_v13 }
0x1754   : > { %3836 = vmatprep.subr.bf16.mxu0 %v2447_v8  ;;  %v2515_v36 = vpop.permute.xlu1 %2514 }
0x1755   : > { %v2509_v48 = vpop.permute.xlu0 %2508  ;;  %v2526_v18 = vsel %vm963_vm4, %v2515_v36, 0 }
0x1756   : > { %v4147_v37 = vpop.eup %4146 }
0x1757   : > { %3837 = vmatpush3.bf16.msra.mxu0 %v2447_v8  ;;  %v2441_v42 = vmul.f32 %v4147_v37, %v4141_v27 }
0x1758   : > { %3936 = vmatprep.subr.msk.bf16.mxu0 %vm963_vm4, %v2515_v36  ;;  %v2513_v49 = vpop.permute.xlu1 %2512 }
0x1759   : > { %v2523_v11 = vsel %vm963_vm4, %v2513_v49, 0 }
0x175a   : > { %v4149_v38 = vpop.eup %4148 }
0x175b   : > { %v4151_v39 = vpop.eup %4150  ;;  %v2443_v40 = vmul.f32 %v4149_v38, %v4143_v30 }
0x175c   : > { %v2442_v44 = vmul.f32 %v4151_v39, %v4145_v31  ;;  %v2511_v50 = vpop.permute.xlu1 %2510 }
0x175d   : > { %v2445_v45 = vpack.c.bf16 %v2443_v40, %v2443_v40 }
0x175e   : > { %v2444_v47 = vpack.c.bf16 %v2442_v44, %v2441_v42 }
0x1760   : > { %3838 = vmatprep.mubr.msk.bf16.mxu0 %vm1030_vm6, %v2444_v47 }
0x1761   : > { %3839 = vmatmul.mubr.msk.bf16.vlgmr.msra.gmra.mxu0 %vm1030_vm6, %v2445_v45 }
0x1762   : > { %3843 = vmatpush3.bf16.xpose.msra.mxu0 %v2526_v18  ;;  %3846 = vmatprep.mubr.msk.bf16.mxu0 %vm963_vm4, %v2509_v48 }
0x1763   : > { %3937 = vmatprep.subr.msk.bf16.mxu0 %vm963_vm4, %v2513_v49 }
0x176a   : > { %3845 = vmatpush3.bf16.xpose.msra.mxu0 %v2523_v11 }
0x1771   : > { %3847 = vmatmul.mubr.msk.bf16.vlgmr.msra.gmra.mxu0 %vm963_vm4, %v2511_v50 }
0x1821   : > { %v4865_v16 = vpop.f32.mrf.mxu0 }
0x1823   : > { %v4867_v51 = vpop.f32.mrf.mxu0 }
0x1825   : > { %v3841_v52 = vpop.f32.mrf.mxu0 }
0x1827   : > { %v4869_v6 = vpop.f32.mrf.mxu0 }
0x1828   : > { %v4013_v24 = vpack.i.bf16 %v4869_v6, %v4867_v51 }
0x1831   : > { %v3848_v12 = vpop.f32.mrf.mxu0 }
0x1832   : > { %v2578_v56 = vmul.f32 0.35355338, %v3848_v12 }
0x1833   : > { %v2562_v54 = vpop.f32.mrf.mxu0 }
0x1834   : > { %v2576_v57 = vmul.f32 0.35355338, %v2562_v54  ;;  %v2581_v0 = vadd.f32 %v2578_v56, %v4529_v28 }
0x1835   : > { %v3849_v59 = vpop.f32.mrf.mxu0 }
0x1836   : > { %v2579_v61 = vadd.f32 %v2576_v57, %v4529_v28  ;;  %v2588_v3 = vsel %vm1030_vm6, %v2581_v0, -inf }
0x1837   : > { %v2565_v62 = vpop.f32.mrf.mxu0 }
0x1838   : > { %v2577_v41 = vmul.f32 0.35355338, %v2565_v62  ;;  %v2582_v43 = vsel %vm1030_vm6, %v2579_v61, -inf }
0x1839   : > { %2583 = vmax.xlane.f32.xlu0 %v2582_v43 }
0x183a   : > { %v2580_v2 = vadd.f32 %v2577_v41, %v4529_v28 }
0x183c   : > { %v2585_v4 = vsel %vm1030_vm6, %v2580_v2, -inf }
0x183d   : > { %2589 = vmax.xlane.f32.xlu0 %v2588_v3  ;;  %2586 = vmax.xlane.f32.xlu1 %v2585_v4 }
0x18c2   : > { %v2584_v46 = vpop.xlane.xlu0 %2583 }
0x18c3   : > { %v2591_v7 = vsub.f32 %v2579_v61, %v2584_v46 }
0x18c5   : > { %v2594_v15 = vmul.f32 1.442695, %v2591_v7 }
0x18c6   : > { %v2590_v19 = vpop.xlane.xlu0 %2589  ;;  %v2587_v20 = vpop.xlane.xlu1 %2586 }
0x18c7   : > { %4152 = vpow2.f32 %v2594_v15  ;;  %v2593_v21 = vsub.f32 %v2581_v0, %v2590_v19  ;;  %v2592_v22 = vsub.f32 %v2580_v2, %v2587_v20 }
0x18c9   : > { %v2598_v23 = vmul.f32 1.442695, %v2593_v21  ;;  %v2596_v25 = vmul.f32 1.442695, %v2592_v22 }
0x18cb   : > { %4154 = vpow2.f32 %v2598_v23 }
0x18cc   : > { %4156 = vpow2.f32 %v2596_v25 }
0x18d4   : > { %v4153_v26 = vpop.eup %4152 }
0x18d5   : > { %v2600_v27 = vsel %vm1030_vm6, %v4153_v26, 0.0 }
0x18d6   : > { %2601 = vadd.xlane.f32.xlu0 %v2600_v27 }
0x18d8   : > { %v4155_v29 = vpop.eup %4154 }
0x18d9   : > { %v4157_v30 = vpop.eup %4156  ;;  %v2606_v31 = vsel %vm1030_vm6, %v4155_v29, 0.0 }
0x18da   : > { %2607 = vadd.xlane.f32.xlu1 %v2606_v31  ;;  %v2603_v32 = vsel %vm1030_vm6, %v4157_v30, 0.0 }
0x18db   : > { %2604 = vadd.xlane.f32.xlu0 %v2603_v32 }
0x18eb   : > { %2617 = vrot.lane.b32.xlu1 %v4785_v55, %s5183_s24 }
0x18ef   : > { %2685 = vrot.lane.b32.xlu1 %v4781_v5, %s5184_s27 }
0x18f1   : > { %2619 = vrot.lane.b32.xlu0 %v4781_v5, %s5183_s24  ;;  %s3377_s24 = scalar_lea.sflag [#allocation3], %s701_s2 }
0x18f3   : > { %2683 = vrot.lane.b32.xlu1 %v4785_v55, %s5184_s27  ;;  %s4271_s27 = smov [#allocation2]  }
0x18f4   : > { %s4196_s8 = sshll.u32 %s4271_s27, 4  ;;  %s4197_s8 = int_to_ptr.vmem [resolvable:$false] %s4196_s8 }
0x18f5   : > { %2679 = vrot.lane.b32.xlu0 %v4785_v55, %s5185_s4 }
0x18f7   : > { %2681 = vrot.lane.b32.xlu1 %v4781_v5, %s5185_s4  ;;  %s5189_s4 = smov 24  }
0x195f   : > { %v2602_v33 = vpop.xlane.xlu0 %2601 }
0x1960   : > { %4158 = vrcp.f32 %v2602_v33 }
0x1963   : > { %v2608_v34 = vpop.xlane.xlu1 %2607 }
0x1964   : > { %v2605_v17 = vpop.xlane.xlu0 %2604  ;;  %4160 = vrcp.f32 %v2608_v34 }
0x1965   : > { %4162 = vrcp.f32 %v2605_v17 }
0x1967   : > { %v2618_v35 = vpop.permute.xlu1 %2617 }
0x1968   : > { %v2620_v14 = vpop.permute.xlu0 %2619 }
0x1969   : > { %v2629_v8 = vsel %vm1077_vm7, %v2620_v14, 0  ;;  %3938 = vmatprep.subr.msk.bf16.mxu1 %vm1077_vm7, %v2620_v14 }
0x196a   : > { %3851 = vmatpush3.bf16.msra.mxu1 %v2629_v8 }
0x196b   : > { %3852 = vmatprep.subr.bf16.mxu1 %v2618_v35  ;;  %v2686_v13 = vpop.permute.xlu1 %2685 }
0x196c   : > { %v2680_v47 = vpop.permute.xlu0 %2679  ;;  %v2697_v48 = vsel %vm963_vm4, %v2686_v13, 0 }
0x196d   : > { %v4159_v36 = vpop.eup %4158 }
0x196e   : > { %3853 = vmatpush3.bf16.msra.mxu1 %v2618_v35  ;;  %v2612_v40 = vmul.f32 %v4159_v36, %v4153_v26 }
0x196f   : > { %3939 = vmatprep.subr.msk.bf16.mxu1 %vm963_vm4, %v2686_v13  ;;  %v2684_v18 = vpop.permute.xlu1 %2683 }
0x1970   : > { %v2694_v49 = vsel %vm963_vm4, %v2684_v18, 0 }
0x1971   : > { %v4161_v37 = vpop.eup %4160 }
0x1972   : > { %v4163_v38 = vpop.eup %4162  ;;  %v2614_v39 = vmul.f32 %v4161_v37, %v4155_v29 }
0x1973   : > { %v2613_v42 = vmul.f32 %v4163_v38, %v4157_v30  ;;  %v2682_v11 = vpop.permute.xlu1 %2681 }
0x1974   : > { %v2616_v44 = vpack.c.bf16 %v2614_v39, %v2614_v39  ;;  %v4044_v39 = vld [vmem:[%s5175_s9 + $0x18] sm:$0xff]  }
0x1975   : > { %v2615_v45 = vpack.c.bf16 %v2613_v42, %v2612_v40  ;;  %v4045_v40 = vld [vmem:[%s5175_s9 + $0x10] sm:$0xff]  }
0x1977   : > { %3854 = vmatprep.mubr.msk.bf16.mxu1 %vm1030_vm6, %v2615_v45 }
0x1978   : > { %3855 = vmatmul.mubr.msk.bf16.vlgmr.msra.gmra.mxu1 %vm1030_vm6, %v2616_v44 }
0x1979   : > { %3859 = vmatpush3.bf16.xpose.msra.mxu1 %v2697_v48  ;;  %3862 = vmatprep.mubr.msk.bf16.mxu1 %vm963_vm4, %v2680_v47 }
0x197a   : > { %3940 = vmatprep.subr.msk.bf16.mxu1 %vm963_vm4, %v2684_v18 }
0x1981   : > { %3861 = vmatpush3.bf16.xpose.msra.mxu1 %v2694_v49 }
0x1988   : > { %3863 = vmatmul.mubr.msk.bf16.vlgmr.msra.gmra.mxu1 %vm963_vm4, %v2682_v11 }
0x1a38   : > { %v3856_v50 = vpop.f32.mrf.mxu1 }
0x1a3a   : > { %v2665_v52 = vpop.f32.mrf.mxu1 }
0x1a3c   : > { %v3857_v12 = vpop.f32.mrf.mxu1 }
0x1a3e   : > { %v2668_v54 = vpop.f32.mrf.mxu1 }
0x1a3f   : > { %v4018_v56 = vpack.i.bf16 %v2668_v54, %v2665_v52 }
0x1a48   : > { %v3864_v57 = vpop.f32.mrf.mxu1 }
0x1a49   : > { %v2749_v61 = vmul.f32 0.35355338, %v3864_v57 }
0x1a4a   : > { %v2733_v59 = vpop.f32.mrf.mxu1 }
0x1a4b   : > { %v2747_v62 = vmul.f32 0.35355338, %v2733_v59  ;;  %v2752_v2 = vadd.f32 %v2749_v61, %v4529_v28 }
0x1a4c   : > { %v3865_v41 = vpop.f32.mrf.mxu1 }
0x1a4d   : > { %v2750_v43 = vadd.f32 %v2747_v62, %v4529_v28  ;;  %v2759_v7 = vsel %vm1030_vm6, %v2752_v2, -inf }
0x1a4e   : > { %v2736_v0 = vpop.f32.mrf.mxu1 }
0x1a4f   : > { %v2748_v3 = vmul.f32 0.35355338, %v2736_v0  ;;  %v2753_v4 = vsel %vm1030_vm6, %v2750_v43, -inf }
0x1a50   : > { %2754 = vmax.xlane.f32.xlu0 %v2753_v4 }
0x1a51   : > { %v2751_v46 = vadd.f32 %v2748_v3, %v4529_v28 }
0x1a53   : > { %v2756_v15 = vsel %vm1030_vm6, %v2751_v46, -inf }
0x1a54   : > { %2760 = vmax.xlane.f32.xlu0 %v2759_v7  ;;  %2757 = vmax.xlane.f32.xlu1 %v2756_v15 }
0x1ad9   : > { %v2755_v19 = vpop.xlane.xlu0 %2754 }
0x1ada   : > { %v2762_v20 = vsub.f32 %v2750_v43, %v2755_v19  ;;  %v3534_v19 = vld [vmem:[%s5092_s10 + $0x1] ss:$0 sm:$0xff] }
0x1adc   : > { %v2765_v21 = vmul.f32 1.442695, %v2762_v20 }
0x1add   : > { %v2761_v22 = vpop.xlane.xlu0 %2760  ;;  %v2758_v23 = vpop.xlane.xlu1 %2757 }
0x1ade   : > { %4164 = vpow2.f32 %v2765_v21  ;;  %v2764_v25 = vsub.f32 %v2752_v2, %v2761_v22  ;;  %v2763_v26 = vsub.f32 %v2751_v46, %v2758_v23 }
0x1ae0   : > { %v2769_v27 = vmul.f32 1.442695, %v2764_v25  ;;  %v2767_v29 = vmul.f32 1.442695, %v2763_v26 }
0x1ae2   : > { %4166 = vpow2.f32 %v2769_v27 }
0x1ae3   : > { %4168 = vpow2.f32 %v2767_v29 }
0x1aeb   : > { %v4165_v30 = vpop.eup %4164 }
0x1aec   : > { %v2771_v28 = vsel %vm1030_vm6, %v4165_v30, 0.0 }
0x1aed   : > { %2772 = vadd.xlane.f32.xlu0 %v2771_v28 }
0x1aef   : > { %v4167_v31 = vpop.eup %4166 }
0x1af0   : > { %v4169_v32 = vpop.eup %4168  ;;  %v2777_v33 = vsel %vm1030_vm6, %v4167_v31, 0.0 }
0x1af1   : > { %2778 = vadd.xlane.f32.xlu1 %v2777_v33  ;;  %v2774_v34 = vsel %vm1030_vm6, %v4169_v32, 0.0 }
0x1af2   : > { %2775 = vadd.xlane.f32.xlu0 %v2774_v34 }
0x1b02   : > { %2788 = vrot.lane.b32.xlu1 %v4785_v55, %s5186_s29 }
0x1b06   : > { %4014 = vrot.lane.b32.xlu1 %v4013_v24, %s5187_s3 }
0x1b08   : > { %2790 = vrot.lane.b32.xlu0 %v4781_v5, %s5186_s29  ;;  %s702_s29 = scalar_lea.vmem [#allocation2], %s701_s2 }
0x1b0a   : > { %2857 = vrot.lane.b32.xlu1 %v4865_v16, %s5187_s3  ;;  %s3389_s3 = sshll.u32 %s702_s29, 4  ;;  %s5043_s3 = int_to_ptr.vmem [resolvable:$true] %s3389_s3 }
0x1b0b   : > { %p4199_p0 = scmp.lt.s32.totalorder %s5043_s3, %s4197_s8 }
0x1b0c   : > { %4019 = vrot.lane.b32.xlu0 %v4018_v56, %s5188_s0 }
0x1b0e   : > { %2869 = vrot.lane.b32.xlu1 %v3856_v50, %s5188_s0  ;;  %s4198_s0 = scalar_lea.vmem %s4197_s8, 32 }
0x1b76   : > { %v2773_v17 = vpop.xlane.xlu0 %2772 }
0x1b77   : > { %4170 = vrcp.f32 %v2773_v17 }
0x1b7a   : > { %v2779_v14 = vpop.xlane.xlu1 %2778 }
0x1b7b   : > { %v2776_v35 = vpop.xlane.xlu0 %2775  ;;  %4172 = vrcp.f32 %v2779_v14 }
0x1b7c   : > { %4174 = vrcp.f32 %v2776_v35 }
0x1b7e   : > { %v2789_v6 = vpop.permute.xlu1 %2788 }
0x1b7f   : > { %v2791_v55 = vpop.permute.xlu0 %2790 }
0x1b80   : > { %v2800_v51 = vsel %vm1077_vm7, %v2791_v55, 0  ;;  %3941 = vmatprep.subr.msk.bf16.mxu0 %vm1077_vm7, %v2791_v55 }
0x1b81   : > { %3867 = vmatpush3.bf16.msra.mxu0 %v2800_v51 }
0x1b82   : > { %3868 = vmatprep.subr.bf16.mxu0 %v2789_v6  ;;  %v4015_v18 = vpop.permute.xlu1 %4014 }
0x1b83   : > { %v4020_v11 = vpop.permute.xlu0 %4019  ;;  %v4017_v50 = vunpack.i.h.bf16 %v4015_v18  ;;  %v4016_v52 = vunpack.i.l.bf16 %v4015_v18 }
0x1b84   : > { %v4171_v5 = vpop.eup %4170  ;;  %v4022_v54 = vunpack.i.h.bf16 %v4020_v11  ;;  %v4021_v56 = vunpack.i.l.bf16 %v4020_v11  ;;  %v3541_v11 = vld [vmem:[%s5093_s11 + $0x1] ss:$0 sm:$0xff] }
0x1b85   : > { %3869 = vmatpush3.bf16.msra.mxu0 %v2789_v6  ;;  %v2783_v13 = vmul.f32 %v4171_v5, %v4165_v30  ;;  %v2887_v57 = vsel %vm963_vm4, %v4832_v53, %v4017_v50  ;;  %v2886_v59 = vsel %vm963_vm4, %v4830_v9, %v4016_v52 }
0x1b86   : > { %3874 = vmatprep.subr.bf16.mxu0 %v4044_v39  ;;  %v2858_v49 = vpop.permute.xlu1 %2857  ;;  %v2889_v4 = vsel %vm1681_vm8, %v2886_v59, %v4021_v56  ;;  %v2890_v46 = vsel %vm1681_vm8, %v2887_v57, %v4022_v54  ;;  %v3542_v57 = vld [vmem:[%s5094_s12 + $0x1] ss:$0 sm:$0xff] }
0x1b87   : > { %v2888_v62 = vsel %vm963_vm4, %v4828_v10, %v2858_v49 }
0x1b88   : > { %v4173_v16 = vpop.eup %4172 }
0x1b89   : > { %v4175_v24 = vpop.eup %4174  ;;  %v2785_v8 = vmul.f32 %v4173_v16, %v4167_v31 }
0x1b8a   : > { %v2784_v36 = vmul.f32 %v4175_v24, %v4169_v32  ;;  %v2870_v12 = vpop.permute.xlu1 %2869 }
0x1b8b   : > { %v2787_v37 = vpack.c.bf16 %v2785_v8, %v2785_v8  ;;  %v2891_v43 = vsel %vm1681_vm8, %v2888_v62, %v2870_v12 }
0x1b8c   : > { %v2786_v38 = vpack.c.bf16 %v2784_v36, %v2783_v13  ;;  %v4046_v13 = vld [vmem:[%s5095_s13 + $0x18] sm:$0xff]   ;;  %v4047_v36 = vld [vmem:[%s5095_s13 + $0x10] sm:$0xff]  }
0x1b8d   : > { %3882 = vmatprep.subr.bf16.mxu1 %v4046_v13 }
0x1b8e   : > { %3870 = vmatprep.mubr.msk.bf16.mxu0 %vm1030_vm6, %v2786_v38  ;;  %3883 = vmatpush3.bf16.msra.mxu1 %v4046_v13 }
0x1b8f   : > { %3871 = vmatmul.mubr.msk.bf16.vlgmr.msra.gmra.mxu0 %vm1030_vm6, %v2787_v37  ;;  %3884 = vmatprep.subr.bf16.mxu1 %v4047_v36 }
0x1b90   : > { %3875 = vmatpush3.bf16.msra.mxu0 %v4044_v39 }
0x1b91   : > { %3876 = vmatprep.subr.bf16.mxu0 %v4045_v40 }
0x1b92   : > { %3885 = vmatpush3.bf16.msra.mxu1 %v4047_v36 }
0x1b93   : > { %3902 = vmatprep.subr.bf16.mxu1 %v4254_v1 }
0x1b94   : > { %3877 = vmatpush3.bf16.msra.mxu0 %v4045_v40 }
0x1c4f   : > { %v3872_v42 = vpop.f32.mrf.mxu0 }
0x1c50   : > { %2881 = vrot.lane.b32.xlu1 %v3872_v42, %s5189_s4 }
0x1c51   : > { %v2836_v44 = vpop.f32.mrf.mxu0 }
0x1c53   : > { %v3873_v45 = vpop.f32.mrf.mxu0 }
0x1c55   : > { %v2839_v47 = vpop.f32.mrf.mxu0 }
0x1c56   : > { %v4023_v48 = vpack.i.bf16 %v2839_v47, %v2836_v44 }
0x1c58   : > { %4024 = vrot.lane.b32.xlu0 %v4023_v48, %s5189_s4  ;;  %s3575_s4 = sshll.u32 %s4413_s5, 4  ;;  %s4192_s5 = scalar_lea.vmem %s5043_s3, 16 }
0x1c59   : > { %s5041_s6 = scalar_lea.hbm %s5105_s23, %s3575_s4  ;;  %p4193_p11 = scmp.ne.s32.totalorder %s5043_s3, %s4192_s5 }
0x1c5a   : > { %p4200_p1 = scmp.lt.s32.totalorder %s4198_s0, %s4192_s5 }
0x1c5b   : > { %p4194_p12 = pnand %p4193_p11, %p4430_p5 }
0x1c5c   : > { %p4201_p2 = por %p4200_p1, %p4199_p0 }
0x1c5d   : > { %p4195_p13 = pneg %p4194_p12 }
0x1c5f   : > { %p4202_p3 = pnand %p4201_p2, %p4195_p13 }
0x1cc2   : > { %v2882_v61 = vpop.permute.xlu1 %2881 }
0x1cc3   : > { %v2894_v3 = vsel %vm1030_vm6, %v2891_v43, %v2882_v61 }
0x1cc4   : > { %v2901_v15 = vpack.c.bf16 %v2894_v3, %v2894_v3  ;;  %v4048_v3 = vld [vmem:[%s5097_s15 + $0x38] sm:$0xff]  }
0x1cc5   : > { %3890 = vmatprep.subr.bf16.mxu0 %v4048_v3 }
0x1cca   : > { %v4025_v41 = vpop.permute.xlu0 %4024 }
0x1ccb   : > { %v4027_v0 = vunpack.i.h.bf16 %v4025_v41  ;;  %v4026_v2 = vunpack.i.l.bf16 %v4025_v41 }
0x1ccd   : > { %v2892_v53 = vsel %vm1030_vm6, %v2889_v4, %v4026_v2  ;;  %v2893_v7 = vsel %vm1030_vm6, %v2890_v46, %v4027_v0  ;;  %v4049_v4 = vld [vmem:[%s5097_s15 + $0x30] sm:$0xff]   ;;  %v4050_v46 = vld [vmem:[%s5097_s15 + $0x28] sm:$0xff]  }
0x1cce   : > { %v2900_v9 = vpack.c.bf16 %v2893_v7, %v2892_v53  ;;  %v4051_v53 = vld [vmem:[%s5097_s15 + $0x20] sm:$0xff]  }
0x1ccf   : > { %v3548_v7 = vld [vmem:[%s5096_s14 + $0x1] ss:$0 sm:$0xff] }
0x1cd0   : > { %3878 = vmatprep.mubr.msk.bf16.mxu0 %vm817_vm3, %v2900_v9 }
0x1cd1   : > { %3879 = vmatmul.mubr.msk.bf16.vlgmr.msra.gmra.mxu0 %vm817_vm3, %v2901_v15 }
0x1cd2   : > { %3891 = vmatpush3.bf16.msra.mxu0 %v4048_v3 }
0x1cd3   : > { %3892 = vmatprep.subr.bf16.mxu0 %v4049_v4 }
0x1cd6   : > { %3893 = vmatpush3.bf16.msra.mxu0 %v4049_v4 }
0x1cd7   : > { %3894 = vmatprep.subr.bf16.mxu0 %v4050_v46 }
0x1cda   : > { %3895 = vmatpush3.bf16.msra.mxu0 %v4050_v46 }
0x1cdb   : > { %3896 = vmatprep.subr.bf16.mxu0 %v4051_v53 }
0x1cde   : > { %3897 = vmatpush3.bf16.msra.mxu0 %v4051_v53 }
0x1d91   : > { %v3880_v10 = vpop.f32.mrf.mxu0 }
0x1d92   : > { %v2971_v21 = vadd.f32 %v3880_v10, %v3534_v19 }
0x1d93   : > { %v2962_v20 = vpop.f32.mrf.mxu0 }
0x1d94   : > { %v2963_v22 = vadd.f32 %v3534_v19, %v2962_v20  ;;  %v4956_v27 = vadd.f32 %v2971_v21, %v4747_v60 }
0x1d95   : > { %v3881_v23 = vpop.f32.mrf.mxu0 }
0x1d96   : > { %v2976_v25 = vadd.f32 %v2963_v22, %v4745_v58  ;;  %v2989_v32 = vsel %vm817_vm3, %v4956_v27, 0.0 }
0x1d97   : > { %v2965_v26 = vpop.f32.mrf.mxu0 }
0x1d98   : > { %v2966_v29 = vadd.f32 %v3534_v19, %v2965_v26  ;;  %v2983_v30 = vsel %vm817_vm3, %v2976_v25, 0.0 }
0x1d99   : > { %2984 = vadd.xlane.f32.xlu0 %v2983_v30 }
0x1d9a   : > { %v2977_v28 = vadd.f32 %v2966_v29, %v4752_v63 }
0x1d9c   : > { %v2986_v31 = vsel %vm817_vm3, %v2977_v28, 0.0 }
0x1d9d   : > { %2987 = vadd.xlane.f32.xlu1 %v2986_v31  ;;  %2990 = vadd.xlane.f32.xlu0 %v2989_v32 }
0x1e22   : > { %v2985_v33 = vpop.xlane.xlu0 %2984 }
0x1e23   : > { %v2992_v34 = vmul.f32 0.03125, %v2985_v33 }
0x1e25   : > { %v2995_v58 = vsub.f32 %v2976_v25, %v2992_v34 }
0x1e26   : > { %v2988_v17 = vpop.xlane.xlu1 %2987  ;;  %v2991_v14 = vpop.xlane.xlu0 %2990 }
0x1e27   : > { %v2993_v60 = vmul.f32 0.03125, %v2988_v17  ;;  %v2994_v35 = vmul.f32 0.03125, %v2991_v14  ;;  %v2998_v55 = vmul.f32 %v2995_v58, %v2995_v58 }
0x1e29   : > { %v2996_v51 = vsub.f32 %v2977_v28, %v2993_v60  ;;  %v2997_v6 = vsub.f32 %v4956_v27, %v2994_v35  ;;  %v3001_v63 = vsel %vm817_vm3, %v2998_v55, 0.0 }
0x1e2a   : > { %3002 = vadd.xlane.f32.xlu0 %v3001_v63  ;;  %v3568_v63 = vld [vmem:[%s5098_s16 + $0x1] ss:$0 sm:$0xff] }
0x1e2b   : > { %v2999_v5 = vmul.f32 %v2996_v51, %v2996_v51  ;;  %v3000_v16 = vmul.f32 %v2997_v6, %v2997_v6 }
0x1e2d   : > { %v3004_v24 = vsel %vm817_vm3, %v2999_v5, 0.0  ;;  %v3007_v8 = vsel %vm817_vm3, %v3000_v16, 0.0 }
0x1e2e   : > { %3005 = vadd.xlane.f32.xlu0 %v3004_v24  ;;  %3008 = vadd.xlane.f32.xlu1 %v3007_v8 }
0x1eb3   : > { %v3003_v37 = vpop.xlane.xlu0 %3002 }
0x1eb4   : > { %v3010_v38 = vmul.f32 0.03125, %v3003_v37 }
0x1eb6   : > { %v3013_v39 = vadd.f32 1e-05, %v3010_v38 }
0x1eb7   : > { %v3009_v40 = vpop.xlane.xlu1 %3008  ;;  %v3006_v42 = vpop.xlane.xlu0 %3005 }
0x1eb8   : > { %4176 = vrsqrt.f32 %v3013_v39  ;;  %v3012_v44 = vmul.f32 0.03125, %v3009_v40  ;;  %v3011_v45 = vmul.f32 0.03125, %v3006_v42 }
0x1eba   : > { %v3015_v47 = vadd.f32 1e-05, %v3012_v44  ;;  %v3014_v48 = vadd.f32 1e-05, %v3011_v45  ;;  %v4052_v44 = vld [vmem:[%s5101_s19 + $0x8] sm:$0xff]  }
0x1ebc   : > { %4178 = vrsqrt.f32 %v3015_v47 }
0x1ebd   : > { %4180 = vrsqrt.f32 %v3014_v48 }
0x1ec5   : > { %v4177_v18 = vpop.eup %4176 }
0x1ec6   : > { %v3019_v49 = vmul.f32 %v4177_v18, %v2995_v58 }
0x1ec8   : > { %v3028_v56 = vmul.f32 %v3541_v11, %v3019_v49  ;;  %v3233_v49 = vld [vmem:[%s5099_s17] sm:$0x1] }
0x1ec9   : > { %v4179_v50 = vpop.eup %4178 }
0x1eca   : > { %v4181_v52 = vpop.eup %4180  ;;  %v3021_v12 = vmul.f32 %v4179_v50, %v2997_v6  ;;  %v3037_v41 = vadd.f32 %v3542_v57, %v3028_v56  ;;  %v3234_v50 = vld [vmem:[%s5100_s18] sm:$0x1]  ;;  %v4054_v56 = vld [vmem:[%s5103_s21 + $0x8] sm:$0xff]  }
0x1ecb   : > { %v3020_v54 = vmul.f32 %v4181_v52, %v2996_v51 }
0x1ecc   : > { %v3030_v59 = vmul.f32 %v3541_v11, %v3021_v12 }
0x1ecd   : > { %v3029_v61 = vmul.f32 %v3541_v11, %v3020_v54 }
0x1ece   : > { %v3039_v62 = vadd.f32 %v3542_v57, %v3030_v59  ;;  %v3256_v59 = vld [vmem:[%s5102_s20] sm:$0x1] }
0x1ecf   : > { %v3038_v43 = vadd.f32 %v3542_v57, %v3029_v61  ;;  %v4055_v57 = vld [vmem:[%s5103_s21] sm:$0xff]  }
0x1ed0   : > { %v3046_v0 = vpack.c.bf16 %v3039_v62, %v3039_v62 }
0x1ed1   : > { %v3045_v2 = vpack.c.bf16 %v3038_v43, %v3037_v41 }
0x1ed3   : > { %3886 = vmatprep.mubr.msk.bf16.mxu1 %vm817_vm3, %v3045_v2 }
0x1ed4   : > { %3887 = vmatmul.mubr.msk.bf16.vlgmr.msra.gmra.mxu1 %vm817_vm3, %v3046_v0 }
0x1ed5   : > { %3906 = vmatprep.mubr.msk.bf16.mxu1 %vm4255_vm0, %v4254_v1  ;;  %3903 = vmatpush3.bf16.msra.mxu1 %v4052_v44 }
0x1ed6   : > { %3904 = vmatprep.subr.bf16.mxu1 %v4254_v1 }
0x1f94   : > { %v3888_v9 = vpop.f32.mrf.mxu1 }
0x1f95   : > { %v3116_v15 = vadd.f32 %v3888_v9, %v3548_v7 }
0x1f96   : > { %v3107_v10 = vpop.f32.mrf.mxu1 }
0x1f97   : > { %v3126_v19 = vmul.f32 0.70710677, %v3116_v15  ;;  %v3108_v20 = vadd.f32 %v3548_v7, %v3107_v10  ;;  %v3123_v33 = vmul.f32 0.5, %v3116_v15 }
0x1f98   : > { %v3889_v21 = vpop.f32.mrf.mxu1 }
0x1f99   : > { %v3124_v22 = vmul.f32 0.70710677, %v3108_v20  ;;  %4182 = verf.f32 %v3126_v19  ;;  %v3121_v34 = vmul.f32 0.5, %v3108_v20 }
0x1f9a   : > { %v3110_v23 = vpop.f32.mrf.mxu1 }
0x1f9b   : > { %4184 = verf.f32 %v3124_v22  ;;  %v3111_v25 = vadd.f32 %v3548_v7, %v3110_v23 }
0x1f9d   : > { %v3125_v26 = vmul.f32 0.70710677, %v3111_v25  ;;  %v3122_v58 = vmul.f32 0.5, %v3111_v25 }
0x1f9f   : > { %4186 = verf.f32 %v3125_v26 }
0x1fa6   : > { %v4183_v29 = vpop.eup %4182 }
0x1fa7   : > { %v3132_v28 = vadd.f32 1.0, %v4183_v29 }
0x1fa8   : > { %v4185_v30 = vpop.eup %4184 }
0x1fa9   : > { %v3130_v31 = vadd.f32 1.0, %v4185_v30  ;;  %v3135_v14 = vmul.f32 %v3132_v28, %v3123_v33 }
0x1fab   : > { %v3133_v60 = vmul.f32 %v3130_v31, %v3121_v34  ;;  %v3146_v51 = vpack.c.bf16 %v3135_v14, %v3135_v14 }
0x1fac   : > { %v4187_v32 = vpop.eup %4186 }
0x1fad   : > { %v3131_v17 = vadd.f32 1.0, %v4187_v32 }
0x1faf   : > { %v3134_v35 = vmul.f32 %v3131_v17, %v3122_v58 }
0x1fb1   : > { %v3145_v55 = vpack.c.bf16 %v3134_v35, %v3133_v60 }
0x1fb3   : > { %3898 = vmatprep.mubr.msk.bf16.mxu0 %vm751_vm1, %v3145_v55 }
0x1fb4   : > { %3899 = vmatmul.mubr.msk.bf16.vlgmr.msra.gmra.mxu0 %vm751_vm1, %v3146_v51 }
0x2074   : > { %v3900_v6 = vpop.f32.mrf.mxu0 }
0x2075   : > { %v3223_v5 = vadd.f32 %v3900_v6, %v4956_v27  ;;  %v4053_v27 = vld [vmem:[%s5101_s19] sm:$0xff]  }
0x2076   : > { %v3211_v16 = vpop.f32.mrf.mxu0  ;;  %3905 = vmatpush3.bf16.msra.mxu1 %v4053_v27 }
0x2077   : > { %v3232_v24 = vadd.f32 %v3568_v63, %v3223_v5  ;;  %3910 = vmatprep.subr.bf16.mxu1 %v4254_v1 }
0x2078   : > { %v3901_v8 = vpop.f32.mrf.mxu0 }
0x2079   : > { %v3236_v13 = vsel %vm3235_vm9, %v3232_v24, 0.0 }
0x207a   : > { %3237 = vadd.xlane.f32.xlu0 %v3236_v13  ;;  %v3213_v36 = vpop.f32.mrf.mxu0 }
0x2103   : > { %v3238_v37 = vpop.xlane.xlu0 %3237 }
0x2104   : > { %v3239_v38 = vmul.f32 0.03125, %v3238_v37 }
0x2106   : > { %v3240_v39 = vsub.f32 %v3232_v24, %v3239_v38 }
0x2108   : > { %v3241_v40 = vmul.f32 %v3240_v39, %v3240_v39 }
0x210a   : > { %v3242_v42 = vsel %vm3235_vm9, %v3241_v40, 0.0 }
0x210b   : > { %3243 = vadd.xlane.f32.xlu1 %v3242_v42 }
0x2194   : > { %v3244_v45 = vpop.xlane.xlu1 %3243 }
0x2195   : > { %v3245_v47 = vmul.f32 0.03125, %v3244_v45 }
0x2197   : > { %v3246_v48 = vadd.f32 1e-05, %v3245_v47 }
0x2199   : > { %4188 = vrsqrt.f32 %v3246_v48 }
0x21a6   : > { %v4189_v18 = vpop.eup %4188 }
0x21a7   : > { %v3248_v11 = vmul.f32 %v4189_v18, %v3240_v39 }
0x21a9   : > { %v3249_v52 = vmul.f32 %v3248_v11, %v3233_v49 }
0x21ab   : > { %v3250_v12 = vadd.f32 %v3249_v52, %v3234_v50 }
0x21ad   : > { %v3255_v54 = vpack.c.bf16 %v3250_v12, %v3250_v12 }
0x21af   : > { %3907 = vmatmul.mubr.msk.bf16.vlgmr.msra.gmra.mxu1 %vm817_vm3, %v3255_v54 }
0x21b0   : > { %3914 = vmatprep.mubr.msk.bf16.mxu1 %vm4255_vm0, %v4254_v1  ;;  %3911 = vmatpush3.bf16.msra.mxu1 %v4054_v56 }
0x21b1   : > { %3912 = vmatprep.subr.bf16.mxu1 %v4254_v1  ;;  %v3318_v1 = vld [vmem:[%s5104_s22] sm:$0x1] }
0x21b4   : > { %3913 = vmatpush3.bf16.msra.mxu1 %v4055_v57 }
0x226f   : > { %v3306_v61 = vpop.f32.mrf.mxu1 }
0x2270   : > { %v3307_v62 = vadd.f32 %v3306_v61, %v3256_v59 }
0x2271   : > { %v3908_v41 = vpop.f32.mrf.mxu1 }
0x2272   : > { %4190 = vtanh.f32 %v3307_v62 }
0x2273   : > { %v3309_v43 = vpop.f32.mrf.mxu1 }
0x2275   : > { %v3909_v0 = vpop.f32.mrf.mxu1 }
0x227f   : > { %v4191_v2 = vpop.eup %4190 }
0x2280   : > { %v3317_v3 = vpack.c.bf16 %v4191_v2, %v4191_v2 }
0x2282   : > { %3915 = vmatmul.mubr.msk.bf16.vlgmr.msra.gmra.mxu1 %vm817_vm3, %v3317_v3 }
0x2342   : > { %v3368_v4 = vpop.f32.mrf.mxu1 }
0x2343   : > { %v3369_v46 = vadd.f32 %v3368_v4, %v3318_v1 }
0x2344   : > { %v3916_v53 = vpop.f32.mrf.mxu1 }
0x2345   : > { %3375 = vst.msk [vmem:[%s702_s29] sm:$0x1] %vm3374_vm10, %v3369_v46 }
0x2346   : > { %v3371_v7 = vpop.f32.mrf.mxu1 }
0x2347   : > { %4205 = shalt.err (!%p4202_p3)
}
0x2348   : > { %s4206_s4 = scalar_lea.hbm %s5041_s6, 16  ;;  %s4210_s1 = scalar_lea.hbm %s5105_s23, 32 }
0x2349   : > { %p4207_p4 = scmp.ne.s32.totalorder %s5041_s6, %s4206_s4  ;;  %p4211_p9 = scmp.lt.s32.totalorder %s5041_s6, %s5105_s23 }
0x234a   : > { %p4212_p10 = scmp.lt.s32.totalorder %s4210_s1, %s4206_s4 }
0x234b   : > { %p4208_p7 = pnand %p4207_p4, %p4430_p5 }
0x234c   : > { %p4213_p11 = por %p4212_p10, %p4211_p9 }
0x234d   : > { %p4209_p8 = pneg %p4208_p7 }
0x234f   : > { %p4214_p12 = pnand %p4213_p11, %p4209_p8 }
0x2351   : > { %4217 = shalt.err (!%p4214_p12)
}
0x2352   : > { %3942 = dma.vmem_to_hbm [thread:$0]  (%p4430_p5), %s5043_s3, 16, %s5041_s6, %s3377_s24   ;;  %v3917_v9 = vpop.f32.mrf.mxu1 }
0x2353 PF: > { %s5190_s8 = sld [smem:[#allocation5_spill]]  ;;  %p3948_p13 = scmp.ge.s32.totalorder %s4252_s25, 2 }
0x2355   : > { %p3945_p0 = pnand %p3948_p13, %p4434_p6 }
0x2357   : > { %p3946_p1 = pneg %p3945_p0 }
0x2359   : > { %s3401_s0 = sand.u32 1, %s5190_s8  }
0x235a   : > { %s3402_s9 = scalar_lea.sflag [#allocation3], %s3401_s0 }
0x235b   : > { %4235 = dma.done.wait (%p3946_p1), %s3402_s9, 16  }
0x235c   : > { %4237 = vsyncadd (%p3946_p1), %s3402_s9, 4294967280  ;;  %s5192_s25 = sld [smem:[#allocation7_spill]]  ;;  %s5195_s4 = smov %s4244_s30 }
0x235d   : > { %s5193_s2 = sld [smem:[#allocation6_spill]] }
0x235e   : > { %s5194_s24 = sld [smem:[#allocation8_spill]] }
0x2362   : > { %p33_p2 = scmp.ge.s32.totalorder %s5192_s25, 4  }
0x2363   : > { %s5196_s30 = smov %s5193_s2 }
0x2364   :  { %35 = sbr.rel (!%p33_p2) target bundleno = 14 (0xe), region = 159 }
0x2369   :  { %3406 = vsyncpa [#allocation3], 1 }
0x236a   :  { %3408 = vsyncpa [#allocation3 + $0x1], 1 }

</bundles_post_ra>
